<compile_context>
chip_gen: v5e
topology: v5e:2x2
jax: 0.10.0
libtpu: 0.0.40
codegen_flags: <defaults>
</compile_context>

<pallas_src>
import functools

import jax
import jax.numpy as jnp
import numpy as np
from jax.experimental import pallas as pl
from jax.experimental.pallas import tpu as pltpu

_NEG_INF = -1e30


def _round_up(x, m):
    return ((x + m - 1) // m) * m


def pcrnn_kernel(x_ref,                                   # (T*Bp, E) time-major, flattened
                 wih0_ref, whh0_ref, bx0_ref, bhn0_ref,   # layer 0 fused weights/biases
                 wih1_ref, whh1_ref, bx1_ref, bhn1_ref,   # layer 1 fused weights/biases
                 wff_ref, bff_ref, wpc_ref, bpc_ref,      # head (lane-padded)
                 out_ref,                                 # (Bp, Pp) softmax probs
                 *, T, Bp):
    Hp = whh0_ref.shape[0]

    # ---- hoist layer-0 input-to-hidden projection over ALL timesteps (one matmul) ----
    gx0_all = jnp.dot(x_ref[...], wih0_ref[...],
                      preferred_element_type=jnp.float32) + bx0_ref[...]       # (T*Bp, 3Hp)

    # hoist weight reads out of the unrolled loop
    whh0 = whh0_ref[...]
    bhn0 = bhn0_ref[...]
    wih1 = wih1_ref[...]
    bx1 = bx1_ref[...]
    whh1 = whh1_ref[...]
    bhn1 = bhn1_ref[...]

    def gru_step(gx, h_prev, whh, bhn):
        # gx already contains: W_ih x + b_ih (+ b_hh for the r,z gates)
        gh = jnp.dot(h_prev, whh, preferred_element_type=jnp.float32)          # (Bp, 3Hp)
        r = jax.nn.sigmoid(gx[:, 0:Hp] + gh[:, 0:Hp])
        z = jax.nn.sigmoid(gx[:, Hp:2 * Hp] + gh[:, Hp:2 * Hp])
        n = jnp.tanh(gx[:, 2 * Hp:] + r * (gh[:, 2 * Hp:] + bhn))
        return (1.0 - z) * n + z * h_prev

    h0 = jnp.zeros((Bp, Hp), jnp.float32)
    h1 = jnp.zeros((Bp, Hp), jnp.float32)

    # T is small & static -> fully unrolled recurrence (no loop overhead, static
    # sublane-aligned slices since Bp is a multiple of 8).
    for t in range(T):
        gx0 = gx0_all[t * Bp:(t + 1) * Bp]                                     # (Bp, 3Hp)
        h0 = gru_step(gx0, h0, whh0, bhn0)
        gx1 = jnp.dot(h0, wih1, preferred_element_type=jnp.float32) + bx1      # (Bp, 3Hp)
        h1 = gru_step(gx1, h1, whh1, bhn1)

    # ---- head: ff -> ff_pcs -> softmax over the (padded) pc axis ----
    ff = jnp.dot(h1, wff_ref[...], preferred_element_type=jnp.float32) + bff_ref[...]
    # padded pc columns carry a -1e30 bias -> exp underflows to exactly 0, so the
    # softmax normalization only sees the real n_pcs lanes.
    logits = jnp.dot(ff, wpc_ref[...], preferred_element_type=jnp.float32) + bpc_ref[...]
    m = jnp.max(logits, axis=-1, keepdims=True)
    e = jnp.exp(logits - m)
    denom = jnp.sum(e, axis=-1, keepdims=True)
    out_ref[...] = e * pl.reciprocal(denom, approx=True)


def _fuse_pad_gru(wih, whh, bih, bhh, in_rows, hp):
    """Fuse (r,z,n) gate weights along lanes, zero-padding hidden lanes to hp and
    the wih input-row dim to in_rows.  PyTorch gate order (r, z, n)."""
    h = whh.shape[-1]
    pad_h = hp - h

    def padc(w):                                   # pad gate lane width H -> Hp
        return jnp.pad(w, ((0, 0), (0, pad_h)))

    wih_cat = jnp.concatenate([padc(wih[g]) for g in range(3)], axis=1)   # (in, 3Hp)
    wih_cat = jnp.pad(wih_cat, ((0, in_rows - wih.shape[1]), (0, 0)))     # (in_rows, 3Hp)
    whh_cat = jnp.concatenate([padc(whh[g]) for g in range(3)], axis=1)   # (H, 3Hp)
    whh_cat = jnp.pad(whh_cat, ((0, pad_h), (0, 0)))                      # (Hp, 3Hp)
    # fold biases: r,z get (bih + bhh) once on the x path; n keeps bih on the x path
    # and bhh_n separate (must be added before the r* multiply).
    bx = jnp.concatenate([padc(bih[0] + bhh[0]),
                          padc(bih[1] + bhh[1]),
                          padc(bih[2])], axis=1)                          # (1, 3Hp)
    bhn = padc(bhh[2])                                                    # (1, Hp)
    return wih_cat, whh_cat, bx, bhn


@jax.jit
def pcrnn_forward(pc_history, params):
    # Embedding lookup + weight fusion/padding are glue (would be precomputed /
    # constant-folded in a real deployment); everything else runs in the kernel.
    x = params['embedding'][pc_history].astype(jnp.float32)      # (B, T, E)
    x = jnp.transpose(x, (1, 0, 2))                               # (T, B, E) time-major
    T, B, E = x.shape

    Bp = _round_up(B, 8)                                          # sublane-aligned batch
    x = jnp.pad(x, ((0, 0), (0, Bp - B), (0, 0)))                 # (T, Bp, E)
    x_flat = x.reshape(T * Bp, E)

    H = params['whh0'].shape[-1]
    FF = params['wff'].shape[-1]                                  # 2H
    n_pcs = params['wpc'].shape[-1]
    Hp = _round_up(H, 128)
    FFp = _round_up(FF, 128)
    Pp = _round_up(n_pcs, 128)

    wih0c, whh0c, bx0, bhn0 = _fuse_pad_gru(
        params['wih0'], params['whh0'], params['bih0'], params['bhh0'], in_rows=E, hp=Hp)
    wih1c, whh1c, bx1, bhn1 = _fuse_pad_gru(
        params['wih1'], params['whh1'], params['bih1'], params['bhh1'], in_rows=Hp, hp=Hp)

    wff_p = jnp.pad(params['wff'], ((0, Hp - H), (0, FFp - FF)))
    bff_p = jnp.pad(params['bff'], ((0, 0), (0, FFp - FF)))
    wpc_p = jnp.pad(params['wpc'], ((0, FFp - FF), (0, Pp - n_pcs)))
    # padded pc lanes get a huge negative bias -> excluded from the softmax.
    bpc_p = jnp.pad(params['bpc'], ((0, 0), (0, Pp - n_pcs)), constant_values=_NEG_INF)

    args = (x_flat,
            wih0c, whh0c, bx0, bhn0,
            wih1c, whh1c, bx1, bhn1,
            wff_p, bff_p, wpc_p, bpc_p)

    out_pad = pl.pallas_call(
        functools.partial(pcrnn_kernel, T=T, Bp=Bp),
        out_shape=jax.ShapeDtypeStruct((Bp, Pp), jnp.float32),
        in_specs=[pl.BlockSpec(memory_space=pltpu.MemorySpace.VMEM)
                  for _ in range(len(args))],
        out_specs=pl.BlockSpec(memory_space=pltpu.MemorySpace.VMEM),
    )(*args)

    return {'next_pc': out_pad[:B, :n_pcs]}


def init_params(key, n_pcs, pc_emb_size, hidden):
    keys = jax.random.split(key, 12)
    k = 1.0 / np.sqrt(hidden)

    def uni(kk, shape, scale):
        return jax.random.uniform(kk, shape, jnp.float32, -scale, scale)

    def xavier(kk, shape):
        a = np.sqrt(6.0 / (shape[0] + shape[1]))
        return jax.random.uniform(kk, shape, jnp.float32, -a, a)

    return {
        'embedding': jax.random.normal(keys[0], (n_pcs, pc_emb_size), jnp.float32),
        # GRU layer 0 (input size = pc_emb_size), PyTorch gate order (r, z, n)
        'wih0': uni(keys[1], (3, pc_emb_size, hidden), k),
        'whh0': uni(keys[2], (3, hidden, hidden), k),
        'bih0': uni(keys[3], (3, 1, hidden), k),
        'bhh0': uni(keys[4], (3, 1, hidden), k),
        # GRU layer 1 (input size = hidden)
        'wih1': uni(keys[5], (3, hidden, hidden), k),
        'whh1': uni(keys[6], (3, hidden, hidden), k),
        'bih1': uni(keys[7], (3, 1, hidden), k),
        'bhh1': uni(keys[8], (3, 1, hidden), k),
        # heads (xavier-uniform like the torch init)
        'wff': xavier(keys[9], (hidden, 2 * hidden)),
        'bff': uni(keys[10], (1, 2 * hidden), k),
        'wpc': xavier(keys[11], (2 * hidden, n_pcs)),
        'bpc': jnp.zeros((1, n_pcs), jnp.float32),
    }


def reference_forward(pc_history, params):
    """Pure-JAX reference (unfused, unpadded) for correctness checking."""
    x = params['embedding'][pc_history].astype(jnp.float32)      # (B, T, E)
    B, T, _ = x.shape
    H = params['whh0'].shape[-1]

    def cell(x_t, h, wih, whh, bih, bhh):
        r = jax.nn.sigmoid(x_t @ wih[0] + bih[0] + h @ whh[0] + bhh[0])
        z = jax.nn.sigmoid(x_t @ wih[1] + bih[1] + h @ whh[1] + bhh[1])
        n = jnp.tanh(x_t @ wih[2] + bih[2] + r * (h @ whh[2] + bhh[2]))
        return (1.0 - z) * n + z * h

    h0 = jnp.zeros((B, H), jnp.float32)
    h1 = jnp.zeros((B, H), jnp.float32)
    for t in range(T):
        h0 = cell(x[:, t], h0, params['wih0'], params['whh0'], params['bih0'], params['bhh0'])
        h1 = cell(h0, h1, params['wih1'], params['whh1'], params['bih1'], params['bhh1'])
    ff = h1 @ params['wff'] + params['bff']
    logits = ff @ params['wpc'] + params['bpc']
    return jax.nn.softmax(logits, axis=1)


if __name__ == "__main__":
    B, T = 2, 8
    pc_emb_size, hidden, n_pcs = 32, 32, 64

    key = jax.random.PRNGKey(0)
    kp, kx = jax.random.split(key)
    params = init_params(kp, n_pcs, pc_emb_size, hidden)
    pc_history = jax.random.randint(kx, (B, T), 0, n_pcs, dtype=jnp.int32)

    out = pcrnn_forward(pc_history, params)
    jax.block_until_ready(out['next_pc'])

    ref = reference_forward(pc_history, params)
    # tolerance allows for the EUP approx reciprocal in the softmax denominator
    np.testing.assert_allclose(np.asarray(out['next_pc']), np.asarray(ref),
                               rtol=5e-3, atol=1e-4)
    print("KERNEL_OK")
</pallas_src>

<mosaic_0001>
module attributes {stable_mosaic.version = 11 : i64} {
  func.func @pcrnn_kernel(%arg0: memref<64x32xf32, #tpu.memory_space<vmem>>, %arg1: memref<32x384xf32, #tpu.memory_space<vmem>>, %arg2: memref<128x384xf32, #tpu.memory_space<vmem>>, %arg3: memref<1x384xf32, #tpu.memory_space<vmem>>, %arg4: memref<1x128xf32, #tpu.memory_space<vmem>>, %arg5: memref<128x384xf32, #tpu.memory_space<vmem>>, %arg6: memref<128x384xf32, #tpu.memory_space<vmem>>, %arg7: memref<1x384xf32, #tpu.memory_space<vmem>>, %arg8: memref<1x128xf32, #tpu.memory_space<vmem>>, %arg9: memref<128x128xf32, #tpu.memory_space<vmem>>, %arg10: memref<1x128xf32, #tpu.memory_space<vmem>>, %arg11: memref<128x128xf32, #tpu.memory_space<vmem>>, %arg12: memref<1x128xf32, #tpu.memory_space<vmem>>, %arg13: memref<8x128xf32, #tpu.memory_space<vmem>>) attributes {dimension_semantics = [], scalar_prefetch = 0 : i64, scratch_operands = 0 : i64, tpu.core_type = #tpu.core_type<tc>} {
    %c0 = arith.constant 0 : index
    %c0_0 = arith.constant 0 : index
    %0 = vector.load %arg0[%c0, %c0_0] : memref<64x32xf32, #tpu.memory_space<vmem>>, vector<64x32xf32>
    %c0_1 = arith.constant 0 : index
    %c0_2 = arith.constant 0 : index
    %1 = vector.load %arg1[%c0_1, %c0_2] : memref<32x384xf32, #tpu.memory_space<vmem>>, vector<32x384xf32>
    %cst = arith.constant dense<0.000000e+00> : vector<64x384xf32>
    %2 = tpu.matmul %0, %1, %cst {dimension_numbers = #tpu.dot_dimension_numbers<[1], [0], [0], [1], [0, 0, 1, 1], [], []>} : vector<64x32xf32>, vector<32x384xf32>, vector<64x384xf32> -> vector<64x384xf32>
    %c0_3 = arith.constant 0 : index
    %c0_4 = arith.constant 0 : index
    %3 = vector.load %arg3[%c0_3, %c0_4] : memref<1x384xf32, #tpu.memory_space<vmem>>, vector<1x384xf32>
    %4 = vector.broadcast %3 : vector<1x384xf32> to vector<64x384xf32>
    %5 = arith.addf %2, %4 : vector<64x384xf32>
    %c0_5 = arith.constant 0 : index
    %c0_6 = arith.constant 0 : index
    %6 = vector.load %arg2[%c0_5, %c0_6] : memref<128x384xf32, #tpu.memory_space<vmem>>, vector<128x384xf32>
    %c0_7 = arith.constant 0 : index
    %c0_8 = arith.constant 0 : index
    %7 = vector.load %arg4[%c0_7, %c0_8] : memref<1x128xf32, #tpu.memory_space<vmem>>, vector<1x128xf32>
    %c0_9 = arith.constant 0 : index
    %c0_10 = arith.constant 0 : index
    %8 = vector.load %arg5[%c0_9, %c0_10] : memref<128x384xf32, #tpu.memory_space<vmem>>, vector<128x384xf32>
    %c0_11 = arith.constant 0 : index
    %c0_12 = arith.constant 0 : index
    %9 = vector.load %arg7[%c0_11, %c0_12] : memref<1x384xf32, #tpu.memory_space<vmem>>, vector<1x384xf32>
    %c0_13 = arith.constant 0 : index
    %c0_14 = arith.constant 0 : index
    %10 = vector.load %arg6[%c0_13, %c0_14] : memref<128x384xf32, #tpu.memory_space<vmem>>, vector<128x384xf32>
    %c0_15 = arith.constant 0 : index
    %c0_16 = arith.constant 0 : index
    %11 = vector.load %arg8[%c0_15, %c0_16] : memref<1x128xf32, #tpu.memory_space<vmem>>, vector<1x128xf32>
    %cst_17 = arith.constant 0.000000e+00 : f32
    %12 = vector.broadcast %cst_17 : f32 to vector<8x128xf32>
    %cst_18 = arith.constant 0.000000e+00 : f32
    %13 = vector.broadcast %cst_18 : f32 to vector<8x128xf32>
    %14 = vector.extract_strided_slice %5 {offsets = [0, 0], sizes = [8, 384], strides = [1, 1]} : vector<64x384xf32> to vector<8x384xf32>
    %cst_19 = arith.constant dense<0.000000e+00> : vector<8x384xf32>
    %15 = tpu.matmul %12, %6, %cst_19 {dimension_numbers = #tpu.dot_dimension_numbers<[1], [0], [0], [1], [0, 0, 1, 1], [], []>} : vector<8x128xf32>, vector<128x384xf32>, vector<8x384xf32> -> vector<8x384xf32>
    %16 = vector.extract_strided_slice %14 {offsets = [0, 0], sizes = [8, 128], strides = [1, 1]} : vector<8x384xf32> to vector<8x128xf32>
    %17 = vector.extract_strided_slice %15 {offsets = [0, 0], sizes = [8, 128], strides = [1, 1]} : vector<8x384xf32> to vector<8x128xf32>
    %18 = arith.addf %16, %17 : vector<8x128xf32>
    %19 = arith.negf %18 : vector<8x128xf32>
    %20 = math.exp %19 : vector<8x128xf32>
    %cst_20 = arith.constant 1.000000e+00 : f32
    %21 = vector.broadcast %cst_20 : f32 to vector<8x128xf32>
    %22 = arith.addf %21, %20 : vector<8x128xf32>
    %23 = arith.divf %21, %22 : vector<8x128xf32>
    %24 = vector.extract_strided_slice %14 {offsets = [0, 128], sizes = [8, 128], strides = [1, 1]} : vector<8x384xf32> to vector<8x128xf32>
    %25 = vector.extract_strided_slice %15 {offsets = [0, 128], sizes = [8, 128], strides = [1, 1]} : vector<8x384xf32> to vector<8x128xf32>
    %26 = arith.addf %24, %25 : vector<8x128xf32>
    %27 = arith.negf %26 : vector<8x128xf32>
    %28 = math.exp %27 : vector<8x128xf32>
    %cst_21 = arith.constant 1.000000e+00 : f32
    %29 = vector.broadcast %cst_21 : f32 to vector<8x128xf32>
    %30 = arith.addf %29, %28 : vector<8x128xf32>
    %31 = arith.divf %29, %30 : vector<8x128xf32>
    %32 = vector.extract_strided_slice %14 {offsets = [0, 256], sizes = [8, 128], strides = [1, 1]} : vector<8x384xf32> to vector<8x128xf32>
    %33 = vector.extract_strided_slice %15 {offsets = [0, 256], sizes = [8, 128], strides = [1, 1]} : vector<8x384xf32> to vector<8x128xf32>
    %34 = vector.broadcast %7 : vector<1x128xf32> to vector<8x128xf32>
    %35 = arith.addf %33, %34 : vector<8x128xf32>
    %36 = arith.mulf %23, %35 : vector<8x128xf32>
    %37 = arith.addf %32, %36 : vector<8x128xf32>
    %38 = math.tanh %37 : vector<8x128xf32>
    %cst_22 = arith.constant 1.000000e+00 : f32
    %39 = vector.broadcast %cst_22 : f32 to vector<8x128xf32>
    %40 = arith.subf %39, %31 : vector<8x128xf32>
    %41 = arith.mulf %40, %38 : vector<8x128xf32>
    %42 = arith.mulf %31, %12 : vector<8x128xf32>
    %43 = arith.addf %41, %42 : vector<8x128xf32>
    %cst_23 = arith.constant dense<0.000000e+00> : vector<8x384xf32>
    %44 = tpu.matmul %43, %8, %cst_23 {dimension_numbers = #tpu.dot_dimension_numbers<[1], [0], [0], [1], [0, 0, 1, 1], [], []>} : vector<8x128xf32>, vector<128x384xf32>, vector<8x384xf32> -> vector<8x384xf32>
    %45 = vector.broadcast %9 : vector<1x384xf32> to vector<8x384xf32>
    %46 = arith.addf %44, %45 : vector<8x384xf32>
    %cst_24 = arith.constant dense<0.000000e+00> : vector<8x384xf32>
    %47 = tpu.matmul %13, %10, %cst_24 {dimension_numbers = #tpu.dot_dimension_numbers<[1], [0], [0], [1], [0, 0, 1, 1], [], []>} : vector<8x128xf32>, vector<128x384xf32>, vector<8x384xf32> -> vector<8x384xf32>
    %48 = vector.extract_strided_slice %46 {offsets = [0, 0], sizes = [8, 128], strides = [1, 1]} : vector<8x384xf32> to vector<8x128xf32>
    %49 = vector.extract_strided_slice %47 {offsets = [0, 0], sizes = [8, 128], strides = [1, 1]} : vector<8x384xf32> to vector<8x128xf32>
    %50 = arith.addf %48, %49 : vector<8x128xf32>
    %51 = arith.negf %50 : vector<8x128xf32>
    %52 = math.exp %51 : vector<8x128xf32>
    %cst_25 = arith.constant 1.000000e+00 : f32
    %53 = vector.broadcast %cst_25 : f32 to vector<8x128xf32>
    %54 = arith.addf %53, %52 : vector<8x128xf32>
    %55 = arith.divf %53, %54 : vector<8x128xf32>
    %56 = vector.extract_strided_slice %46 {offsets = [0, 128], sizes = [8, 128], strides = [1, 1]} : vector<8x384xf32> to vector<8x128xf32>
    %57 = vector.extract_strided_slice %47 {offsets = [0, 128], sizes = [8, 128], strides = [1, 1]} : vector<8x384xf32> to vector<8x128xf32>
    %58 = arith.addf %56, %57 : vector<8x128xf32>
    %59 = arith.negf %58 : vector<8x128xf32>
    %60 = math.exp %59 : vector<8x128xf32>
    %cst_26 = arith.constant 1.000000e+00 : f32
    %61 = vector.broadcast %cst_26 : f32 to vector<8x128xf32>
    %62 = arith.addf %61, %60 : vector<8x128xf32>
    %63 = arith.divf %61, %62 : vector<8x128xf32>
    %64 = vector.extract_strided_slice %46 {offsets = [0, 256], sizes = [8, 128], strides = [1, 1]} : vector<8x384xf32> to vector<8x128xf32>
    %65 = vector.extract_strided_slice %47 {offsets = [0, 256], sizes = [8, 128], strides = [1, 1]} : vector<8x384xf32> to vector<8x128xf32>
    %66 = vector.broadcast %11 : vector<1x128xf32> to vector<8x128xf32>
    %67 = arith.addf %65, %66 : vector<8x128xf32>
    %68 = arith.mulf %55, %67 : vector<8x128xf32>
    %69 = arith.addf %64, %68 : vector<8x128xf32>
    %70 = math.tanh %69 : vector<8x128xf32>
    %cst_27 = arith.constant 1.000000e+00 : f32
    %71 = vector.broadcast %cst_27 : f32 to vector<8x128xf32>
    %72 = arith.subf %71, %63 : vector<8x128xf32>
    %73 = arith.mulf %72, %70 : vector<8x128xf32>
    %74 = arith.mulf %63, %13 : vector<8x128xf32>
    %75 = arith.addf %73, %74 : vector<8x128xf32>
    %76 = vector.extract_strided_slice %5 {offsets = [8, 0], sizes = [8, 384], strides = [1, 1]} : vector<64x384xf32> to vector<8x384xf32>
    %cst_28 = arith.constant dense<0.000000e+00> : vector<8x384xf32>
    %77 = tpu.matmul %43, %6, %cst_28 {dimension_numbers = #tpu.dot_dimension_numbers<[1], [0], [0], [1], [0, 0, 1, 1], [], []>} : vector<8x128xf32>, vector<128x384xf32>, vector<8x384xf32> -> vector<8x384xf32>
    %78 = vector.extract_strided_slice %76 {offsets = [0, 0], sizes = [8, 128], strides = [1, 1]} : vector<8x384xf32> to vector<8x128xf32>
    %79 = vector.extract_strided_slice %77 {offsets = [0, 0], sizes = [8, 128], strides = [1, 1]} : vector<8x384xf32> to vector<8x128xf32>
    %80 = arith.addf %78, %79 : vector<8x128xf32>
    %81 = arith.negf %80 : vector<8x128xf32>
    %82 = math.exp %81 : vector<8x128xf32>
    %cst_29 = arith.constant 1.000000e+00 : f32
    %83 = vector.broadcast %cst_29 : f32 to vector<8x128xf32>
    %84 = arith.addf %83, %82 : vector<8x128xf32>
    %85 = arith.divf %83, %84 : vector<8x128xf32>
    %86 = vector.extract_strided_slice %76 {offsets = [0, 128], sizes = [8, 128], strides = [1, 1]} : vector<8x384xf32> to vector<8x128xf32>
    %87 = vector.extract_strided_slice %77 {offsets = [0, 128], sizes = [8, 128], strides = [1, 1]} : vector<8x384xf32> to vector<8x128xf32>
    %88 = arith.addf %86, %87 : vector<8x128xf32>
    %89 = arith.negf %88 : vector<8x128xf32>
    %90 = math.exp %89 : vector<8x128xf32>
    %cst_30 = arith.constant 1.000000e+00 : f32
    %91 = vector.broadcast %cst_30 : f32 to vector<8x128xf32>
    %92 = arith.addf %91, %90 : vector<8x128xf32>
    %93 = arith.divf %91, %92 : vector<8x128xf32>
    %94 = vector.extract_strided_slice %76 {offsets = [0, 256], sizes = [8, 128], strides = [1, 1]} : vector<8x384xf32> to vector<8x128xf32>
    %95 = vector.extract_strided_slice %77 {offsets = [0, 256], sizes = [8, 128], strides = [1, 1]} : vector<8x384xf32> to vector<8x128xf32>
    %96 = vector.broadcast %7 : vector<1x128xf32> to vector<8x128xf32>
    %97 = arith.addf %95, %96 : vector<8x128xf32>
    %98 = arith.mulf %85, %97 : vector<8x128xf32>
    %99 = arith.addf %94, %98 : vector<8x128xf32>
    %100 = math.tanh %99 : vector<8x128xf32>
    %cst_31 = arith.constant 1.000000e+00 : f32
    %101 = vector.broadcast %cst_31 : f32 to vector<8x128xf32>
    %102 = arith.subf %101, %93 : vector<8x128xf32>
    %103 = arith.mulf %102, %100 : vector<8x128xf32>
    %104 = arith.mulf %93, %43 : vector<8x128xf32>
    %105 = arith.addf %103, %104 : vector<8x128xf32>
    %cst_32 = arith.constant dense<0.000000e+00> : vector<8x384xf32>
    %106 = tpu.matmul %105, %8, %cst_32 {dimension_numbers = #tpu.dot_dimension_numbers<[1], [0], [0], [1], [0, 0, 1, 1], [], []>} : vector<8x128xf32>, vector<128x384xf32>, vector<8x384xf32> -> vector<8x384xf32>
    %107 = vector.broadcast %9 : vector<1x384xf32> to vector<8x384xf32>
    %108 = arith.addf %106, %107 : vector<8x384xf32>
    %cst_33 = arith.constant dense<0.000000e+00> : vector<8x384xf32>
    %109 = tpu.matmul %75, %10, %cst_33 {dimension_numbers = #tpu.dot_dimension_numbers<[1], [0], [0], [1], [0, 0, 1, 1], [], []>} : vector<8x128xf32>, vector<128x384xf32>, vector<8x384xf32> -> vector<8x384xf32>
    %110 = vector.extract_strided_slice %108 {offsets = [0, 0], sizes = [8, 128], strides = [1, 1]} : vector<8x384xf32> to vector<8x128xf32>
    %111 = vector.extract_strided_slice %109 {offsets = [0, 0], sizes = [8, 128], strides = [1, 1]} : vector<8x384xf32> to vector<8x128xf32>
    %112 = arith.addf %110, %111 : vector<8x128xf32>
    %113 = arith.negf %112 : vector<8x128xf32>
    %114 = math.exp %113 : vector<8x128xf32>
    %cst_34 = arith.constant 1.000000e+00 : f32
    %115 = vector.broadcast %cst_34 : f32 to vector<8x128xf32>
    %116 = arith.addf %115, %114 : vector<8x128xf32>
    %117 = arith.divf %115, %116 : vector<8x128xf32>
    %118 = vector.extract_strided_slice %108 {offsets = [0, 128], sizes = [8, 128], strides = [1, 1]} : vector<8x384xf32> to vector<8x128xf32>
    %119 = vector.extract_strided_slice %109 {offsets = [0, 128], sizes = [8, 128], strides = [1, 1]} : vector<8x384xf32> to vector<8x128xf32>
    %120 = arith.addf %118, %119 : vector<8x128xf32>
    %121 = arith.negf %120 : vector<8x128xf32>
    %122 = math.exp %121 : vector<8x128xf32>
    %cst_35 = arith.constant 1.000000e+00 : f32
    %123 = vector.broadcast %cst_35 : f32 to vector<8x128xf32>
    %124 = arith.addf %123, %122 : vector<8x128xf32>
    %125 = arith.divf %123, %124 : vector<8x128xf32>
    %126 = vector.extract_strided_slice %108 {offsets = [0, 256], sizes = [8, 128], strides = [1, 1]} : vector<8x384xf32> to vector<8x128xf32>
    %127 = vector.extract_strided_slice %109 {offsets = [0, 256], sizes = [8, 128], strides = [1, 1]} : vector<8x384xf32> to vector<8x128xf32>
    %128 = vector.broadcast %11 : vector<1x128xf32> to vector<8x128xf32>
    %129 = arith.addf %127, %128 : vector<8x128xf32>
    %130 = arith.mulf %117, %129 : vector<8x128xf32>
    %131 = arith.addf %126, %130 : vector<8x128xf32>
    %132 = math.tanh %131 : vector<8x128xf32>
    %cst_36 = arith.constant 1.000000e+00 : f32
    %133 = vector.broadcast %cst_36 : f32 to vector<8x128xf32>
    %134 = arith.subf %133, %125 : vector<8x128xf32>
    %135 = arith.mulf %134, %132 : vector<8x128xf32>
    %136 = arith.mulf %125, %75 : vector<8x128xf32>
    %137 = arith.addf %135, %136 : vector<8x128xf32>
    %138 = vector.extract_strided_slice %5 {offsets = [16, 0], sizes = [8, 384], strides = [1, 1]} : vector<64x384xf32> to vector<8x384xf32>
    %cst_37 = arith.constant dense<0.000000e+00> : vector<8x384xf32>
    %139 = tpu.matmul %105, %6, %cst_37 {dimension_numbers = #tpu.dot_dimension_numbers<[1], [0], [0], [1], [0, 0, 1, 1], [], []>} : vector<8x128xf32>, vector<128x384xf32>, vector<8x384xf32> -> vector<8x384xf32>
    %140 = vector.extract_strided_slice %138 {offsets = [0, 0], sizes = [8, 128], strides = [1, 1]} : vector<8x384xf32> to vector<8x128xf32>
    %141 = vector.extract_strided_slice %139 {offsets = [0, 0], sizes = [8, 128], strides = [1, 1]} : vector<8x384xf32> to vector<8x128xf32>
    %142 = arith.addf %140, %141 : vector<8x128xf32>
    %143 = arith.negf %142 : vector<8x128xf32>
    %144 = math.exp %143 : vector<8x128xf32>
    %cst_38 = arith.constant 1.000000e+00 : f32
    %145 = vector.broadcast %cst_38 : f32 to vector<8x128xf32>
    %146 = arith.addf %145, %144 : vector<8x128xf32>
    %147 = arith.divf %145, %146 : vector<8x128xf32>
    %148 = vector.extract_strided_slice %138 {offsets = [0, 128], sizes = [8, 128], strides = [1, 1]} : vector<8x384xf32> to vector<8x128xf32>
    %149 = vector.extract_strided_slice %139 {offsets = [0, 128], sizes = [8, 128], strides = [1, 1]} : vector<8x384xf32> to vector<8x128xf32>
    %150 = arith.addf %148, %149 : vector<8x128xf32>
    %151 = arith.negf %150 : vector<8x128xf32>
    %152 = math.exp %151 : vector<8x128xf32>
    %cst_39 = arith.constant 1.000000e+00 : f32
    %153 = vector.broadcast %cst_39 : f32 to vector<8x128xf32>
    %154 = arith.addf %153, %152 : vector<8x128xf32>
    %155 = arith.divf %153, %154 : vector<8x128xf32>
    %156 = vector.extract_strided_slice %138 {offsets = [0, 256], sizes = [8, 128], strides = [1, 1]} : vector<8x384xf32> to vector<8x128xf32>
    %157 = vector.extract_strided_slice %139 {offsets = [0, 256], sizes = [8, 128], strides = [1, 1]} : vector<8x384xf32> to vector<8x128xf32>
    %158 = vector.broadcast %7 : vector<1x128xf32> to vector<8x128xf32>
    %159 = arith.addf %157, %158 : vector<8x128xf32>
    %160 = arith.mulf %147, %159 : vector<8x128xf32>
    %161 = arith.addf %156, %160 : vector<8x128xf32>
    %162 = math.tanh %161 : vector<8x128xf32>
    %cst_40 = arith.constant 1.000000e+00 : f32
    %163 = vector.broadcast %cst_40 : f32 to vector<8x128xf32>
    %164 = arith.subf %163, %155 : vector<8x128xf32>
    %165 = arith.mulf %164, %162 : vector<8x128xf32>
    %166 = arith.mulf %155, %105 : vector<8x128xf32>
    %167 = arith.addf %165, %166 : vector<8x128xf32>
    %cst_41 = arith.constant dense<0.000000e+00> : vector<8x384xf32>
    %168 = tpu.matmul %167, %8, %cst_41 {dimension_numbers = #tpu.dot_dimension_numbers<[1], [0], [0], [1], [0, 0, 1, 1], [], []>} : vector<8x128xf32>, vector<128x384xf32>, vector<8x384xf32> -> vector<8x384xf32>
    %169 = vector.broadcast %9 : vector<1x384xf32> to vector<8x384xf32>
    %170 = arith.addf %168, %169 : vector<8x384xf32>
    %cst_42 = arith.constant dense<0.000000e+00> : vector<8x384xf32>
    %171 = tpu.matmul %137, %10, %cst_42 {dimension_numbers = #tpu.dot_dimension_numbers<[1], [0], [0], [1], [0, 0, 1, 1], [], []>} : vector<8x128xf32>, vector<128x384xf32>, vector<8x384xf32> -> vector<8x384xf32>
    %172 = vector.extract_strided_slice %170 {offsets = [0, 0], sizes = [8, 128], strides = [1, 1]} : vector<8x384xf32> to vector<8x128xf32>
    %173 = vector.extract_strided_slice %171 {offsets = [0, 0], sizes = [8, 128], strides = [1, 1]} : vector<8x384xf32> to vector<8x128xf32>
    %174 = arith.addf %172, %173 : vector<8x128xf32>
    %175 = arith.negf %174 : vector<8x128xf32>
    %176 = math.exp %175 : vector<8x128xf32>
    %cst_43 = arith.constant 1.000000e+00 : f32
    %177 = vector.broadcast %cst_43 : f32 to vector<8x128xf32>
    %178 = arith.addf %177, %176 : vector<8x128xf32>
    %179 = arith.divf %177, %178 : vector<8x128xf32>
    %180 = vector.extract_strided_slice %170 {offsets = [0, 128], sizes = [8, 128], strides = [1, 1]} : vector<8x384xf32> to vector<8x128xf32>
    %181 = vector.extract_strided_slice %171 {offsets = [0, 128], sizes = [8, 128], strides = [1, 1]} : vector<8x384xf32> to vector<8x128xf32>
    %182 = arith.addf %180, %181 : vector<8x128xf32>
    %183 = arith.negf %182 : vector<8x128xf32>
    %184 = math.exp %183 : vector<8x128xf32>
    %cst_44 = arith.constant 1.000000e+00 : f32
    %185 = vector.broadcast %cst_44 : f32 to vector<8x128xf32>
    %186 = arith.addf %185, %184 : vector<8x128xf32>
    %187 = arith.divf %185, %186 : vector<8x128xf32>
    %188 = vector.extract_strided_slice %170 {offsets = [0, 256], sizes = [8, 128], strides = [1, 1]} : vector<8x384xf32> to vector<8x128xf32>
    %189 = vector.extract_strided_slice %171 {offsets = [0, 256], sizes = [8, 128], strides = [1, 1]} : vector<8x384xf32> to vector<8x128xf32>
    %190 = vector.broadcast %11 : vector<1x128xf32> to vector<8x128xf32>
    %191 = arith.addf %189, %190 : vector<8x128xf32>
    %192 = arith.mulf %179, %191 : vector<8x128xf32>
    %193 = arith.addf %188, %192 : vector<8x128xf32>
    %194 = math.tanh %193 : vector<8x128xf32>
    %cst_45 = arith.constant 1.000000e+00 : f32
    %195 = vector.broadcast %cst_45 : f32 to vector<8x128xf32>
    %196 = arith.subf %195, %187 : vector<8x128xf32>
    %197 = arith.mulf %196, %194 : vector<8x128xf32>
    %198 = arith.mulf %187, %137 : vector<8x128xf32>
    %199 = arith.addf %197, %198 : vector<8x128xf32>
    %200 = vector.extract_strided_slice %5 {offsets = [24, 0], sizes = [8, 384], strides = [1, 1]} : vector<64x384xf32> to vector<8x384xf32>
    %cst_46 = arith.constant dense<0.000000e+00> : vector<8x384xf32>
    %201 = tpu.matmul %167, %6, %cst_46 {dimension_numbers = #tpu.dot_dimension_numbers<[1], [0], [0], [1], [0, 0, 1, 1], [], []>} : vector<8x128xf32>, vector<128x384xf32>, vector<8x384xf32> -> vector<8x384xf32>
    %202 = vector.extract_strided_slice %200 {offsets = [0, 0], sizes = [8, 128], strides = [1, 1]} : vector<8x384xf32> to vector<8x128xf32>
    %203 = vector.extract_strided_slice %201 {offsets = [0, 0], sizes = [8, 128], strides = [1, 1]} : vector<8x384xf32> to vector<8x128xf32>
    %204 = arith.addf %202, %203 : vector<8x128xf32>
    %205 = arith.negf %204 : vector<8x128xf32>
    %206 = math.exp %205 : vector<8x128xf32>
    %cst_47 = arith.constant 1.000000e+00 : f32
    %207 = vector.broadcast %cst_47 : f32 to vector<8x128xf32>
    %208 = arith.addf %207, %206 : vector<8x128xf32>
    %209 = arith.divf %207, %208 : vector<8x128xf32>
    %210 = vector.extract_strided_slice %200 {offsets = [0, 128], sizes = [8, 128], strides = [1, 1]} : vector<8x384xf32> to vector<8x128xf32>
    %211 = vector.extract_strided_slice %201 {offsets = [0, 128], sizes = [8, 128], strides = [1, 1]} : vector<8x384xf32> to vector<8x128xf32>
    %212 = arith.addf %210, %211 : vector<8x128xf32>
    %213 = arith.negf %212 : vector<8x128xf32>
    %214 = math.exp %213 : vector<8x128xf32>
    %cst_48 = arith.constant 1.000000e+00 : f32
    %215 = vector.broadcast %cst_48 : f32 to vector<8x128xf32>
    %216 = arith.addf %215, %214 : vector<8x128xf32>
    %217 = arith.divf %215, %216 : vector<8x128xf32>
    %218 = vector.extract_strided_slice %200 {offsets = [0, 256], sizes = [8, 128], strides = [1, 1]} : vector<8x384xf32> to vector<8x128xf32>
    %219 = vector.extract_strided_slice %201 {offsets = [0, 256], sizes = [8, 128], strides = [1, 1]} : vector<8x384xf32> to vector<8x128xf32>
    %220 = vector.broadcast %7 : vector<1x128xf32> to vector<8x128xf32>
    %221 = arith.addf %219, %220 : vector<8x128xf32>
    %222 = arith.mulf %209, %221 : vector<8x128xf32>
    %223 = arith.addf %218, %222 : vector<8x128xf32>
    %224 = math.tanh %223 : vector<8x128xf32>
    %cst_49 = arith.constant 1.000000e+00 : f32
    %225 = vector.broadcast %cst_49 : f32 to vector<8x128xf32>
    %226 = arith.subf %225, %217 : vector<8x128xf32>
    %227 = arith.mulf %226, %224 : vector<8x128xf32>
    %228 = arith.mulf %217, %167 : vector<8x128xf32>
    %229 = arith.addf %227, %228 : vector<8x128xf32>
    %cst_50 = arith.constant dense<0.000000e+00> : vector<8x384xf32>
    %230 = tpu.matmul %229, %8, %cst_50 {dimension_numbers = #tpu.dot_dimension_numbers<[1], [0], [0], [1], [0, 0, 1, 1], [], []>} : vector<8x128xf32>, vector<128x384xf32>, vector<8x384xf32> -> vector<8x384xf32>
    %231 = vector.broadcast %9 : vector<1x384xf32> to vector<8x384xf32>
    %232 = arith.addf %230, %231 : vector<8x384xf32>
    %cst_51 = arith.constant dense<0.000000e+00> : vector<8x384xf32>
    %233 = tpu.matmul %199, %10, %cst_51 {dimension_numbers = #tpu.dot_dimension_numbers<[1], [0], [0], [1], [0, 0, 1, 1], [], []>} : vector<8x128xf32>, vector<128x384xf32>, vector<8x384xf32> -> vector<8x384xf32>
    %234 = vector.extract_strided_slice %232 {offsets = [0, 0], sizes = [8, 128], strides = [1, 1]} : vector<8x384xf32> to vector<8x128xf32>
    %235 = vector.extract_strided_slice %233 {offsets = [0, 0], sizes = [8, 128], strides = [1, 1]} : vector<8x384xf32> to vector<8x128xf32>
    %236 = arith.addf %234, %235 : vector<8x128xf32>
    %237 = arith.negf %236 : vector<8x128xf32>
    %238 = math.exp %237 : vector<8x128xf32>
    %cst_52 = arith.constant 1.000000e+00 : f32
    %239 = vector.broadcast %cst_52 : f32 to vector<8x128xf32>
    %240 = arith.addf %239, %238 : vector<8x128xf32>
    %241 = arith.divf %239, %240 : vector<8x128xf32>
    %242 = vector.extract_strided_slice %232 {offsets = [0, 128], sizes = [8, 128], strides = [1, 1]} : vector<8x384xf32> to vector<8x128xf32>
    %243 = vector.extract_strided_slice %233 {offsets = [0, 128], sizes = [8, 128], strides = [1, 1]} : vector<8x384xf32> to vector<8x128xf32>
    %244 = arith.addf %242, %243 : vector<8x128xf32>
    %245 = arith.negf %244 : vector<8x128xf32>
    %246 = math.exp %245 : vector<8x128xf32>
    %cst_53 = arith.constant 1.000000e+00 : f32
    %247 = vector.broadcast %cst_53 : f32 to vector<8x128xf32>
    %248 = arith.addf %247, %246 : vector<8x128xf32>
    %249 = arith.divf %247, %248 : vector<8x128xf32>
    %250 = vector.extract_strided_slice %232 {offsets = [0, 256], sizes = [8, 128], strides = [1, 1]} : vector<8x384xf32> to vector<8x128xf32>
    %251 = vector.extract_strided_slice %233 {offsets = [0, 256], sizes = [8, 128], strides = [1, 1]} : vector<8x384xf32> to vector<8x128xf32>
    %252 = vector.broadcast %11 : vector<1x128xf32> to vector<8x128xf32>
    %253 = arith.addf %251, %252 : vector<8x128xf32>
    %254 = arith.mulf %241, %253 : vector<8x128xf32>
    %255 = arith.addf %250, %254 : vector<8x128xf32>
    %256 = math.tanh %255 : vector<8x128xf32>
    %cst_54 = arith.constant 1.000000e+00 : f32
    %257 = vector.broadcast %cst_54 : f32 to vector<8x128xf32>
    %258 = arith.subf %257, %249 : vector<8x128xf32>
    %259 = arith.mulf %258, %256 : vector<8x128xf32>
    %260 = arith.mulf %249, %199 : vector<8x128xf32>
    %261 = arith.addf %259, %260 : vector<8x128xf32>
    %262 = vector.extract_strided_slice %5 {offsets = [32, 0], sizes = [8, 384], strides = [1, 1]} : vector<64x384xf32> to vector<8x384xf32>
    %cst_55 = arith.constant dense<0.000000e+00> : vector<8x384xf32>
    %263 = tpu.matmul %229, %6, %cst_55 {dimension_numbers = #tpu.dot_dimension_numbers<[1], [0], [0], [1], [0, 0, 1, 1], [], []>} : vector<8x128xf32>, vector<128x384xf32>, vector<8x384xf32> -> vector<8x384xf32>
    %264 = vector.extract_strided_slice %262 {offsets = [0, 0], sizes = [8, 128], strides = [1, 1]} : vector<8x384xf32> to vector<8x128xf32>
    %265 = vector.extract_strided_slice %263 {offsets = [0, 0], sizes = [8, 128], strides = [1, 1]} : vector<8x384xf32> to vector<8x128xf32>
    %266 = arith.addf %264, %265 : vector<8x128xf32>
    %267 = arith.negf %266 : vector<8x128xf32>
    %268 = math.exp %267 : vector<8x128xf32>
    %cst_56 = arith.constant 1.000000e+00 : f32
    %269 = vector.broadcast %cst_56 : f32 to vector<8x128xf32>
    %270 = arith.addf %269, %268 : vector<8x128xf32>
    %271 = arith.divf %269, %270 : vector<8x128xf32>
    %272 = vector.extract_strided_slice %262 {offsets = [0, 128], sizes = [8, 128], strides = [1, 1]} : vector<8x384xf32> to vector<8x128xf32>
    %273 = vector.extract_strided_slice %263 {offsets = [0, 128], sizes = [8, 128], strides = [1, 1]} : vector<8x384xf32> to vector<8x128xf32>
    %274 = arith.addf %272, %273 : vector<8x128xf32>
    %275 = arith.negf %274 : vector<8x128xf32>
    %276 = math.exp %275 : vector<8x128xf32>
    %cst_57 = arith.constant 1.000000e+00 : f32
    %277 = vector.broadcast %cst_57 : f32 to vector<8x128xf32>
    %278 = arith.addf %277, %276 : vector<8x128xf32>
    %279 = arith.divf %277, %278 : vector<8x128xf32>
    %280 = vector.extract_strided_slice %262 {offsets = [0, 256], sizes = [8, 128], strides = [1, 1]} : vector<8x384xf32> to vector<8x128xf32>
    %281 = vector.extract_strided_slice %263 {offsets = [0, 256], sizes = [8, 128], strides = [1, 1]} : vector<8x384xf32> to vector<8x128xf32>
    %282 = vector.broadcast %7 : vector<1x128xf32> to vector<8x128xf32>
    %283 = arith.addf %281, %282 : vector<8x128xf32>
    %284 = arith.mulf %271, %283 : vector<8x128xf32>
    %285 = arith.addf %280, %284 : vector<8x128xf32>
    %286 = math.tanh %285 : vector<8x128xf32>
    %cst_58 = arith.constant 1.000000e+00 : f32
    %287 = vector.broadcast %cst_58 : f32 to vector<8x128xf32>
    %288 = arith.subf %287, %279 : vector<8x128xf32>
    %289 = arith.mulf %288, %286 : vector<8x128xf32>
    %290 = arith.mulf %279, %229 : vector<8x128xf32>
    %291 = arith.addf %289, %290 : vector<8x128xf32>
    %cst_59 = arith.constant dense<0.000000e+00> : vector<8x384xf32>
    %292 = tpu.matmul %291, %8, %cst_59 {dimension_numbers = #tpu.dot_dimension_numbers<[1], [0], [0], [1], [0, 0, 1, 1], [], []>} : vector<8x128xf32>, vector<128x384xf32>, vector<8x384xf32> -> vector<8x384xf32>
    %293 = vector.broadcast %9 : vector<1x384xf32> to vector<8x384xf32>
    %294 = arith.addf %292, %293 : vector<8x384xf32>
    %cst_60 = arith.constant dense<0.000000e+00> : vector<8x384xf32>
    %295 = tpu.matmul %261, %10, %cst_60 {dimension_numbers = #tpu.dot_dimension_numbers<[1], [0], [0], [1], [0, 0, 1, 1], [], []>} : vector<8x128xf32>, vector<128x384xf32>, vector<8x384xf32> -> vector<8x384xf32>
    %296 = vector.extract_strided_slice %294 {offsets = [0, 0], sizes = [8, 128], strides = [1, 1]} : vector<8x384xf32> to vector<8x128xf32>
    %297 = vector.extract_strided_slice %295 {offsets = [0, 0], sizes = [8, 128], strides = [1, 1]} : vector<8x384xf32> to vector<8x128xf32>
    %298 = arith.addf %296, %297 : vector<8x128xf32>
    %299 = arith.negf %298 : vector<8x128xf32>
    %300 = math.exp %299 : vector<8x128xf32>
    %cst_61 = arith.constant 1.000000e+00 : f32
    %301 = vector.broadcast %cst_61 : f32 to vector<8x128xf32>
    %302 = arith.addf %301, %300 : vector<8x128xf32>
    %303 = arith.divf %301, %302 : vector<8x128xf32>
    %304 = vector.extract_strided_slice %294 {offsets = [0, 128], sizes = [8, 128], strides = [1, 1]} : vector<8x384xf32> to vector<8x128xf32>
    %305 = vector.extract_strided_slice %295 {offsets = [0, 128], sizes = [8, 128], strides = [1, 1]} : vector<8x384xf32> to vector<8x128xf32>
    %306 = arith.addf %304, %305 : vector<8x128xf32>
    %307 = arith.negf %306 : vector<8x128xf32>
    %308 = math.exp %307 : vector<8x128xf32>
    %cst_62 = arith.constant 1.000000e+00 : f32
    %309 = vector.broadcast %cst_62 : f32 to vector<8x128xf32>
    %310 = arith.addf %309, %308 : vector<8x128xf32>
    %311 = arith.divf %309, %310 : vector<8x128xf32>
    %312 = vector.extract_strided_slice %294 {offsets = [0, 256], sizes = [8, 128], strides = [1, 1]} : vector<8x384xf32> to vector<8x128xf32>
    %313 = vector.extract_strided_slice %295 {offsets = [0, 256], sizes = [8, 128], strides = [1, 1]} : vector<8x384xf32> to vector<8x128xf32>
    %314 = vector.broadcast %11 : vector<1x128xf32> to vector<8x128xf32>
    %315 = arith.addf %313, %314 : vector<8x128xf32>
    %316 = arith.mulf %303, %315 : vector<8x128xf32>
    %317 = arith.addf %312, %316 : vector<8x128xf32>
    %318 = math.tanh %317 : vector<8x128xf32>
    %cst_63 = arith.constant 1.000000e+00 : f32
    %319 = vector.broadcast %cst_63 : f32 to vector<8x128xf32>
    %320 = arith.subf %319, %311 : vector<8x128xf32>
    %321 = arith.mulf %320, %318 : vector<8x128xf32>
    %322 = arith.mulf %311, %261 : vector<8x128xf32>
    %323 = arith.addf %321, %322 : vector<8x128xf32>
    %324 = vector.extract_strided_slice %5 {offsets = [40, 0], sizes = [8, 384], strides = [1, 1]} : vector<64x384xf32> to vector<8x384xf32>
    %cst_64 = arith.constant dense<0.000000e+00> : vector<8x384xf32>
    %325 = tpu.matmul %291, %6, %cst_64 {dimension_numbers = #tpu.dot_dimension_numbers<[1], [0], [0], [1], [0, 0, 1, 1], [], []>} : vector<8x128xf32>, vector<128x384xf32>, vector<8x384xf32> -> vector<8x384xf32>
    %326 = vector.extract_strided_slice %324 {offsets = [0, 0], sizes = [8, 128], strides = [1, 1]} : vector<8x384xf32> to vector<8x128xf32>
    %327 = vector.extract_strided_slice %325 {offsets = [0, 0], sizes = [8, 128], strides = [1, 1]} : vector<8x384xf32> to vector<8x128xf32>
    %328 = arith.addf %326, %327 : vector<8x128xf32>
    %329 = arith.negf %328 : vector<8x128xf32>
    %330 = math.exp %329 : vector<8x128xf32>
    %cst_65 = arith.constant 1.000000e+00 : f32
    %331 = vector.broadcast %cst_65 : f32 to vector<8x128xf32>
    %332 = arith.addf %331, %330 : vector<8x128xf32>
    %333 = arith.divf %331, %332 : vector<8x128xf32>
    %334 = vector.extract_strided_slice %324 {offsets = [0, 128], sizes = [8, 128], strides = [1, 1]} : vector<8x384xf32> to vector<8x128xf32>
    %335 = vector.extract_strided_slice %325 {offsets = [0, 128], sizes = [8, 128], strides = [1, 1]} : vector<8x384xf32> to vector<8x128xf32>
    %336 = arith.addf %334, %335 : vector<8x128xf32>
    %337 = arith.negf %336 : vector<8x128xf32>
    %338 = math.exp %337 : vector<8x128xf32>
    %cst_66 = arith.constant 1.000000e+00 : f32
    %339 = vector.broadcast %cst_66 : f32 to vector<8x128xf32>
    %340 = arith.addf %339, %338 : vector<8x128xf32>
    %341 = arith.divf %339, %340 : vector<8x128xf32>
    %342 = vector.extract_strided_slice %324 {offsets = [0, 256], sizes = [8, 128], strides = [1, 1]} : vector<8x384xf32> to vector<8x128xf32>
    %343 = vector.extract_strided_slice %325 {offsets = [0, 256], sizes = [8, 128], strides = [1, 1]} : vector<8x384xf32> to vector<8x128xf32>
    %344 = vector.broadcast %7 : vector<1x128xf32> to vector<8x128xf32>
    %345 = arith.addf %343, %344 : vector<8x128xf32>
    %346 = arith.mulf %333, %345 : vector<8x128xf32>
    %347 = arith.addf %342, %346 : vector<8x128xf32>
    %348 = math.tanh %347 : vector<8x128xf32>
    %cst_67 = arith.constant 1.000000e+00 : f32
    %349 = vector.broadcast %cst_67 : f32 to vector<8x128xf32>
    %350 = arith.subf %349, %341 : vector<8x128xf32>
    %351 = arith.mulf %350, %348 : vector<8x128xf32>
    %352 = arith.mulf %341, %291 : vector<8x128xf32>
    %353 = arith.addf %351, %352 : vector<8x128xf32>
    %cst_68 = arith.constant dense<0.000000e+00> : vector<8x384xf32>
    %354 = tpu.matmul %353, %8, %cst_68 {dimension_numbers = #tpu.dot_dimension_numbers<[1], [0], [0], [1], [0, 0, 1, 1], [], []>} : vector<8x128xf32>, vector<128x384xf32>, vector<8x384xf32> -> vector<8x384xf32>
    %355 = vector.broadcast %9 : vector<1x384xf32> to vector<8x384xf32>
    %356 = arith.addf %354, %355 : vector<8x384xf32>
    %cst_69 = arith.constant dense<0.000000e+00> : vector<8x384xf32>
    %357 = tpu.matmul %323, %10, %cst_69 {dimension_numbers = #tpu.dot_dimension_numbers<[1], [0], [0], [1], [0, 0, 1, 1], [], []>} : vector<8x128xf32>, vector<128x384xf32>, vector<8x384xf32> -> vector<8x384xf32>
    %358 = vector.extract_strided_slice %356 {offsets = [0, 0], sizes = [8, 128], strides = [1, 1]} : vector<8x384xf32> to vector<8x128xf32>
    %359 = vector.extract_strided_slice %357 {offsets = [0, 0], sizes = [8, 128], strides = [1, 1]} : vector<8x384xf32> to vector<8x128xf32>
    %360 = arith.addf %358, %359 : vector<8x128xf32>
    %361 = arith.negf %360 : vector<8x128xf32>
    %362 = math.exp %361 : vector<8x128xf32>
    %cst_70 = arith.constant 1.000000e+00 : f32
    %363 = vector.broadcast %cst_70 : f32 to vector<8x128xf32>
    %364 = arith.addf %363, %362 : vector<8x128xf32>
    %365 = arith.divf %363, %364 : vector<8x128xf32>
    %366 = vector.extract_strided_slice %356 {offsets = [0, 128], sizes = [8, 128], strides = [1, 1]} : vector<8x384xf32> to vector<8x128xf32>
    %367 = vector.extract_strided_slice %357 {offsets = [0, 128], sizes = [8, 128], strides = [1, 1]} : vector<8x384xf32> to vector<8x128xf32>
    %368 = arith.addf %366, %367 : vector<8x128xf32>
    %369 = arith.negf %368 : vector<8x128xf32>
    %370 = math.exp %369 : vector<8x128xf32>
    %cst_71 = arith.constant 1.000000e+00 : f32
    %371 = vector.broadcast %cst_71 : f32 to vector<8x128xf32>
    %372 = arith.addf %371, %370 : vector<8x128xf32>
    %373 = arith.divf %371, %372 : vector<8x128xf32>
    %374 = vector.extract_strided_slice %356 {offsets = [0, 256], sizes = [8, 128], strides = [1, 1]} : vector<8x384xf32> to vector<8x128xf32>
    %375 = vector.extract_strided_slice %357 {offsets = [0, 256], sizes = [8, 128], strides = [1, 1]} : vector<8x384xf32> to vector<8x128xf32>
    %376 = vector.broadcast %11 : vector<1x128xf32> to vector<8x128xf32>
    %377 = arith.addf %375, %376 : vector<8x128xf32>
    %378 = arith.mulf %365, %377 : vector<8x128xf32>
    %379 = arith.addf %374, %378 : vector<8x128xf32>
    %380 = math.tanh %379 : vector<8x128xf32>
    %cst_72 = arith.constant 1.000000e+00 : f32
    %381 = vector.broadcast %cst_72 : f32 to vector<8x128xf32>
    %382 = arith.subf %381, %373 : vector<8x128xf32>
    %383 = arith.mulf %382, %380 : vector<8x128xf32>
    %384 = arith.mulf %373, %323 : vector<8x128xf32>
    %385 = arith.addf %383, %384 : vector<8x128xf32>
    %386 = vector.extract_strided_slice %5 {offsets = [48, 0], sizes = [8, 384], strides = [1, 1]} : vector<64x384xf32> to vector<8x384xf32>
    %cst_73 = arith.constant dense<0.000000e+00> : vector<8x384xf32>
    %387 = tpu.matmul %353, %6, %cst_73 {dimension_numbers = #tpu.dot_dimension_numbers<[1], [0], [0], [1], [0, 0, 1, 1], [], []>} : vector<8x128xf32>, vector<128x384xf32>, vector<8x384xf32> -> vector<8x384xf32>
    %388 = vector.extract_strided_slice %386 {offsets = [0, 0], sizes = [8, 128], strides = [1, 1]} : vector<8x384xf32> to vector<8x128xf32>
    %389 = vector.extract_strided_slice %387 {offsets = [0, 0], sizes = [8, 128], strides = [1, 1]} : vector<8x384xf32> to vector<8x128xf32>
    %390 = arith.addf %388, %389 : vector<8x128xf32>
    %391 = arith.negf %390 : vector<8x128xf32>
    %392 = math.exp %391 : vector<8x128xf32>
    %cst_74 = arith.constant 1.000000e+00 : f32
    %393 = vector.broadcast %cst_74 : f32 to vector<8x128xf32>
    %394 = arith.addf %393, %392 : vector<8x128xf32>
    %395 = arith.divf %393, %394 : vector<8x128xf32>
    %396 = vector.extract_strided_slice %386 {offsets = [0, 128], sizes = [8, 128], strides = [1, 1]} : vector<8x384xf32> to vector<8x128xf32>
    %397 = vector.extract_strided_slice %387 {offsets = [0, 128], sizes = [8, 128], strides = [1, 1]} : vector<8x384xf32> to vector<8x128xf32>
    %398 = arith.addf %396, %397 : vector<8x128xf32>
    %399 = arith.negf %398 : vector<8x128xf32>
    %400 = math.exp %399 : vector<8x128xf32>
    %cst_75 = arith.constant 1.000000e+00 : f32
    %401 = vector.broadcast %cst_75 : f32 to vector<8x128xf32>
    %402 = arith.addf %401, %400 : vector<8x128xf32>
    %403 = arith.divf %401, %402 : vector<8x128xf32>
    %404 = vector.extract_strided_slice %386 {offsets = [0, 256], sizes = [8, 128], strides = [1, 1]} : vector<8x384xf32> to vector<8x128xf32>
    %405 = vector.extract_strided_slice %387 {offsets = [0, 256], sizes = [8, 128], strides = [1, 1]} : vector<8x384xf32> to vector<8x128xf32>
    %406 = vector.broadcast %7 : vector<1x128xf32> to vector<8x128xf32>
    %407 = arith.addf %405, %406 : vector<8x128xf32>
    %408 = arith.mulf %395, %407 : vector<8x128xf32>
    %409 = arith.addf %404, %408 : vector<8x128xf32>
    %410 = math.tanh %409 : vector<8x128xf32>
    %cst_76 = arith.constant 1.000000e+00 : f32
    %411 = vector.broadcast %cst_76 : f32 to vector<8x128xf32>
    %412 = arith.subf %411, %403 : vector<8x128xf32>
    %413 = arith.mulf %412, %410 : vector<8x128xf32>
    %414 = arith.mulf %403, %353 : vector<8x128xf32>
    %415 = arith.addf %413, %414 : vector<8x128xf32>
    %cst_77 = arith.constant dense<0.000000e+00> : vector<8x384xf32>
    %416 = tpu.matmul %415, %8, %cst_77 {dimension_numbers = #tpu.dot_dimension_numbers<[1], [0], [0], [1], [0, 0, 1, 1], [], []>} : vector<8x128xf32>, vector<128x384xf32>, vector<8x384xf32> -> vector<8x384xf32>
    %417 = vector.broadcast %9 : vector<1x384xf32> to vector<8x384xf32>
    %418 = arith.addf %416, %417 : vector<8x384xf32>
    %cst_78 = arith.constant dense<0.000000e+00> : vector<8x384xf32>
    %419 = tpu.matmul %385, %10, %cst_78 {dimension_numbers = #tpu.dot_dimension_numbers<[1], [0], [0], [1], [0, 0, 1, 1], [], []>} : vector<8x128xf32>, vector<128x384xf32>, vector<8x384xf32> -> vector<8x384xf32>
    %420 = vector.extract_strided_slice %418 {offsets = [0, 0], sizes = [8, 128], strides = [1, 1]} : vector<8x384xf32> to vector<8x128xf32>
    %421 = vector.extract_strided_slice %419 {offsets = [0, 0], sizes = [8, 128], strides = [1, 1]} : vector<8x384xf32> to vector<8x128xf32>
    %422 = arith.addf %420, %421 : vector<8x128xf32>
    %423 = arith.negf %422 : vector<8x128xf32>
    %424 = math.exp %423 : vector<8x128xf32>
    %cst_79 = arith.constant 1.000000e+00 : f32
    %425 = vector.broadcast %cst_79 : f32 to vector<8x128xf32>
    %426 = arith.addf %425, %424 : vector<8x128xf32>
    %427 = arith.divf %425, %426 : vector<8x128xf32>
    %428 = vector.extract_strided_slice %418 {offsets = [0, 128], sizes = [8, 128], strides = [1, 1]} : vector<8x384xf32> to vector<8x128xf32>
    %429 = vector.extract_strided_slice %419 {offsets = [0, 128], sizes = [8, 128], strides = [1, 1]} : vector<8x384xf32> to vector<8x128xf32>
    %430 = arith.addf %428, %429 : vector<8x128xf32>
    %431 = arith.negf %430 : vector<8x128xf32>
    %432 = math.exp %431 : vector<8x128xf32>
    %cst_80 = arith.constant 1.000000e+00 : f32
    %433 = vector.broadcast %cst_80 : f32 to vector<8x128xf32>
    %434 = arith.addf %433, %432 : vector<8x128xf32>
    %435 = arith.divf %433, %434 : vector<8x128xf32>
    %436 = vector.extract_strided_slice %418 {offsets = [0, 256], sizes = [8, 128], strides = [1, 1]} : vector<8x384xf32> to vector<8x128xf32>
    %437 = vector.extract_strided_slice %419 {offsets = [0, 256], sizes = [8, 128], strides = [1, 1]} : vector<8x384xf32> to vector<8x128xf32>
    %438 = vector.broadcast %11 : vector<1x128xf32> to vector<8x128xf32>
    %439 = arith.addf %437, %438 : vector<8x128xf32>
    %440 = arith.mulf %427, %439 : vector<8x128xf32>
    %441 = arith.addf %436, %440 : vector<8x128xf32>
    %442 = math.tanh %441 : vector<8x128xf32>
    %cst_81 = arith.constant 1.000000e+00 : f32
    %443 = vector.broadcast %cst_81 : f32 to vector<8x128xf32>
    %444 = arith.subf %443, %435 : vector<8x128xf32>
    %445 = arith.mulf %444, %442 : vector<8x128xf32>
    %446 = arith.mulf %435, %385 : vector<8x128xf32>
    %447 = arith.addf %445, %446 : vector<8x128xf32>
    %448 = vector.extract_strided_slice %5 {offsets = [56, 0], sizes = [8, 384], strides = [1, 1]} : vector<64x384xf32> to vector<8x384xf32>
    %cst_82 = arith.constant dense<0.000000e+00> : vector<8x384xf32>
    %449 = tpu.matmul %415, %6, %cst_82 {dimension_numbers = #tpu.dot_dimension_numbers<[1], [0], [0], [1], [0, 0, 1, 1], [], []>} : vector<8x128xf32>, vector<128x384xf32>, vector<8x384xf32> -> vector<8x384xf32>
    %450 = vector.extract_strided_slice %448 {offsets = [0, 0], sizes = [8, 128], strides = [1, 1]} : vector<8x384xf32> to vector<8x128xf32>
    %451 = vector.extract_strided_slice %449 {offsets = [0, 0], sizes = [8, 128], strides = [1, 1]} : vector<8x384xf32> to vector<8x128xf32>
    %452 = arith.addf %450, %451 : vector<8x128xf32>
    %453 = arith.negf %452 : vector<8x128xf32>
    %454 = math.exp %453 : vector<8x128xf32>
    %cst_83 = arith.constant 1.000000e+00 : f32
    %455 = vector.broadcast %cst_83 : f32 to vector<8x128xf32>
    %456 = arith.addf %455, %454 : vector<8x128xf32>
    %457 = arith.divf %455, %456 : vector<8x128xf32>
    %458 = vector.extract_strided_slice %448 {offsets = [0, 128], sizes = [8, 128], strides = [1, 1]} : vector<8x384xf32> to vector<8x128xf32>
    %459 = vector.extract_strided_slice %449 {offsets = [0, 128], sizes = [8, 128], strides = [1, 1]} : vector<8x384xf32> to vector<8x128xf32>
    %460 = arith.addf %458, %459 : vector<8x128xf32>
    %461 = arith.negf %460 : vector<8x128xf32>
    %462 = math.exp %461 : vector<8x128xf32>
    %cst_84 = arith.constant 1.000000e+00 : f32
    %463 = vector.broadcast %cst_84 : f32 to vector<8x128xf32>
    %464 = arith.addf %463, %462 : vector<8x128xf32>
    %465 = arith.divf %463, %464 : vector<8x128xf32>
    %466 = vector.extract_strided_slice %448 {offsets = [0, 256], sizes = [8, 128], strides = [1, 1]} : vector<8x384xf32> to vector<8x128xf32>
    %467 = vector.extract_strided_slice %449 {offsets = [0, 256], sizes = [8, 128], strides = [1, 1]} : vector<8x384xf32> to vector<8x128xf32>
    %468 = vector.broadcast %7 : vector<1x128xf32> to vector<8x128xf32>
    %469 = arith.addf %467, %468 : vector<8x128xf32>
    %470 = arith.mulf %457, %469 : vector<8x128xf32>
    %471 = arith.addf %466, %470 : vector<8x128xf32>
    %472 = math.tanh %471 : vector<8x128xf32>
    %cst_85 = arith.constant 1.000000e+00 : f32
    %473 = vector.broadcast %cst_85 : f32 to vector<8x128xf32>
    %474 = arith.subf %473, %465 : vector<8x128xf32>
    %475 = arith.mulf %474, %472 : vector<8x128xf32>
    %476 = arith.mulf %465, %415 : vector<8x128xf32>
    %477 = arith.addf %475, %476 : vector<8x128xf32>
    %cst_86 = arith.constant dense<0.000000e+00> : vector<8x384xf32>
    %478 = tpu.matmul %477, %8, %cst_86 {dimension_numbers = #tpu.dot_dimension_numbers<[1], [0], [0], [1], [0, 0, 1, 1], [], []>} : vector<8x128xf32>, vector<128x384xf32>, vector<8x384xf32> -> vector<8x384xf32>
    %479 = vector.broadcast %9 : vector<1x384xf32> to vector<8x384xf32>
    %480 = arith.addf %478, %479 : vector<8x384xf32>
    %cst_87 = arith.constant dense<0.000000e+00> : vector<8x384xf32>
    %481 = tpu.matmul %447, %10, %cst_87 {dimension_numbers = #tpu.dot_dimension_numbers<[1], [0], [0], [1], [0, 0, 1, 1], [], []>} : vector<8x128xf32>, vector<128x384xf32>, vector<8x384xf32> -> vector<8x384xf32>
    %482 = vector.extract_strided_slice %480 {offsets = [0, 0], sizes = [8, 128], strides = [1, 1]} : vector<8x384xf32> to vector<8x128xf32>
    %483 = vector.extract_strided_slice %481 {offsets = [0, 0], sizes = [8, 128], strides = [1, 1]} : vector<8x384xf32> to vector<8x128xf32>
    %484 = arith.addf %482, %483 : vector<8x128xf32>
    %485 = arith.negf %484 : vector<8x128xf32>
    %486 = math.exp %485 : vector<8x128xf32>
    %cst_88 = arith.constant 1.000000e+00 : f32
    %487 = vector.broadcast %cst_88 : f32 to vector<8x128xf32>
    %488 = arith.addf %487, %486 : vector<8x128xf32>
    %489 = arith.divf %487, %488 : vector<8x128xf32>
    %490 = vector.extract_strided_slice %480 {offsets = [0, 128], sizes = [8, 128], strides = [1, 1]} : vector<8x384xf32> to vector<8x128xf32>
    %491 = vector.extract_strided_slice %481 {offsets = [0, 128], sizes = [8, 128], strides = [1, 1]} : vector<8x384xf32> to vector<8x128xf32>
    %492 = arith.addf %490, %491 : vector<8x128xf32>
    %493 = arith.negf %492 : vector<8x128xf32>
    %494 = math.exp %493 : vector<8x128xf32>
    %cst_89 = arith.constant 1.000000e+00 : f32
    %495 = vector.broadcast %cst_89 : f32 to vector<8x128xf32>
    %496 = arith.addf %495, %494 : vector<8x128xf32>
    %497 = arith.divf %495, %496 : vector<8x128xf32>
    %498 = vector.extract_strided_slice %480 {offsets = [0, 256], sizes = [8, 128], strides = [1, 1]} : vector<8x384xf32> to vector<8x128xf32>
    %499 = vector.extract_strided_slice %481 {offsets = [0, 256], sizes = [8, 128], strides = [1, 1]} : vector<8x384xf32> to vector<8x128xf32>
    %500 = vector.broadcast %11 : vector<1x128xf32> to vector<8x128xf32>
    %501 = arith.addf %499, %500 : vector<8x128xf32>
    %502 = arith.mulf %489, %501 : vector<8x128xf32>
    %503 = arith.addf %498, %502 : vector<8x128xf32>
    %504 = math.tanh %503 : vector<8x128xf32>
    %cst_90 = arith.constant 1.000000e+00 : f32
    %505 = vector.broadcast %cst_90 : f32 to vector<8x128xf32>
    %506 = arith.subf %505, %497 : vector<8x128xf32>
    %507 = arith.mulf %506, %504 : vector<8x128xf32>
    %508 = arith.mulf %497, %447 : vector<8x128xf32>
    %509 = arith.addf %507, %508 : vector<8x128xf32>
    %c0_91 = arith.constant 0 : index
    %c0_92 = arith.constant 0 : index
    %510 = vector.load %arg9[%c0_91, %c0_92] : memref<128x128xf32, #tpu.memory_space<vmem>>, vector<128x128xf32>
    %cst_93 = arith.constant dense<0.000000e+00> : vector<8x128xf32>
    %511 = tpu.matmul %509, %510, %cst_93 {dimension_numbers = #tpu.dot_dimension_numbers<[1], [0], [0], [1], [0, 0, 1, 1], [], []>} : vector<8x128xf32>, vector<128x128xf32>, vector<8x128xf32> -> vector<8x128xf32>
    %c0_94 = arith.constant 0 : index
    %c0_95 = arith.constant 0 : index
    %512 = vector.load %arg10[%c0_94, %c0_95] : memref<1x128xf32, #tpu.memory_space<vmem>>, vector<1x128xf32>
    %513 = vector.broadcast %512 : vector<1x128xf32> to vector<8x128xf32>
    %514 = arith.addf %511, %513 : vector<8x128xf32>
    %c0_96 = arith.constant 0 : index
    %c0_97 = arith.constant 0 : index
    %515 = vector.load %arg11[%c0_96, %c0_97] : memref<128x128xf32, #tpu.memory_space<vmem>>, vector<128x128xf32>
    %cst_98 = arith.constant dense<0.000000e+00> : vector<8x128xf32>
    %516 = tpu.matmul %514, %515, %cst_98 {dimension_numbers = #tpu.dot_dimension_numbers<[1], [0], [0], [1], [0, 0, 1, 1], [], []>} : vector<8x128xf32>, vector<128x128xf32>, vector<8x128xf32> -> vector<8x128xf32>
    %c0_99 = arith.constant 0 : index
    %c0_100 = arith.constant 0 : index
    %517 = vector.load %arg12[%c0_99, %c0_100] : memref<1x128xf32, #tpu.memory_space<vmem>>, vector<1x128xf32>
    %518 = vector.broadcast %517 : vector<1x128xf32> to vector<8x128xf32>
    %519 = arith.addf %516, %518 : vector<8x128xf32>
    %cst_101 = arith.constant dense<0xFF800000> : vector<8xf32>
    %520 = vector.multi_reduction <maximumf>, %519, %cst_101 [1] : vector<8x128xf32> to vector<8xf32>
    %521 = vector.shape_cast %520 : vector<8xf32> to vector<8x1xf32>
    %522 = vector.broadcast %521 : vector<8x1xf32> to vector<8x128xf32>
    %523 = arith.subf %519, %522 : vector<8x128xf32>
    %524 = math.exp %523 : vector<8x128xf32>
    %cst_102 = arith.constant dense<0.000000e+00> : vector<8xf32>
    %525 = vector.multi_reduction <add>, %524, %cst_102 [1] : vector<8x128xf32> to vector<8xf32>
    %526 = vector.shape_cast %525 : vector<8xf32> to vector<8x1xf32>
    %527 = tpu.reciprocal %526 {approx = true} : vector<8x1xf32> -> vector<8x1xf32>
    %528 = vector.broadcast %527 : vector<8x1xf32> to vector<8x128xf32>
    %529 = arith.mulf %524, %528 : vector<8x128xf32>
    %c0_103 = arith.constant 0 : index
    %c0_104 = arith.constant 0 : index
    %530 = vector.load %arg13[%c0_103, %c0_104] : memref<8x128xf32, #tpu.memory_space<vmem>>, vector<8x128xf32>
    tpu.vector_store %arg13[%c0_103, %c0_104], %529 {strides = array<i32>} : memref<8x128xf32, #tpu.memory_space<vmem>>, vector<8x128xf32>,
    return
  }
}

</mosaic_0001>

<bundles_post_ra>
// kernel: pcrnn_forward.1
= control target key start
LH: loop header
LB: loop body
LE: loop exit
PB: predicated region body
PF: predicated region fallthrough
CT: control target
= control target key end

     0   :  { %vm72_vm0 = vcmask 261120   ;;  %v7891_v41 = vmov 0.0   ;;  %s7877_s1 = inlined_call_operand.vmem [shape: f32[32,384], index: 1, kind: input, shape index: {}]   ;;  %s7878_s2 = inlined_call_operand.vmem [shape: f32[128,384], index: 2, kind: input, shape index: {}]   ;;  %s7879_s0 = inlined_call_operand.vmem [shape: f32[64,32], index: 0, kind: input, shape index: {}]   ;;  %s7880_s4 = inlined_call_operand.vmem [shape: f32[1,128], index: 4, kind: input, shape index: {}]   ;;  %s7881_s5 = inlined_call_operand.vmem [shape: f32[128,384], index: 5, kind: input, shape index: {}]   ;;  %s7882_s6 = inlined_call_operand.vmem [shape: f32[128,384], index: 6, kind: input, shape index: {}]   ;;  %s7883_s3 = inlined_call_operand.vmem [shape: f32[1,384], index: 3, kind: input, shape index: {}]   ;;  %s7884_s8 = inlined_call_operand.vmem [shape: f32[1,128], index: 8, kind: input, shape index: {}]   ;;  %s7885_s7 = inlined_call_operand.vmem [shape: f32[1,384], index: 7, kind: input, shape index: {}]   ;;  %s7886_s10 = inlined_call_operand.vmem [shape: f32[1,128], index: 10, kind: input, shape index: {}]   ;;  %s7887_s9 = inlined_call_operand.vmem [shape: f32[128,128], index: 9, kind: input, shape index: {}]   ;;  %s7888_s11 = inlined_call_operand.vmem [shape: f32[128,128], index: 11, kind: input, shape index: {}]   ;;  %s7889_s12 = inlined_call_operand.vmem [shape: f32[1,128], index: 12, kind: input, shape index: {}]   ;;  %s7890_s13 = inlined_call_operand.vmem [shape: f32[8,128], index: 13, kind: output, shape index: {}]  }
   0x1   :  { %v61_v0 = vld [vmem:[%s7877_s1 + $0x48] sm:$0xff]  ;;  %v58_v2 = vld [vmem:[%s7877_s1 + $0x30] sm:$0xff]  ;;  %v55_v4 = vld [vmem:[%s7877_s1 + $0x18] sm:$0xff] }
   0x2   :  { %v3415_v1 = vld [vmem:[%s7878_s2 + $0x168] sm:$0xff]  ;;  %109 = vmatpush.msra.mxu0 %v61_v0  ;;  %v3424_v3 = vld [vmem:[%s7878_s2 + $0x150] sm:$0xff]  ;;  %v3432_v5 = vld [vmem:[%s7878_s2 + $0x138] sm:$0xff] }
   0x3   :  { %367 = vmatpush.msra.mxu3 %v3415_v1  ;;  %v52_v6 = vld [vmem:[%s7877_s1] sm:$0xff]  ;;  %v3452_v9 = vld [vmem:[%s7878_s2 + $0x108] sm:$0xff]  ;;  %v3457_v10 = vld [vmem:[%s7878_s2 + $0x178] sm:$0xff] }
   0x4   :  { %110 = vmatpush.msra.mxu0 %v58_v2  ;;  %v3441_v7 = vld [vmem:[%s7878_s2 + $0x120] sm:$0xff]  ;;  %v3465_v11 = vld [vmem:[%s7878_s2 + $0xf0] sm:$0xff]  ;;  %v3477_v13 = vld [vmem:[%s7878_s2 + $0xd8] sm:$0xff] }
   0x5   :  { %368 = vmatpush.msra.mxu3 %v3424_v3  ;;  %v3447_v8 = vld [vmem:[%s7879_s0] sm:$0xff]  ;;  %v3482_v14 = vld [vmem:[%s7878_s2 + $0x148] sm:$0xff]  ;;  %v3494_v16 = vld [vmem:[%s7878_s2 + $0x130] sm:$0xff] }
   0x6   :  { %111 = vmatpush.msra.mxu0 %v55_v4  ;;  %v3470_v12 = vld [vmem:[%s7878_s2 + $0x160] sm:$0xff]  ;;  %v3500_v17 = vld [vmem:[%s7879_s0 + $0x8] sm:$0xff]  ;;  %v3511_v19 = vld [vmem:[%s7878_s2 + $0x118] sm:$0xff] }
   0x7   :  { %369 = vmatpush.msra.mxu3 %v3432_v5  ;;  %v3489_v15 = vld [vmem:[%s7878_s2 + $0xc0] sm:$0xff]  ;;  %v3506_v18 = vld [vmem:[%s7878_s2 + $0xa8] sm:$0xff]  ;;  %v3520_v20 = vld [vmem:[%s7878_s2 + $0x90] sm:$0xff] }
   0x8   :  { %112 = vmatpush.msra.mxu0 %v52_v6  ;;  %v3525_v21 = vld [vmem:[%s7878_s2 + $0x100] sm:$0xff]  ;;  %v3532_v22 = vld [vmem:[%s7878_s2 + $0x78] sm:$0xff]  ;;  %v3537_v23 = vld [vmem:[%s7878_s2 + $0xe8] sm:$0xff] }
   0x9   :  { %370 = vmatpush.msra.mxu3 %v3441_v7  ;;  %2682 = vmatmul.msk.f32.vlgmr.msra.gmra.mxu0 %vm72_vm0, %v3447_v8  ;;  %8224 = vst [vmem:[#allocation2_spill] sm:$0xff] %v3525_v21  ;;  %v3544_v24 = vld [vmem:[%s7878_s2 + $0x60] sm:$0xff]  ;;  %v3550_v25 = vld [vmem:[%s7879_s0 + $0x10] sm:$0xff]  ;;  %v3561_v27 = vld [vmem:[%s7878_s2 + $0x48] sm:$0xff] }
   0xa   :  { %407 = vmatpush.msrb.mxu0 %v3457_v10  ;;  %8225 = vst [vmem:[#allocation3_spill] sm:$0xff] %v3537_v23  ;;  %v3556_v26 = vld [vmem:[%s7878_s2 + $0xd0] sm:$0xff]  ;;  %v3576_v29 = vld [vmem:[%s7878_s2 + $0xb8] sm:$0xff]  ;;  %v3588_v31 = vld [vmem:[%s7878_s2 + $0xa0] sm:$0xff] }
   0xb   :  { %371 = vmatpush.msra.mxu3 %v3452_v9  ;;  %8226 = vst [vmem:[#allocation4_spill] sm:$0xff] %v3556_v26  ;;  %v3570_v28 = vld [vmem:[%s7878_s2 + $0x30] sm:$0xff]  ;;  %v3581_v30 = vld [vmem:[%s7878_s2 + $0x18] sm:$0xff]  ;;  %v3596_v33 = vld [vmem:[%s7878_s2] sm:$0xff] }
   0xc   :  { %408 = vmatpush.msrb.mxu0 %v3470_v12  ;;  %8227 = vst [vmem:[#allocation5_spill] sm:$0xff] %v3576_v29  ;;  %v62_v32 = vld [vmem:[%s7877_s1 + $0x50] sm:$0xff]  ;;  %v3601_v34 = vld [vmem:[%s7879_s0 + $0x18] sm:$0xff]  ;;  %v3611_v36 = vld [vmem:[%s7878_s2 + $0x88] sm:$0xff] }
   0xd   :  { %372 = vmatpush.msra.mxu3 %v3465_v11  ;;  %8228 = vst [vmem:[#allocation6_spill] sm:$0xff] %v3588_v31  ;;  %150 = vmatpush.msra.mxu1 %v62_v32  ;;  %v63_v35 = vld [vmem:[%s7877_s1 + $0x58] sm:$0xff]  ;;  %v3619_v38 = vld [vmem:[%s7878_s2 + $0x170] sm:$0xff]  ;;  %v60_v39 = vld [vmem:[%s7877_s1 + $0x40] sm:$0xff] }
   0xe   :  { %409 = vmatpush.msrb.mxu0 %v3482_v14  ;;  %8229 = vst [vmem:[#allocation7_spill] sm:$0xff] %v3611_v36  ;;  %v59_v37 = vld [vmem:[%s7877_s1 + $0x38] sm:$0xff]  ;;  %191 = vmatpush.msra.mxu2 %v63_v35  ;;  %v3629_v40 = vld [vmem:[%s7878_s2 + $0x70] sm:$0xff]  ;;  %v56_v43 = vld [vmem:[%s7877_s1 + $0x20] sm:$0xff] }
   0xf   :  { %373 = vmatpush.msra.mxu3 %v3477_v13  ;;  %151 = vmatpush.msra.mxu1 %v59_v37  ;;  %8230 = vst [vmem:[#allocation8_spill] sm:$0xff] %v3629_v40  ;;  %v3637_v42 = vld [vmem:[%s7878_s2 + $0x158] sm:$0xff]  ;;  %v57_v44 = vld [vmem:[%s7877_s1 + $0x28] sm:$0xff]  ;;  %v3657_v47 = vld [vmem:[%s7878_s2 + $0x140] sm:$0xff] }
  0x10   :  { %410 = vmatpush.msrb.mxu0 %v3494_v16  ;;  %192 = vmatpush.msra.mxu2 %v60_v39  ;;  %v3649_v45 = vld [vmem:[%s7878_s2 + $0x58] sm:$0xff]  ;;  %v53_v46 = vld [vmem:[%s7877_s1 + $0x8] sm:$0xff]  ;;  %v54_v48 = vld [vmem:[%s7877_s1 + $0x10] sm:$0xff] }
  0x11   :  { %374 = vmatpush.msra.mxu3 %v3489_v15  ;;  %2683 = vmatmul.msk.f32.gmra.mxu0 %vm72_vm0, %v3500_v17  ;;  %8231 = vst [vmem:[#allocation9_spill] sm:$0xff] %v3649_v45  ;;  %v3667_v49 = vld [vmem:[%s7878_s2 + $0x40] sm:$0xff]  ;;  %v3672_v50 = vld [vmem:[%s7878_s2 + $0x128] sm:$0xff]  ;;  %v3684_v52 = vld [vmem:[%s7878_s2 + $0x110] sm:$0xff] }
  0x12   :  { %411 = vmatpush.msrb.mxu0 %v3511_v19  ;;  %152 = vmatpush.msra.mxu1 %v56_v43  ;;  %8232 = vst [vmem:[#allocation10_spill] sm:$0xff] %v3667_v49  ;;  %v48_v51 = vld [vmem:[%s7879_s0 + $0x20] sm:$0xff]  ;;  %v3690_v53 = vld [vmem:[%s7878_s2 + $0x28] sm:$0xff]  ;;  %v3699_v54 = vld [vmem:[%s7878_s2 + $0xf8] sm:$0xff] }
  0x13   :  { %375 = vmatpush.msra.mxu3 %v3506_v18  ;;  %193 = vmatpush.msra.mxu2 %v57_v44  ;;  %8233 = vst [vmem:[#allocation11_spill] sm:$0xff] %v3684_v52  ;;  %v3704_v55 = vld [vmem:[%s7878_s2 + $0x10] sm:$0xff]  ;;  %v3711_v56 = vld [vmem:[%s7878_s2 + $0xe0] sm:$0xff]  ;;  %v3718_v57 = vld [vmem:[%s7878_s2 + $0xc8] sm:$0xff] }
  0x14   :  { %412 = vmatpush.msrb.mxu0 %v3525_v21  ;;  %153 = vmatpush.msra.mxu1 %v53_v46  ;;  %8234 = vst [vmem:[#allocation12_spill] sm:$0xff] %v3690_v53  ;;  %v49_v58 = vld [vmem:[%s7879_s0 + $0x28] sm:$0xff]  ;;  %v3729_v59 = vld [vmem:[%s7878_s2 + $0xb0] sm:$0xff]  ;;  %v3738_v60 = vld [vmem:[%s7878_s2 + $0x98] sm:$0xff] }
  0x15   :  { %376 = vmatpush.msra.mxu3 %v3520_v20  ;;  %2690 = vmatmul.msk.f32.vlgmr.msra.gmra.mxu1 %vm72_vm0, %v3447_v8  ;;  %8235 = vst [vmem:[#allocation13_spill] sm:$0xff] %v3699_v54  ;;  %v3744_v61 = vld [vmem:[%s7878_s2 + $0x80] sm:$0xff]  ;;  %v3750_v62 = vld [vmem:[%s7878_s2 + $0x68] sm:$0xff]  ;;  %v50_v63 = vld [vmem:[%s7879_s0 + $0x30] sm:$0xff] }
  0x16   :  { %413 = vmatpush.msrb.mxu0 %v3537_v23  ;;  %194 = vmatpush.msra.mxu2 %v54_v48  ;;  %8236 = vst [vmem:[#allocation14_spill] sm:$0xff] %v3704_v55  ;;  %v3761_v0 = vld [vmem:[%s7878_s2 + $0x50] sm:$0xff]  ;;  %v3770_v2 = vld [vmem:[%s7878_s2 + $0x38] sm:$0xff]  ;;  %v3776_v4 = vld [vmem:[%s7878_s2 + $0x20] sm:$0xff] }
  0x17   :  { %377 = vmatpush.msra.mxu3 %v3532_v22  ;;  %2698 = vmatmul.msk.f32.vlgmr.msra.gmra.mxu2 %vm72_vm0, %v3447_v8  ;;  %8237 = vst [vmem:[#allocation15_spill] sm:$0xff] %v3711_v56  ;;  %v3782_v6 = vld [vmem:[%s7878_s2 + $0x8] sm:$0xff]  ;;  %v51_v8 = vld [vmem:[%s7879_s0 + $0x38] sm:$0xff]  ;;  %v3826_v35 = vld [vmem:[%s7882_s6 + $0x150] sm:$0xff] }
  0x18   :  { %414 = vmatpush.msrb.mxu0 %v3556_v26  ;;  %8238 = vst [vmem:[#allocation16_spill] sm:$0xff] %v3718_v57  ;;  %v3814_v32 = vld [vmem:[%s7882_s6 + $0x168] sm:$0xff]  ;;  %v3835_v39 = vld [vmem:[%s7881_s5 + $0x138] sm:$0xff]  ;;  %v3847_v44 = vld [vmem:[%s7881_s5 + $0x120] sm:$0xff] }
  0x19   :  { %378 = vmatpush.msra.mxu3 %v3544_v24  ;;  %2684 = vmatmul.msk.f32.gmra.mxu0 %vm72_vm0, %v3550_v25  ;;  %8239 = vst [vmem:[#allocation17_spill] sm:$0xff] %v3729_v59  ;;  %v3840_v43 = vld [vmem:[%s7882_s6 + $0x138] sm:$0xff]  ;;  %v3852_v46 = vld [vmem:[%s7882_s6 + $0x120] sm:$0xff] }
  0x1a   :  { %415 = vmatpush.msrb.mxu0 %v3576_v29  ;;  %8240 = vst [vmem:[#allocation18_spill] sm:$0xff] %v3738_v60  ;;  %v3857_v48 = vld [vmem:[%s7883_s3] sm:$0x7]  ;;  %v4067_v23 = vld [vmem:[%s7881_s5 + $0x18] sm:$0xff] }
  0x1b   :  { %379 = vmatpush.msra.mxu3 %v3561_v27  ;;  %8241 = vst [vmem:[#allocation19_spill] sm:$0xff] %v3744_v61  ;;  %v4008_v29 = vld [vmem:[%s7882_s6 + $0x60] sm:$0xff]  ;;  %v4128_v21 = vld [vmem:[%s7881_s5 + $0x58] sm:$0xff] }
  0x1c   :  { %416 = vmatpush.msrb.mxu0 %v3588_v31  ;;  %8242 = vst [vmem:[#allocation20_spill] sm:$0xff] %v3750_v62  ;;  %v3983_v31 = vld [vmem:[%s7881_s5 + $0xe8] sm:$0xff] }
  0x1d   :  { %380 = vmatpush.msra.mxu3 %v3570_v28  ;;  %2691 = vmatmul.msk.f32.gmra.mxu1 %vm72_vm0, %v3500_v17  ;;  %8243 = vst [vmem:[#allocation21_spill] sm:$0xff] %v3761_v0 }
  0x1e   :  { %417 = vmatpush.msrb.mxu0 %v3611_v36  ;;  %8244 = vst [vmem:[#allocation22_spill] sm:$0xff] %v3770_v2  ;;  %v3969_v36 = vld [vmem:[%s7882_s6 + $0x90] sm:$0xff] }
  0x1f   :  { %381 = vmatpush.msra.mxu3 %v3581_v30  ;;  %2699 = vmatmul.msk.f32.gmra.mxu2 %vm72_vm0, %v3500_v17  ;;  %8245 = vst [vmem:[#allocation23_spill] sm:$0xff] %v3776_v4 }
  0x20   :  { %418 = vmatpush.msrb.mxu0 %v3629_v40  ;;  %8246 = vst [vmem:[#allocation24_spill] sm:$0xff] %v3782_v6  ;;  %v3962_v40 = vld [vmem:[%s7881_s5 + $0x100] sm:$0xff] }
  0x21   :  { %382 = vmatpush.msra.mxu3 %v3596_v33  ;;  %2685 = vmatmul.msk.f32.gmra.mxu0 %vm72_vm0, %v3601_v34  ;;  %8247 = vst [vmem:[#allocation25_spill] sm:$0xff] %v3814_v32 }
  0x22   :  { %383 = vmatmul.f32.vlgmr.msra.gmra.mxu3 %v7891_v41  ;;  %419 = vmatpush.msrb.mxu0 %v3649_v45  ;;  %8248 = vst [vmem:[#allocation26_spill] sm:$0xff] %v3826_v35  ;;  %v3951_v45 = vld [vmem:[%s7882_s6 + $0xa8] sm:$0xff] }
  0x23   :  { %387 = vmatpush.msrb.mxu3 %v3619_v38  ;;  %8250 = vst [vmem:[#allocation28_spill] sm:$0xff] %v3840_v43 }
  0x24   :  { %420 = vmatpush.msrb.mxu0 %v3667_v49  ;;  %8251 = vst [vmem:[#allocation29_spill] sm:$0xff] %v3847_v44  ;;  %v3933_v49 = vld [vmem:[%s7882_s6 + $0xc0] sm:$0xff] }
  0x25   :  { %388 = vmatpush.msrb.mxu3 %v3637_v42  ;;  %2692 = vmatmul.msk.f32.gmra.mxu1 %vm72_vm0, %v3550_v25  ;;  %8252 = vst [vmem:[#allocation30_spill] sm:$0xff] %v3852_v46 }
  0x26   :  { %421 = vmatpush.msrb.mxu0 %v3690_v53  ;;  %v3928_v53 = vld [vmem:[%s7881_s5 + $0x130] sm:$0xff]  ;;  %8262 = vst [vmem:[#allocation40_spill] sm:$0xff] %v3933_v49 }
  0x27   :  { %389 = vmatpush.msrb.mxu3 %v3657_v47  ;;  %2700 = vmatmul.msk.f32.gmra.mxu2 %vm72_vm0, %v3550_v25  ;;  %v3809_v25 = vld [vmem:[%s7881_s5 + $0x168] sm:$0xff]  ;;  %8264 = vst [vmem:[#allocation42_spill] sm:$0xff] %v3951_v45 }
  0x28   :  { %422 = vmatpush.msrb.mxu0 %v3704_v55  ;;  %485 = vmatpush.msrb.mxu1 %v3809_v25  ;;  %8266 = vst [vmem:[#allocation44_spill] sm:$0xff] %v3969_v36 }
  0x29   :  { %390 = vmatpush.msrb.mxu3 %v3672_v50  ;;  %2686 = vmatmul.msk.f32.gmra.mxu0 %vm72_vm0, %v48_v51  ;;  %8271 = vst [vmem:[#allocation49_spill] sm:$0xff] %v4008_v29 }
  0x2a   :  { %545 = vmatpush.msra.mxu0 %v3814_v32  ;;  %v3908_v32 = vld [vmem:[%s7881_s5 + $0x148] sm:$0xff]  ;;  %8276 = vst [vmem:[#allocation54_spill] sm:$0xff] %v4067_v23 }
  0x2b   :  { %391 = vmatpush.msrb.mxu3 %v3684_v52 }
  0x2c   :  { %546 = vmatpush.msra.mxu0 %v3826_v35  ;;  %v3903_v35 = vld [vmem:[%s7881_s5 + $0xd8] sm:$0xff] }
  0x2d   :  { %392 = vmatpush.msrb.mxu3 %v3699_v54  ;;  %2693 = vmatmul.msk.f32.gmra.mxu1 %vm72_vm0, %v3601_v34  ;;  %8258 = vst [vmem:[#allocation36_spill] sm:$0xff] %v3903_v35 }
  0x2e   :  { %547 = vmatpush.msra.mxu0 %v3840_v43 }
  0x2f   :  { %393 = vmatpush.msrb.mxu3 %v3711_v56  ;;  %2701 = vmatmul.msk.f32.gmra.mxu2 %vm72_vm0, %v3601_v34  ;;  %v3821_v34 = vld [vmem:[%s7881_s5 + $0x150] sm:$0xff] }
  0x30   :  { %486 = vmatpush.msrb.mxu1 %v3821_v34  ;;  %548 = vmatpush.msra.mxu0 %v3852_v46  ;;  %v3895_v46 = vperm.slane %v3857_v48, 0 }
  0x31   :  { %394 = vmatpush.msrb.mxu3 %v3718_v57  ;;  %2687 = vmatmul.msk.f32.gmra.mxu0 %vm72_vm0, %v49_v58 }
  0x32   :  { %487 = vmatpush.msrb.mxu1 %v3835_v39  ;;  %8257 = vst [vmem:[#allocation35_spill] sm:$0xff] %v3895_v46 }
  0x33   :  { %395 = vmatpush.msrb.mxu3 %v3729_v59 }
  0x34   :  { %488 = vmatpush.msrb.mxu1 %v3847_v44  ;;  %v4183_v44 = vld [vmem:[%s7881_s5 + $0xc8] sm:$0xff] }
  0x35   :  { %396 = vmatpush.msrb.mxu3 %v3738_v60  ;;  %2694 = vmatmul.msk.f32.gmra.mxu1 %vm72_vm0, %v48_v51  ;;  %8290 = vst [vmem:[#allocation68_spill] sm:$0xff] %v4183_v44 }
  0x37   :  { %397 = vmatpush.msrb.mxu3 %v3744_v61  ;;  %2702 = vmatmul.msk.f32.gmra.mxu2 %vm72_vm0, %v48_v51  ;;  %v3864_v51 = vld [vmem:[%s7881_s5 + $0x108] sm:$0xff] }
  0x38   :  { %8253 = vst [vmem:[#allocation31_spill] sm:$0xff] %v3864_v51  ;;  %489 = vmatpush.msrb.mxu1 %v3864_v51 }
  0x39   :  { %398 = vmatpush.msrb.mxu3 %v3750_v62  ;;  %2688 = vmatmul.msk.f32.gmra.mxu0 %vm72_vm0, %v50_v63 }
  0x3b   :  { %399 = vmatpush.msrb.mxu3 %v3761_v0 }
  0x3d   :  { %400 = vmatpush.msrb.mxu3 %v3770_v2  ;;  %2695 = vmatmul.msk.f32.gmra.mxu1 %vm72_vm0, %v49_v58 }
  0x3f   :  { %401 = vmatpush.msrb.mxu3 %v3776_v4  ;;  %2703 = vmatmul.msk.f32.gmra.mxu2 %vm72_vm0, %v49_v58  ;;  %v3869_v58 = vld [vmem:[%s7881_s5 + $0x178] sm:$0xff] }
  0x41   :  { %402 = vmatpush.msrb.mxu3 %v3782_v6  ;;  %2689 = vmatmul.msk.f32.gmra.mxu0 %vm72_vm0, %v51_v8 }
  0x42   :  { %403 = vmatmul.f32.vlgmr.msrb.gmra.mxu3 %v7891_v41 }
  0x43   :  { %525 = vmatpush.msra.mxu3 %v3869_v58 }
  0x45   :  { %2696 = vmatmul.msk.f32.gmra.mxu1 %vm72_vm0, %v50_v63 }
  0x47   :  { %2704 = vmatmul.msk.f32.gmra.mxu2 %vm72_vm0, %v50_v63  ;;  %v3874_v63 = vld [vmem:[%s7882_s6 + $0x108] sm:$0xff] }
  0x48   :  { %8254 = vst [vmem:[#allocation32_spill] sm:$0xff] %v3874_v63  ;;  %549 = vmatpush.msra.mxu0 %v3874_v63  ;;  %v3913_v63 = vld [vmem:[%s7882_s6 + $0xd8] sm:$0xff] }
  0x49   :  { %423 = vmatmul.f32.vlgmr.msrb.gmra.mxu0 %v7891_v41  ;;  %v3886_v41 = vld [vmem:[%s7881_s5 + $0x160] sm:$0xff]  ;;  %8259 = vst [vmem:[#allocation37_spill] sm:$0xff] %v3913_v63 }
  0x4a   :  { %526 = vmatpush.msra.mxu3 %v3886_v41 }
  0x4c   :  { %527 = vmatpush.msra.mxu3 %v3908_v32 }
  0x4d   :  { %2697 = vmatmul.msk.f32.gmra.mxu1 %vm72_vm0, %v51_v8 }
  0x4e   :  { %528 = vmatpush.msra.mxu3 %v3928_v53 }
  0x4f   :  { %2705 = vmatmul.msk.f32.gmra.mxu2 %vm72_vm0, %v51_v8  ;;  %v3881_v8 = vld [vmem:[%s7881_s5 + $0xf0] sm:$0xff] }
  0x50   :  { %8255 = vst [vmem:[#allocation33_spill] sm:$0xff] %v3881_v8  ;;  %490 = vmatpush.msrb.mxu1 %v3881_v8 }
  0x52   :  { %491 = vmatpush.msrb.mxu1 %v3903_v35 }
  0x86   :  { %v3804_v17 = vpop.f32.mrf.mxu0 }
  0x87   :  { %v115_v35 = vadd.f32 %v3804_v17, %v3895_v46  ;;  %v4053_v17 = vld [vmem:[%s7881_s5 + $0xa0] sm:$0xff] }
  0x8e   :  { %v3830_v37 = vpop.f32.mrf.mxu0 }
  0x8f   :  { %8249 = vst [vmem:[#allocation27_spill] sm:$0xff] %v3830_v37  ;;  %v3891_v37 = vld [vmem:[%s7882_s6 + $0xf0] sm:$0xff] }
  0x90   :  { %8256 = vst [vmem:[#allocation34_spill] sm:$0xff] %v3891_v37  ;;  %550 = vmatpush.msra.mxu0 %v3891_v37  ;;  %v3923_v37 = vld [vmem:[%s7881_s5 + $0xc0] sm:$0xff] }
  0x91   :  { %8261 = vst [vmem:[#allocation39_spill] sm:$0xff] %v3923_v37  ;;  %492 = vmatpush.msrb.mxu1 %v3923_v37  ;;  %v4003_v37 = vld [vmem:[%s7881_s5 + $0xd0] sm:$0xff] }
  0x92   :  { %551 = vmatpush.msra.mxu0 %v3913_v63  ;;  %v3957_v63 = vld [vmem:[%s7881_s5 + $0x90] sm:$0xff] }
  0x93   :  { %8265 = vst [vmem:[#allocation43_spill] sm:$0xff] %v3957_v63 }
  0x94   :  { %552 = vmatpush.msra.mxu0 %v3933_v49 }
  0x96   :  { %v120_v43 = vpop.f32.mrf.mxu0  ;;  %553 = vmatpush.msra.mxu0 %v3951_v45  ;;  %v3988_v45 = vld [vmem:[%s7882_s6 + $0x78] sm:$0xff] }
  0x97   :  { %v3916_v55 = vadd.f32 %v120_v43, %v3895_v46  ;;  %v3939_v43 = vld [vmem:[%s7881_s5 + $0xa8] sm:$0xff]  ;;  %8268 = vst [vmem:[#allocation46_spill] sm:$0xff] %v3988_v45 }
  0x98   :  { %8263 = vst [vmem:[#allocation41_spill] sm:$0xff] %v3939_v43  ;;  %493 = vmatpush.msrb.mxu1 %v3939_v43  ;;  %554 = vmatpush.msra.mxu0 %v3969_v36  ;;  %v3978_v43 = vld [vmem:[%s7881_s5 + $0x78] sm:$0xff]  ;;  %v3998_v36 = vld [vmem:[%s7881_s5 + $0x60] sm:$0xff] }
  0x99   :  { %8260 = vst [vmem:[#allocation38_spill] sm:$0xff] %v3916_v55  ;;  %v3944_v55 = vld [vmem:[%s7881_s5 + $0x118] sm:$0xff] }
  0x9a   :  { %529 = vmatpush.msra.mxu3 %v3944_v55  ;;  %494 = vmatpush.msrb.mxu1 %v3957_v63  ;;  %8267 = vst [vmem:[#allocation45_spill] sm:$0xff] %v3978_v43 }
  0x9b   :  { %8270 = vst [vmem:[#allocation48_spill] sm:$0xff] %v3998_v36  ;;  %555 = vmatpush.msra.mxu0 %v3988_v45  ;;  %v4031_v45 = vld [vmem:[%s7882_s6 + $0x48] sm:$0xff] }
  0x9c   :  { %530 = vmatpush.msra.mxu3 %v3962_v40  ;;  %495 = vmatpush.msrb.mxu1 %v3978_v43  ;;  %v4024_v43 = vld [vmem:[%s7881_s5 + $0xb8] sm:$0xff]  ;;  %8273 = vst [vmem:[#allocation51_spill] sm:$0xff] %v4031_v45 }
  0x9d   :  { %556 = vmatpush.msra.mxu0 %v4008_v29  ;;  %v4048_v29 = vld [vmem:[%s7881_s5 + $0x158] sm:$0xff] }
  0x9e   :  { %v123_v49 = vpop.f32.mrf.mxu0  ;;  %531 = vmatpush.msra.mxu3 %v3983_v31  ;;  %496 = vmatpush.msrb.mxu1 %v3998_v36  ;;  %v4043_v36 = vld [vmem:[%s7881_s5 + $0x30] sm:$0xff] }
  0x9f   :  { %v3991_v63 = vadd.f32 %v123_v49, %v3895_v46  ;;  %v4014_v49 = vld [vmem:[%s7881_s5 + $0x170] sm:$0xff]  ;;  %557 = vmatpush.msra.mxu0 %v4031_v45  ;;  %8274 = vst [vmem:[#allocation52_spill] sm:$0xff] %v4043_v36 }
  0xa0   :  { %532 = vmatpush.msra.mxu3 %v4003_v37  ;;  %505 = vmatpush.msrb.mxu2 %v4014_v49  ;;  %v4060_v45 = vld [vmem:[%s7882_s6 + $0x30] sm:$0xff] }
  0xa1   :  { %8269 = vst [vmem:[#allocation47_spill] sm:$0xff] %v3991_v63  ;;  %v4019_v63 = vld [vmem:[%s7881_s5 + $0x48] sm:$0xff]  ;;  %558 = vmatpush.msra.mxu0 %v4060_v45 }
  0xa2   :  { %8272 = vst [vmem:[#allocation50_spill] sm:$0xff] %v4019_v63  ;;  %497 = vmatpush.msrb.mxu1 %v4019_v63  ;;  %533 = vmatpush.msra.mxu3 %v4024_v43 }
  0xa3   :  { %506 = vmatpush.msrb.mxu2 %v4048_v29  ;;  %8275 = vst [vmem:[#allocation53_spill] sm:$0xff] %v4060_v45  ;;  %v4082_v45 = vld [vmem:[%s7881_s5 + $0x88] sm:$0xff] }
  0xa4   :  { %498 = vmatpush.msrb.mxu1 %v4043_v36  ;;  %534 = vmatpush.msra.mxu3 %v4053_v17  ;;  %v4087_v36 = vld [vmem:[%s7882_s6 + $0x18] sm:$0xff] }
  0xa5   :  { %v384_v26 = vpop.f32.mrf.mxu3  ;;  %8278 = vst [vmem:[#allocation56_spill] sm:$0xff] %v4087_v36  ;;  %559 = vmatpush.msra.mxu0 %v4087_v36  ;;  %v4116_v36 = vld [vmem:[%s7882_s6 + $0x170] sm:$0xff] }
  0xa6   :  { %v427_v63 = vadd.f32 %v384_v26, %v115_v35  ;;  %v126_v8 = vpop.f32.mrf.mxu0  ;;  %v4072_v26 = vld [vmem:[%s7881_s5 + $0x140] sm:$0xff]  ;;  %499 = vmatpush.msrb.mxu1 %v4067_v23  ;;  %535 = vmatpush.msra.mxu3 %v4082_v45  ;;  %v4104_v23 = vld [vmem:[%s7881_s5 + $0x70] sm:$0xff]  ;;  %8282 = vst [vmem:[#allocation60_spill] sm:$0xff] %v4116_v36 }
  0xa7   :  { %v4075_v35 = vadd.f32 %v126_v8, %v3895_v46  ;;  %507 = vmatpush.msrb.mxu2 %v4072_v26  ;;  %v4094_v8 = vld [vmem:[%s7881_s5] sm:$0xff] }
  0xa8   :  { %v2706_v51 = vmul.f32 -1.442695, %v427_v63  ;;  %8279 = vst [vmem:[#allocation57_spill] sm:$0xff] %v4094_v8  ;;  %500 = vmatpush.msrb.mxu1 %v4094_v8  ;;  %v4111_v63 = vld [vmem:[%s7882_s6] sm:$0xff]  ;;  %536 = vmatpush.msra.mxu3 %v4104_v23  ;;  %v4123_v8 = vld [vmem:[%s7881_s5 + $0x110] sm:$0xff] }
  0xa9   :  { %8277 = vst [vmem:[#allocation55_spill] sm:$0xff] %v4075_v35  ;;  %v4099_v35 = vld [vmem:[%s7881_s5 + $0x128] sm:$0xff]  ;;  %560 = vmatpush.msra.mxu0 %v4111_v63 }
  0xaa   :  { %8280 = vst [vmem:[#allocation58_spill] sm:$0xff] %v4099_v35  ;;  %508 = vmatpush.msrb.mxu2 %v4099_v35  ;;  %565 = vmatpush.msra.mxu1 %v4116_v36  ;;  %v4135_v35 = vld [vmem:[%s7882_s6 + $0x158] sm:$0xff]  ;;  %2743 = vpow2.f32 %v2706_v51  ;;  %v4147_v36 = vld [vmem:[%s7881_s5 + $0x40] sm:$0xff] }
  0xab   :  { %8281 = vst [vmem:[#allocation59_spill] sm:$0xff] %v4111_v63  ;;  %676 = vmatpush.msrb.mxu0 %v3619_v38  ;;  %537 = vmatpush.msra.mxu3 %v4128_v21  ;;  %v4142_v63 = vld [vmem:[%s7881_s5 + $0xf8] sm:$0xff]  ;;  %v4154_v38 = vld [vmem:[%s7882_s6 + $0x140] sm:$0xff] }
  0xac   :  { %8283 = vst [vmem:[#allocation61_spill] sm:$0xff] %v4123_v8  ;;  %509 = vmatpush.msrb.mxu2 %v4123_v8  ;;  %566 = vmatpush.msra.mxu1 %v4135_v35  ;;  %v4161_v8 = vld [vmem:[%s7881_s5 + $0xe0] sm:$0xff] }
  0xad   :  { %8284 = vst [vmem:[#allocation62_spill] sm:$0xff] %v4135_v35  ;;  %677 = vmatpush.msrb.mxu0 %v3637_v42  ;;  %538 = vmatpush.msra.mxu3 %v4147_v36  ;;  %v4166_v35 = vld [vmem:[%s7881_s5 + $0x28] sm:$0xff] }
  0xae   :  { %8285 = vst [vmem:[#allocation63_spill] sm:$0xff] %v4142_v63  ;;  %v129_v51 = vpop.f32.mrf.mxu0  ;;  %510 = vmatpush.msrb.mxu2 %v4142_v63  ;;  %567 = vmatpush.msra.mxu1 %v4154_v38  ;;  %v4176_v63 = vld [vmem:[%s7882_s6 + $0x128] sm:$0xff] }
  0xaf   :  { %8286 = vst [vmem:[#allocation64_spill] sm:$0xff] %v4154_v38  ;;  %v4169_v42 = vadd.f32 %v129_v51, %v3895_v46  ;;  %678 = vmatpush.msrb.mxu0 %v3657_v47  ;;  %539 = vmatpush.msra.mxu3 %v4166_v35  ;;  %v4188_v51 = vld [vmem:[%s7881_s5 + $0x10] sm:$0xff] }
  0xb0   :  { %8287 = vst [vmem:[#allocation65_spill] sm:$0xff] %v4161_v8  ;;  %511 = vmatpush.msrb.mxu2 %v4161_v8  ;;  %568 = vmatpush.msra.mxu1 %v4176_v63  ;;  %v4195_v47 = vld [vmem:[%s7882_s6 + $0x110] sm:$0xff] }
  0xb1   :  { %8288 = vst [vmem:[#allocation66_spill] sm:$0xff] %v4169_v42  ;;  %679 = vmatpush.msrb.mxu0 %v3672_v50  ;;  %v2744_v42 = vpop.eup %2743  ;;  %540 = vmatpush.msra.mxu3 %v4188_v51  ;;  %v4202_v38 = vld [vmem:[%s7881_s5 + $0xb0] sm:$0xff]  ;;  %v4209_v50 = vld [vmem:[%s7882_s6 + $0xf8] sm:$0xff] }
  0xb2   :  { %8289 = vst [vmem:[#allocation67_spill] sm:$0xff] %v4176_v63  ;;  %512 = vmatpush.msrb.mxu2 %v4183_v44  ;;  %569 = vmatpush.msra.mxu1 %v4195_v47  ;;  %v4216_v63 = vld [vmem:[%s7881_s5 + $0x98] sm:$0xff]  ;;  %v4218_v44 = vadd.f32 1.0, %v2744_v42 }
  0xb3   :  { %8291 = vst [vmem:[#allocation69_spill] sm:$0xff] %v4195_v47  ;;  %656 = vmatpush.msrb.mxu3 %v3415_v1  ;;  %680 = vmatpush.msrb.mxu0 %v3684_v52  ;;  %v4225_v47 = vld [vmem:[%s7882_s6 + $0xe0] sm:$0xff] }
  0xb4   :  { %8292 = vst [vmem:[#allocation70_spill] sm:$0xff] %v4209_v50  ;;  %513 = vmatpush.msrb.mxu2 %v4202_v38  ;;  %570 = vmatpush.msra.mxu1 %v4209_v50  ;;  %v4232_v52 = vld [vmem:[%s7881_s5 + $0x80] sm:$0xff]  ;;  %v4242_v50 = vld [vmem:[%s7882_s6 + $0xc8] sm:$0xff]  ;;  %2745 = vrcp.f32 %v4218_v44  ;;  %vm437_vm2 = vweird.f32 %v4218_v44 }
  0xb5   :  { %657 = vmatpush.msrb.mxu3 %v3424_v3  ;;  %8293 = vst [vmem:[#allocation71_spill] sm:$0xff] %v4225_v47  ;;  %681 = vmatpush.msrb.mxu0 %v3699_v54  ;;  %v4249_v54 = vld [vmem:[%s7881_s5 + $0x68] sm:$0xff] }
  0xb6   :  { %v132_v8 = vpop.f32.mrf.mxu0  ;;  %514 = vmatpush.msrb.mxu2 %v4216_v63  ;;  %571 = vmatpush.msra.mxu1 %v4225_v47  ;;  %8295 = vst [vmem:[#allocation73_spill] sm:$0xff] %v4242_v50  ;;  %v155_v47 = vpop.f32.mrf.mxu1 }
  0xb7   :  { %v4235_v42 = vadd.f32 %v132_v8, %v3895_v46  ;;  %658 = vmatpush.msrb.mxu3 %v3432_v5  ;;  %682 = vmatpush.msrb.mxu0 %v3711_v56  ;;  %8296 = vst [vmem:[#allocation74_spill] sm:$0xff] %v4249_v54  ;;  %v4257_v8 = vld [vmem:[%s7882_s6 + $0xb0] sm:$0xff]  ;;  %v4271_v56 = vld [vmem:[%s7882_s6 + $0x98] sm:$0xff] }
  0xb8   :  { %515 = vmatpush.msrb.mxu2 %v4232_v52  ;;  %572 = vmatpush.msra.mxu1 %v4242_v50  ;;  %8297 = vst [vmem:[#allocation75_spill] sm:$0xff] %v4257_v8  ;;  %v4281_v50 = vperm.slane %v3857_v48, 1 }
  0xb9   :  { %8294 = vst [vmem:[#allocation72_spill] sm:$0xff] %v4235_v42  ;;  %659 = vmatpush.msrb.mxu3 %v3441_v7  ;;  %683 = vmatpush.msrb.mxu0 %v3718_v57  ;;  %v4264_v42 = vld [vmem:[%s7881_s5 + $0x50] sm:$0xff]  ;;  %v4278_v57 = vld [vmem:[%s7881_s5 + $0x38] sm:$0xff] }
  0xba   :  { %516 = vmatpush.msrb.mxu2 %v4249_v54  ;;  %8298 = vst [vmem:[#allocation76_spill] sm:$0xff] %v4264_v42  ;;  %573 = vmatpush.msra.mxu1 %v4257_v8  ;;  %v4288_v8 = vld [vmem:[%s7882_s6 + $0x80] sm:$0xff]  ;;  %v4297_v54 = vpop.eup %2745 }
  0xbb   :  { %660 = vmatpush.msrb.mxu3 %v3452_v9  ;;  %8299 = vst [vmem:[#allocation77_spill] sm:$0xff] %v4271_v56  ;;  %684 = vmatpush.msrb.mxu0 %v3729_v59  ;;  %vm438_vm1 = vweird.f32 %v4297_v54 }
  0xbc   :  { %517 = vmatpush.msrb.mxu2 %v4264_v42  ;;  %8300 = vst [vmem:[#allocation78_spill] sm:$0xff] %v4278_v57  ;;  %574 = vmatpush.msra.mxu1 %v4271_v56  ;;  %v4295_v42 = vld [vmem:[%s7881_s5 + $0x20] sm:$0xff]  ;;  %vm4414_vm3 = vmor %vm437_vm2, %vm438_vm1 }
  0xbd   :  { %8301 = vst [vmem:[#allocation79_spill] sm:$0xff] %v4281_v50  ;;  %661 = vmatpush.msrb.mxu3 %v3465_v11  ;;  %685 = vmatpush.msrb.mxu0 %v3738_v60  ;;  %v4307_v60 = vld [vmem:[%s7882_s6 + $0x68] sm:$0xff] }
  0xbe   :  { %8302 = vst [vmem:[#allocation80_spill] sm:$0xff] %v4288_v8  ;;  %v135_v59 = vpop.f32.mrf.mxu0  ;;  %518 = vmatpush.msrb.mxu2 %v4278_v57  ;;  %575 = vmatpush.msra.mxu1 %v4288_v8  ;;  %v4314_v57 = vld [vmem:[%s7881_s5 + $0x8] sm:$0xff] }
  0xbf   :  { %8303 = vst [vmem:[#allocation81_spill] sm:$0xff] %v4295_v42  ;;  %v4300_v56 = vadd.f32 %v135_v59, %v3895_v46  ;;  %662 = vmatpush.msrb.mxu3 %v3477_v13  ;;  %686 = vmatpush.msrb.mxu0 %v3744_v61  ;;  %v156_v59 = vadd.f32 %v155_v47, %v4281_v50  ;;  %v4327_v46 = vld [vmem:[%s7882_s6 + $0x178] sm:$0xff]  ;;  %v8308_v47 = vmov 0.0  }
  0xc0   :  { %8305 = vst [vmem:[#allocation83_spill] sm:$0xff] %v4307_v60  ;;  %519 = vmatpush.msrb.mxu2 %v4295_v42  ;;  %576 = vmatpush.msra.mxu1 %v4307_v60  ;;  %v433_v61 = vmul.f32 %v4297_v54, %v4218_v44  ;;  %v4338_v50 = vld [vmem:[%s7882_s6 + $0x38] sm:$0xff]  ;;  %v4343_v60 = vld [vmem:[%s7882_s6 + $0x160] sm:$0xff] }
  0xc1   :  { %8304 = vst [vmem:[#allocation82_spill] sm:$0xff] %v4300_v56  ;;  %663 = vmatpush.msrb.mxu3 %v3489_v15  ;;  %v4322_v56 = vld [vmem:[%s7882_s6 + $0x50] sm:$0xff]  ;;  %687 = vmatpush.msrb.mxu0 %v3750_v62 }
  0xc2   :  { %8306 = vst [vmem:[#allocation84_spill] sm:$0xff] %v4314_v57  ;;  %520 = vmatpush.msrb.mxu2 %v4314_v57  ;;  %561 = vmatmul.f32.vlgmr.msra.gmra.mxu0 %v8308_v47  ;;  %v4357_v57 = vld [vmem:[%s7882_s6 + $0x148] sm:$0xff]  ;;  %v434_v42 = vsub.f32 1.0, %v433_v61 }
  0xc3   :  { %8307 = vst [vmem:[#allocation85_spill] sm:$0xff] %v4322_v56  ;;  %577 = vmatpush.msra.mxu1 %v4322_v56  ;;  %664 = vmatpush.msrb.mxu3 %v3506_v18  ;;  %v4352_v56 = vld [vmem:[%s7882_s6 + $0x20] sm:$0xff] }
  0xc4   :  { %8309 = vst [vmem:[#allocation86_spill] sm:$0xff] %v4338_v50  ;;  %585 = vmatpush.msra.mxu2 %v4327_v46  ;;  %688 = vmatpush.msrb.mxu0 %v3761_v0  ;;  %v4371_v0 = vld [vmem:[%s7882_s6 + $0x130] sm:$0xff]  ;;  %v435_v61 = vmul.f32 %v4297_v54, %v434_v42 }
  0xc5   :  { %v404_v8 = vpop.f32.mrf.mxu3  ;;  %578 = vmatpush.msra.mxu1 %v4338_v50  ;;  %8310 = vst [vmem:[#allocation87_spill] sm:$0xff] %v4352_v56  ;;  %665 = vmatpush.msrb.mxu3 %v3520_v20 }
  0xc6   :  { %v447_v62 = vadd.f32 %v404_v8, %v156_v59  ;;  %586 = vmatpush.msra.mxu2 %v4343_v60  ;;  %689 = vmatpush.msrb.mxu0 %v3770_v2  ;;  %v4366_v59 = vld [vmem:[%s7882_s6 + $0x8] sm:$0xff]  ;;  %v436_v42 = vadd.f32 %v4297_v54, %v435_v61  ;;  %v424_v2 = vpop.f32.mrf.mxu0 }
  0xc7   :  { %579 = vmatpush.msra.mxu1 %v4352_v56  ;;  %8311 = vst [vmem:[#allocation88_spill] sm:$0xff] %v4366_v59  ;;  %666 = vmatpush.msrb.mxu3 %v3532_v22  ;;  %v441_v56 = vand.u32 2147483647, %v4218_v44 }
  0xc8   :  { %v2707_v8 = vmul.f32 -1.442695, %v447_v62  ;;  %587 = vmatpush.msra.mxu2 %v4357_v57  ;;  %690 = vmatpush.msrb.mxu0 %v3776_v4  ;;  %v4384_v62 = vld [vmem:[%s7882_s6 + $0x118] sm:$0xff] }
  0xc9   :  { %580 = vmatpush.msra.mxu1 %v4366_v59  ;;  %667 = vmatpush.msrb.mxu3 %v3544_v24  ;;  %8312 = vst [vmem:[#allocation89_spill] sm:$0xff] %v4384_v62  ;;  %v443_v59 = vand.u32 2147483648, %v4218_v44  ;;  %v4429_v44 = vperm.slane %v3857_v48, 2  ;;  %vm442_vm4 = vcmp.eq.f32.partialorder %v441_v56, 8.507059e+37 }
  0xca   :  { %2747 = vpow2.f32 %v2707_v8  ;;  %588 = vmatpush.msra.mxu2 %v4371_v0  ;;  %691 = vmatpush.msrb.mxu0 %v3782_v6  ;;  %v4391_v8 = vld [vmem:[%s7882_s6 + $0x100] sm:$0xff] }
  0xcb   :  { %668 = vmatpush.msrb.mxu3 %v3561_v27  ;;  %8313 = vst [vmem:[#allocation90_spill] sm:$0xff] %v4391_v8  ;;  %v4399_v6 = vld [vmem:[%s7880_s4] ss:$0 sm:$0xff] }
  0xcc   :  { %589 = vmatpush.msra.mxu2 %v4384_v62  ;;  %804 = vmatpush.msra.mxu0 %v3869_v58  ;;  %v4407_v58 = vld [vmem:[%s7882_s6 + $0xe8] sm:$0xff]  ;;  %8317 = vst [vmem:[#allocation92_spill] sm:$0xff] %v4429_v44  ;;  %v196_v62 = vpop.f32.mrf.mxu2 }
  0xcd   :  { %669 = vmatpush.msrb.mxu3 %v3570_v28  ;;  %8314 = vst [vmem:[#allocation91_spill] sm:$0xff] %v4407_v58  ;;  %v197_v50 = vadd.f32 %v196_v62, %v4429_v44 }
  0xce   :  { %590 = vmatpush.msra.mxu2 %v4391_v8  ;;  %805 = vmatpush.msra.mxu0 %v3886_v41  ;;  %v4421_v8 = vld [vmem:[%s7882_s6 + $0xd0] sm:$0xff]  ;;  %v440_v41 = vsel %vm4414_vm3, %v4297_v54, %v436_v42 }
  0xcf   :  { %670 = vmatpush.msrb.mxu3 %v3581_v30 }
  0xd0   :  { %v2748_v4 = vpop.eup %2747  ;;  %591 = vmatpush.msra.mxu2 %v4407_v58  ;;  %806 = vmatpush.msra.mxu0 %v3908_v32  ;;  %v444_v58 = vor.u32 1.1754944e-38, %v443_v59  ;;  %v4436_v32 = vld [vmem:[%s7882_s6 + $0xb8] sm:$0xff] }
  0xd1   :  { %v451_v61 = vadd.f32 1.0, %v2748_v4  ;;  %v470_v4 = vadd.f32 %v4399_v6, %v424_v2  ;;  %671 = vmatpush.msrb.mxu3 %v3596_v33  ;;  %v4443_v2 = vld [vmem:[%s7882_s6 + $0xa0] sm:$0xff] }
  0xd2   :  { %592 = vmatpush.msra.mxu2 %v4421_v8  ;;  %807 = vmatpush.msra.mxu0 %v3928_v53  ;;  %v445_v54 = vsel %vm442_vm4, %v444_v58, %v440_v41  ;;  %v4451_v53 = vld [vmem:[%s7882_s6 + $0x88] sm:$0xff]  ;;  %v4465_v58 = vld [vmem:[%s7882_s6 + $0x58] sm:$0xff] }
  0xd3   :  { %2749 = vrcp.f32 %v451_v61  ;;  %v471_v48 = vmul.f32 %v470_v4, %v445_v54  ;;  %v461_v4 = vand.u32 2147483647, %v451_v61  ;;  %vm457_vm6 = vweird.f32 %v451_v61 }
  0xd4   :  { %593 = vmatpush.msra.mxu2 %v4436_v32  ;;  %808 = vmatpush.msra.mxu0 %v3944_v55  ;;  %v4458_v55 = vld [vmem:[%s7882_s6 + $0x70] sm:$0xff] }
  0xd5   :  { %v472_v62 = vadd.f32 %v471_v48, %v197_v50  ;;  %vm462_vm8 = vcmp.eq.f32.partialorder %v461_v4, 8.507059e+37  ;;  %v8344_v4 = vld [vmem:[#allocation12_spill] sm:$0xff] }
  0xd6   :  { %594 = vmatpush.msra.mxu2 %v4443_v2  ;;  %809 = vmatpush.msra.mxu0 %v3962_v40  ;;  %v463_v40 = vand.u32 2147483648, %v451_v61 }
  0xd7   :  { %2751 = vtanh.f32 %v472_v62 }
  0xd8   :  { %595 = vmatpush.msra.mxu2 %v4451_v53  ;;  %810 = vmatpush.msra.mxu0 %v3983_v31  ;;  %v4472_v31 = vld [vmem:[%s7882_s6 + $0x40] sm:$0xff]  ;;  %v464_v48 = vor.u32 1.1754944e-38, %v463_v40 }
  0xd9   :  { %v2750_v56 = vpop.eup %2749 }
  0xda   :  { %v453_v59 = vmul.f32 %v2750_v56, %v451_v61  ;;  %596 = vmatpush.msra.mxu2 %v4458_v55  ;;  %811 = vmatpush.msra.mxu0 %v4003_v37  ;;  %vm458_vm5 = vweird.f32 %v2750_v56  ;;  %v4479_v37 = vld [vmem:[%s7882_s6 + $0x28] sm:$0xff] }
  0xdb   :  { %vm459_vm7 = vmor %vm457_vm6, %vm458_vm5 }
  0xdc   :  { %v454_v42 = vsub.f32 1.0, %v453_v59  ;;  %597 = vmatpush.msra.mxu2 %v4465_v58  ;;  %812 = vmatpush.msra.mxu0 %v4024_v43  ;;  %v4486_v43 = vld [vmem:[%s7882_s6 + $0x10] sm:$0xff] }
  0xde   :  { %v455_v41 = vmul.f32 %v2750_v56, %v454_v42  ;;  %598 = vmatpush.msra.mxu2 %v4472_v31  ;;  %813 = vmatpush.msra.mxu0 %v4053_v17  ;;  %v2752_v17 = vpop.eup %2751 }
  0xe0   :  { %v456_v54 = vadd.f32 %v2750_v56, %v455_v41  ;;  %599 = vmatpush.msra.mxu2 %v4479_v37  ;;  %814 = vmatpush.msra.mxu0 %v4082_v45  ;;  %v8329_v45 = vld [vmem:[#allocation5_spill] sm:$0xff]  ;;  %v8342_v41 = vld [vmem:[#allocation50_spill] sm:$0xff] }
  0xe2   :  { %v460_v50 = vsel %vm459_vm7, %v2750_v56, %v456_v54  ;;  %600 = vmatpush.msra.mxu2 %v4486_v43  ;;  %815 = vmatpush.msra.mxu0 %v4104_v23  ;;  %v8324_v23 = vld [vmem:[#allocation33_spill] sm:$0xff]  ;;  %v8341_v56 = vld [vmem:[#allocation10_spill] sm:$0xff]  ;;  %v8345_v54 = vld [vmem:[#allocation52_spill] sm:$0xff] }
  0xe3   :  { %v465_v61 = vsel %vm462_vm8, %v464_v48, %v460_v50  ;;  %v8347_v48 = vld [vmem:[#allocation14_spill] sm:$0xff] }
  0xe4   :  { %v474_v59 = vsub.f32 1.0, %v465_v61  ;;  %v476_v42 = vmul.f32 0.0, %v465_v61  ;;  %816 = vmatpush.msra.mxu0 %v4128_v21  ;;  %v8321_v21 = vld [vmem:[#allocation31_spill] sm:$0xff]  ;;  %v8348_v50 = vld [vmem:[#allocation54_spill] sm:$0xff]  ;;  %v8350_v61 = vld [vmem:[#allocation25_spill] sm:$0xff] }
  0xe6   :  { %v475_v62 = vmul.f32 %v2752_v17, %v474_v59  ;;  %817 = vmatpush.msra.mxu0 %v4147_v36  ;;  %v8327_v36 = vld [vmem:[#allocation36_spill] sm:$0xff]  ;;  %v8351_v59 = vld [vmem:[#allocation57_spill] sm:$0xff] }
  0xe7   :  { %v8353_v17 = vld [vmem:[#allocation84_spill] sm:$0xff] }
  0xe8   :  { %v4492_v40 = vadd.f32 %v476_v42, %v475_v62  ;;  %818 = vmatpush.msra.mxu0 %v4166_v35  ;;  %v8354_v62 = vld [vmem:[#allocation26_spill] sm:$0xff]  ;;  %v8356_v42 = vld [vmem:[#allocation28_spill] sm:$0xff] }
  0xea   :  { %501 = vmatmul.f32.vlgmr.msrb.gmra.mxu1 %v4492_v40  ;;  %521 = vmatmul.f32.vlgmr.msrb.gmra.mxu2 %v4492_v40 }
  0xeb   :  { %541 = vmatmul.f32.vlgmr.msra.gmra.mxu3 %v4492_v40  ;;  %692 = vmatmul.f32.vlgmr.msrb.gmra.mxu0 %v4492_v40 }
  0xec   :  { %696 = vmatpush.msrb.mxu1 %v3457_v10  ;;  %764 = vmatpush.msrb.mxu2 %v3809_v25  ;;  %v8318_v10 = vld [vmem:[#allocation29_spill] sm:$0xff]  ;;  %v8330_v25 = vld [vmem:[#allocation39_spill] sm:$0xff] }
  0xed   :  { %784 = vmatpush.msra.mxu3 %v4014_v49  ;;  %819 = vmatpush.msra.mxu0 %v4188_v51  ;;  %v8335_v49 = vld [vmem:[#allocation43_spill] sm:$0xff] }
  0xee   :  { %697 = vmatpush.msrb.mxu1 %v3470_v12  ;;  %765 = vmatpush.msrb.mxu2 %v3821_v34  ;;  %v8319_v12 = vld [vmem:[#allocation58_spill] sm:$0xff] }
  0xef   :  { %785 = vmatpush.msra.mxu3 %v4048_v29  ;;  %932 = vmatpush.msrb.mxu0 %v3415_v1  ;;  %v8322_v1 = vld [vmem:[#allocation61_spill] sm:$0xff]  ;;  %v8325_v29 = vld [vmem:[#allocation63_spill] sm:$0xff]  ;;  %v8332_v34 = vld [vmem:[#allocation6_spill] sm:$0xff] }
  0xf0   :  { %698 = vmatpush.msrb.mxu1 %v3482_v14  ;;  %766 = vmatpush.msrb.mxu2 %v3835_v39  ;;  %v8320_v14 = vld [vmem:[#allocation2_spill] sm:$0xff]  ;;  %v8333_v39 = vld [vmem:[#allocation41_spill] sm:$0xff] }
  0xf1   :  { %786 = vmatpush.msra.mxu3 %v4072_v26  ;;  %933 = vmatpush.msrb.mxu0 %v3424_v3  ;;  %v8328_v3 = vld [vmem:[#allocation65_spill] sm:$0xff] }
  0xf2   :  { %699 = vmatpush.msrb.mxu1 %v3494_v16  ;;  %601 = vmatmul.f32.vlgmr.msra.gmra.mxu2 %v8308_v47  ;;  %v8323_v16 = vld [vmem:[#allocation3_spill] sm:$0xff]  ;;  %v8337_v26 = vld [vmem:[#allocation45_spill] sm:$0xff] }
  0xf3   :  { %581 = vmatmul.f32.vlgmr.msra.gmra.mxu1 %v8308_v47  ;;  %672 = vmatmul.f32.vlgmr.msrb.gmra.mxu3 %v4492_v40  ;;  %v8339_v47 = vld [vmem:[#allocation48_spill] sm:$0xff] }
  0xf4   :  { %700 = vmatpush.msrb.mxu1 %v3511_v19  ;;  %767 = vmatpush.msrb.mxu2 %v8318_v10  ;;  %v8326_v19 = vld [vmem:[#allocation4_spill] sm:$0xff] }
  0xf5   :  { %787 = vmatpush.msra.mxu3 %v8319_v12  ;;  %934 = vmatpush.msrb.mxu0 %v3432_v5  ;;  %v8331_v5 = vld [vmem:[#allocation68_spill] sm:$0xff]  ;;  %v8358_v12 = vld [vmem:[#allocation30_spill] sm:$0xff] }
  0xf6   :  { %701 = vmatpush.msrb.mxu1 %v8320_v14  ;;  %768 = vmatpush.msrb.mxu2 %v8321_v21  ;;  %v8357_v10 = vld [vmem:[#allocation64_spill] sm:$0xff]  ;;  %v8359_v14 = vld [vmem:[#allocation67_spill] sm:$0xff] }
  0xf7   :  { %788 = vmatpush.msra.mxu3 %v8322_v1  ;;  %935 = vmatpush.msrb.mxu0 %v3441_v7  ;;  %v8334_v7 = vld [vmem:[#allocation7_spill] sm:$0xff]  ;;  %v8360_v21 = vld [vmem:[#allocation32_spill] sm:$0xff] }
  0xf8   :  { %702 = vmatpush.msrb.mxu1 %v8323_v16  ;;  %769 = vmatpush.msrb.mxu2 %v8324_v23  ;;  %v8362_v16 = vld [vmem:[#allocation34_spill] sm:$0xff]  ;;  %v8363_v23 = vld [vmem:[#allocation89_spill] sm:$0xff] }
  0xf9   :  { %789 = vmatpush.msra.mxu3 %v8325_v29  ;;  %936 = vmatpush.msrb.mxu0 %v3452_v9  ;;  %v8336_v9 = vld [vmem:[#allocation8_spill] sm:$0xff] }
  0xfa   :  { %703 = vmatpush.msrb.mxu1 %v8326_v19  ;;  %770 = vmatpush.msrb.mxu2 %v8327_v36  ;;  %v8365_v19 = vld [vmem:[#allocation37_spill] sm:$0xff]  ;;  %v8366_v36 = vld [vmem:[#allocation90_spill] sm:$0xff] }
  0xfb   :  { %790 = vmatpush.msra.mxu3 %v8328_v3  ;;  %937 = vmatpush.msrb.mxu0 %v3465_v11  ;;  %v8338_v11 = vld [vmem:[#allocation9_spill] sm:$0xff] }
  0xfc   :  { %704 = vmatpush.msrb.mxu1 %v8329_v45  ;;  %771 = vmatpush.msrb.mxu2 %v8330_v25  ;;  %v8367_v45 = vld [vmem:[#allocation71_spill] sm:$0xff] }
  0xfd   :  { %791 = vmatpush.msra.mxu3 %v8331_v5  ;;  %938 = vmatpush.msrb.mxu0 %v3477_v13  ;;  %v8340_v13 = vld [vmem:[#allocation74_spill] sm:$0xff]  ;;  %v8369_v25 = vld [vmem:[#allocation91_spill] sm:$0xff] }
  0xfe   :  { %705 = vmatpush.msrb.mxu1 %v8332_v34  ;;  %772 = vmatpush.msrb.mxu2 %v8333_v39  ;;  %v8370_v34 = vld [vmem:[#allocation73_spill] sm:$0xff]  ;;  %v8371_v39 = vld [vmem:[#allocation42_spill] sm:$0xff] }
  0xff   :  { %792 = vmatpush.msra.mxu3 %v4202_v38  ;;  %939 = vmatpush.msrb.mxu0 %v3489_v15  ;;  %v8343_v15 = vld [vmem:[#allocation76_spill] sm:$0xff] }
 0x100   :  { %706 = vmatpush.msrb.mxu1 %v8334_v7  ;;  %773 = vmatpush.msrb.mxu2 %v8335_v49  ;;  %v8373_v7 = vld [vmem:[#allocation44_spill] sm:$0xff]  ;;  %v8374_v49 = vld [vmem:[#allocation77_spill] sm:$0xff] }
 0x101   :  { %793 = vmatpush.msra.mxu3 %v4216_v63  ;;  %940 = vmatpush.msrb.mxu0 %v3506_v18  ;;  %v8346_v18 = vld [vmem:[#allocation78_spill] sm:$0xff] }
 0x102   :  { %707 = vmatpush.msrb.mxu1 %v8336_v9  ;;  %774 = vmatpush.msrb.mxu2 %v8337_v26  ;;  %v8375_v9 = vld [vmem:[#allocation46_spill] sm:$0xff]  ;;  %v158_v26 = vpop.f32.mrf.mxu1 }
 0x103   :  { %794 = vmatpush.msra.mxu3 %v4232_v52  ;;  %941 = vmatpush.msrb.mxu0 %v3520_v20  ;;  %v8349_v20 = vld [vmem:[#allocation81_spill] sm:$0xff] }
 0x104   :  { %708 = vmatpush.msrb.mxu1 %v8338_v11  ;;  %775 = vmatpush.msrb.mxu2 %v8339_v47  ;;  %v8376_v11 = vld [vmem:[#allocation80_spill] sm:$0xff]  ;;  %v8377_v47 = vld [vmem:[#allocation49_spill] sm:$0xff] }
 0x105   :  { %795 = vmatpush.msra.mxu3 %v8340_v13  ;;  %942 = vmatpush.msrb.mxu0 %v3532_v22  ;;  %v8352_v22 = vld [vmem:[#allocation60_spill] sm:$0xff] }
 0x106   :  { %709 = vmatpush.msrb.mxu1 %v8341_v56  ;;  %776 = vmatpush.msrb.mxu2 %v8342_v41  ;;  %v8378_v56 = vld [vmem:[#allocation83_spill] sm:$0xff] }
 0x107   :  { %796 = vmatpush.msra.mxu3 %v8343_v15  ;;  %943 = vmatpush.msrb.mxu0 %v3544_v24  ;;  %v8355_v24 = vld [vmem:[#allocation62_spill] sm:$0xff]  ;;  %v8379_v41 = vld [vmem:[#allocation51_spill] sm:$0xff] }
 0x108   :  { %710 = vmatpush.msrb.mxu1 %v8344_v4  ;;  %777 = vmatpush.msrb.mxu2 %v8345_v54  ;;  %v8380_v4 = vld [vmem:[#allocation85_spill] sm:$0xff] }
 0x109   :  { %797 = vmatpush.msra.mxu3 %v8346_v18  ;;  %944 = vmatpush.msrb.mxu0 %v3561_v27  ;;  %v8361_v27 = vld [vmem:[#allocation69_spill] sm:$0xff] }
 0x10a   :  { %711 = vmatpush.msrb.mxu1 %v8347_v48  ;;  %778 = vmatpush.msrb.mxu2 %v8348_v50  ;;  %v8381_v54 = vld [vmem:[#allocation53_spill] sm:$0xff]  ;;  %v4609_v48 = vpop.f32.mrf.mxu2  ;;  %v8382_v50 = vld [vmem:[#allocation86_spill] sm:$0xff] }
 0x10b   :  { %712 = vmatmul.f32.vlgmr.msrb.gmra.mxu1 %v4492_v40  ;;  %798 = vmatpush.msra.mxu3 %v8349_v20 }
 0x10c   :  { %824 = vmatpush.msra.mxu1 %v8350_v61  ;;  %779 = vmatpush.msrb.mxu2 %v8351_v59  ;;  %v8383_v61 = vld [vmem:[#allocation56_spill] sm:$0xff]  ;;  %v8384_v59 = vld [vmem:[#allocation87_spill] sm:$0xff] }
 0x10d   :  { %799 = vmatpush.msra.mxu3 %v8353_v17  ;;  %945 = vmatpush.msrb.mxu0 %v3570_v28  ;;  %v8364_v28 = vld [vmem:[#allocation70_spill] sm:$0xff] }
 0x10e   :  { %844 = vmatpush.msra.mxu2 %v8352_v22  ;;  %825 = vmatpush.msra.mxu1 %v8354_v62  ;;  %v8385_v22 = vld [vmem:[#allocation59_spill] sm:$0xff]  ;;  %v4617_v62 = vpop.f32.mrf.mxu1 }
 0x10f   :  { %864 = vmatpush.msrb.mxu3 %v4327_v46  ;;  %946 = vmatpush.msrb.mxu0 %v3581_v30  ;;  %v8368_v30 = vld [vmem:[#allocation40_spill] sm:$0xff]  ;;  %8386 = vst [vmem:[#allocation29_spill] sm:$0xff] %v4617_v62 }
 0x110   :  { %845 = vmatpush.msra.mxu2 %v8355_v24  ;;  %826 = vmatpush.msra.mxu1 %v8356_v42  ;;  %v4622_v24 = vld [vmem:[%s7878_s2 + $0x170] sm:$0xff] }
 0x111   :  { %865 = vmatpush.msrb.mxu3 %v4343_v60  ;;  %947 = vmatpush.msrb.mxu0 %v3596_v33  ;;  %v8372_v33 = vld [vmem:[#allocation75_spill] sm:$0xff]  ;;  %v8387_v42 = vld [vmem:[#allocation88_spill] sm:$0xff] }
 0x112   :  { %846 = vmatpush.msra.mxu2 %v8357_v10  ;;  %827 = vmatpush.msra.mxu1 %v8358_v12  ;;  %v4630_v10 = vld [vmem:[%s7878_s2 + $0x158] sm:$0xff]  ;;  %v4636_v12 = vld [vmem:[%s7878_s2 + $0x140] sm:$0xff] }
 0x113   :  { %866 = vmatpush.msrb.mxu3 %v4357_v57  ;;  %8388 = vst [vmem:[#allocation58_spill] sm:$0xff] %v4630_v10 }
 0x114   :  { %847 = vmatpush.msra.mxu2 %v8359_v14  ;;  %828 = vmatpush.msra.mxu1 %v8360_v21  ;;  %8389 = vst [vmem:[#allocation2_spill] sm:$0xff] %v4636_v12  ;;  %v4639_v14 = vpop.f32.mrf.mxu2  ;;  %v4644_v21 = vld [vmem:[%s7878_s2 + $0x128] sm:$0xff] }
 0x115   :  { %867 = vmatpush.msrb.mxu3 %v4371_v0  ;;  %8390 = vst [vmem:[#allocation31_spill] sm:$0xff] %v4639_v14 }
 0x116   :  { %848 = vmatpush.msra.mxu2 %v8361_v27  ;;  %829 = vmatpush.msra.mxu1 %v8362_v16  ;;  %8391 = vst [vmem:[#allocation61_spill] sm:$0xff] %v4644_v21  ;;  %v8392_v27 = vld [vmem:[#allocation11_spill] sm:$0xff]  ;;  %v4648_v16 = vpop.f32.mrf.mxu1 }
 0x117   :  { %868 = vmatpush.msrb.mxu3 %v8363_v23  ;;  %8393 = vst [vmem:[#allocation3_spill] sm:$0xff] %v4648_v16  ;;  %v8418_v16 = vld [vmem:[#allocation27_spill] sm:$0xff] }
 0x118   :  { %849 = vmatpush.msra.mxu2 %v8364_v28  ;;  %830 = vmatpush.msra.mxu1 %v8365_v19  ;;  %v8394_v28 = vld [vmem:[#allocation13_spill] sm:$0xff]  ;;  %v8395_v19 = vld [vmem:[#allocation15_spill] sm:$0xff] }
 0x119   :  { %869 = vmatpush.msrb.mxu3 %v8366_v36 }
 0x11a   :  { %850 = vmatpush.msra.mxu2 %v8367_v45  ;;  %831 = vmatpush.msra.mxu1 %v8368_v30  ;;  %v8396_v45 = vld [vmem:[#allocation16_spill] sm:$0xff] }
 0x11b   :  { %870 = vmatpush.msrb.mxu3 %v8369_v25 }
 0x11c   :  { %851 = vmatpush.msra.mxu2 %v8370_v34  ;;  %832 = vmatpush.msra.mxu1 %v8371_v39  ;;  %v4653_v30 = vpop.f32.mrf.mxu2  ;;  %v8398_v34 = vld [vmem:[#allocation17_spill] sm:$0xff]  ;;  %v8399_v39 = vld [vmem:[#allocation18_spill] sm:$0xff] }
 0x11d   :  { %871 = vmatpush.msrb.mxu3 %v4421_v8  ;;  %8397 = vst [vmem:[#allocation33_spill] sm:$0xff] %v4653_v30 }
 0x11e   :  { %852 = vmatpush.msra.mxu2 %v8372_v33  ;;  %833 = vmatpush.msra.mxu1 %v8373_v7  ;;  %v4657_v33 = vpop.f32.mrf.mxu1  ;;  %v8401_v7 = vld [vmem:[#allocation19_spill] sm:$0xff] }
 0x11f   :  { %872 = vmatpush.msrb.mxu3 %v4436_v32  ;;  %8400 = vst [vmem:[#allocation63_spill] sm:$0xff] %v4657_v33 }
 0x120   :  { %853 = vmatpush.msra.mxu2 %v8374_v49  ;;  %834 = vmatpush.msra.mxu1 %v8375_v9  ;;  %v8402_v49 = vld [vmem:[#allocation20_spill] sm:$0xff]  ;;  %v8403_v9 = vld [vmem:[#allocation21_spill] sm:$0xff] }
 0x121   :  { %873 = vmatpush.msrb.mxu3 %v4443_v2 }
 0x122   :  { %854 = vmatpush.msra.mxu2 %v8376_v11  ;;  %835 = vmatpush.msra.mxu1 %v8377_v47  ;;  %v8405_v47 = vld [vmem:[#allocation22_spill] sm:$0xff] }
 0x123   :  { %874 = vmatpush.msrb.mxu3 %v4451_v53 }
 0x124   :  { %855 = vmatpush.msra.mxu2 %v8378_v56  ;;  %836 = vmatpush.msra.mxu1 %v8379_v41  ;;  %v4662_v11 = vpop.f32.mrf.mxu2  ;;  %v8406_v56 = vld [vmem:[#allocation23_spill] sm:$0xff] }
 0x125   :  { %875 = vmatpush.msrb.mxu3 %v4458_v55  ;;  %8404 = vst [vmem:[#allocation4_spill] sm:$0xff] %v4662_v11 }
 0x126   :  { %856 = vmatpush.msra.mxu2 %v8380_v4  ;;  %837 = vmatpush.msra.mxu1 %v8381_v54  ;;  %v4666_v41 = vpop.f32.mrf.mxu1  ;;  %v8408_v4 = vld [vmem:[#allocation24_spill] sm:$0xff] }
 0x127   :  { %876 = vmatpush.msrb.mxu3 %v4465_v58  ;;  %8407 = vst [vmem:[#allocation36_spill] sm:$0xff] %v4666_v41 }
 0x128   :  { %857 = vmatpush.msra.mxu2 %v8382_v50  ;;  %838 = vmatpush.msra.mxu1 %v8383_v61 }
 0x129   :  { %877 = vmatpush.msrb.mxu3 %v4472_v31 }
 0x12a   :  { %858 = vmatpush.msra.mxu2 %v8384_v59  ;;  %839 = vmatpush.msra.mxu1 %v8385_v22 }
 0x12b   :  { %878 = vmatpush.msrb.mxu3 %v4479_v37 }
 0x12c   :  { %952 = vmatpush.msrb.mxu1 %v4622_v24  ;;  %859 = vmatpush.msra.mxu2 %v8387_v42  ;;  %v4669_v54 = vpop.f32.mrf.mxu2 }
 0x12d   :  { %879 = vmatpush.msrb.mxu3 %v4486_v43  ;;  %8409 = vst [vmem:[#allocation65_spill] sm:$0xff] %v4669_v54 }
 0x12e   :  { %953 = vmatpush.msrb.mxu1 %v4630_v10  ;;  %v4671_v50 = vpop.f32.mrf.mxu1 }
 0x12f   :  { %8410 = vst [vmem:[#allocation5_spill] sm:$0xff] %v4671_v50 }
 0x130   :  { %954 = vmatpush.msrb.mxu1 %v4636_v12 }
 0x132   :  { %955 = vmatpush.msrb.mxu1 %v4644_v21 }
 0x134   :  { %956 = vmatpush.msrb.mxu1 %v8392_v27  ;;  %v4673_v61 = vpop.f32.mrf.mxu2 }
 0x135   :  { %8411 = vst [vmem:[#allocation39_spill] sm:$0xff] %v4673_v61 }
 0x136   :  { %957 = vmatpush.msrb.mxu1 %v8394_v28  ;;  %v4675_v22 = vpop.f32.mrf.mxu1  ;;  %v317_v28 = vld [vmem:[%s7885_s7] sm:$0x7] }
 0x137   :  { %8412 = vst [vmem:[#allocation68_spill] sm:$0xff] %v4675_v22 }
 0x138   :  { %958 = vmatpush.msrb.mxu1 %v8395_v19 }
 0x13a   :  { %959 = vmatpush.msrb.mxu1 %v8396_v45  ;;  %v4682_v45 = vperm.slane %v317_v28, 0 }
 0x13c   :  { %960 = vmatpush.msrb.mxu1 %v8398_v34  ;;  %v4680_v19 = vpop.f32.mrf.mxu2  ;;  %8414 = vst [vmem:[#allocation41_spill] sm:$0xff] %v4682_v45 }
 0x13d   :  { %8413 = vst [vmem:[#allocation6_spill] sm:$0xff] %v4680_v19 }
 0x13e   :  { %961 = vmatpush.msrb.mxu1 %v8399_v39  ;;  %v8415_v39 = vld [vmem:[#allocation79_spill] sm:$0xff] }
 0x13f   :  { %v562_v27 = vpop.f32.mrf.mxu0 }
 0x140   :  { %962 = vmatpush.msrb.mxu1 %v8401_v7  ;;  %v159_v7 = vadd.f32 %v158_v26, %v8415_v39  ;;  %v8417_v26 = vld [vmem:[#allocation35_spill] sm:$0xff] }
 0x142   :  { %963 = vmatpush.msrb.mxu1 %v8402_v49 }
 0x144   :  { %964 = vmatpush.msrb.mxu1 %v8403_v9 }
 0x146   :  { %965 = vmatpush.msrb.mxu1 %v8405_v47 }
 0x148   :  { %966 = vmatpush.msrb.mxu1 %v8406_v56 }
 0x14a   :  { %967 = vmatpush.msrb.mxu1 %v8408_v4  ;;  %v4686_v4 = vperm.slane %v317_v28, 1 }
 0x14c   :  { %8416 = vst [vmem:[#allocation7_spill] sm:$0xff] %v4686_v4 }
 0x167   :  { %v502_v34 = vpop.f32.mrf.mxu1 }
 0x168   :  { %v503_v49 = vadd.f32 %v502_v34, %v4682_v45  ;;  %v693_v9 = vpop.f32.mrf.mxu0  ;;  %v118_v34 = vadd.f32 %v8418_v16, %v8417_v26  ;;  %v4697_v16 = vld [vmem:[%s7884_s8] ss:$0 sm:$0xff] }
 0x169   :  { %v736_v56 = vadd.f32 %v693_v9, %v159_v7  ;;  %8419 = vst [vmem:[#allocation43_spill] sm:$0xff] %v4697_v16 }
 0x16a   :  { %v605_v47 = vadd.f32 %v562_v27, %v503_v49 }
 0x16b   :  { %v2711_v50 = vmul.f32 -1.442695, %v736_v56 }
 0x16c   :  { %v2708_v22 = vmul.f32 -1.442695, %v605_v47 }
 0x16d   :  { %v522_v61 = vpop.f32.mrf.mxu2 }
 0x16e   :  { %2753 = vpow2.f32 %v2708_v22  ;;  %v523_v54 = vadd.f32 %v522_v61, %v4686_v4  ;;  %v542_v41 = vpop.f32.mrf.mxu3 }
 0x16f   :  { %2755 = vpow2.f32 %v2711_v50 }
 0x170   :  { %v582_v19 = vpop.f32.mrf.mxu1 }
 0x171   :  { %v625_v11 = vadd.f32 %v582_v19, %v523_v54 }
 0x173   :  { %v2709_v33 = vmul.f32 -1.442695, %v625_v11 }
 0x174   :  { %v2754_v30 = vpop.eup %2753 }
 0x175   :  { %v609_v14 = vadd.f32 1.0, %v2754_v30  ;;  %2757 = vpow2.f32 %v2709_v33  ;;  %v2756_v49 = vpop.eup %2755  ;;  %v602_v33 = vpop.f32.mrf.mxu2 }
 0x176   :  { %v673_v27 = vpop.f32.mrf.mxu3  ;;  %v4691_v47 = vadd.f32 1.0, %v2756_v49 }
 0x177   :  { %2759 = vrcp.f32 %v609_v14  ;;  %v716_v7 = vadd.f32 %v673_v27, %v118_v34  ;;  %v621_v50 = vand.u32 2147483648, %v609_v14  ;;  %v619_v34 = vand.u32 2147483647, %v609_v14 }
 0x178   :  { %v4699_v27 = vperm.slane %v317_v28, 2  ;;  %vm615_vm10 = vweird.f32 %v609_v14  ;;  %vm746_vm6 = vweird.f32 %v4691_v47 }
 0x179   :  { %v2710_v9 = vmul.f32 -1.442695, %v716_v7  ;;  %v622_v4 = vor.u32 1.1754944e-38, %v621_v50  ;;  %vm620_vm12 = vcmp.eq.f32.partialorder %v619_v34, 8.507059e+37 }
 0x17a   :  { %8420 = vst [vmem:[#allocation8_spill] sm:$0xff] %v4699_v27  ;;  %v543_v28 = vadd.f32 %v542_v41, %v4699_v27 }
 0x17b   :  { %v2758_v22 = vpop.eup %2757  ;;  %2761 = vpow2.f32 %v2710_v9  ;;  %v648_v9 = vadd.f32 %v4697_v16, %v602_v33 }
 0x17c   :  { %v629_v61 = vadd.f32 1.0, %v2758_v22 }
 0x17d   :  { %v2760_v56 = vpop.eup %2759 }
 0x17e   :  { %2763 = vrcp.f32 %v629_v61  ;;  %v611_v54 = vmul.f32 %v2760_v56, %v609_v14  ;;  %vm616_vm9 = vweird.f32 %v2760_v56  ;;  %v641_v21 = vand.u32 2147483648, %v629_v61 }
 0x17f   :  { %2765 = vrcp.f32 %v4691_v47  ;;  %vm617_vm11 = vmor %vm615_vm10, %vm616_vm9  ;;  %v639_v14 = vand.u32 2147483647, %v629_v61  ;;  %vm635_vm14 = vweird.f32 %v629_v61 }
 0x180   :  { %v612_v11 = vsub.f32 1.0, %v611_v54 }
 0x181   :  { %v2762_v30 = vpop.eup %2761  ;;  %vm640_vm0 = vcmp.eq.f32.partialorder %v639_v14, 8.507059e+37 }
 0x182   :  { %v720_v19 = vadd.f32 1.0, %v2762_v30  ;;  %v613_v26 = vmul.f32 %v2760_v56, %v612_v11 }
 0x184   :  { %v2764_v7 = vpop.eup %2763  ;;  %2767 = vrcp.f32 %v720_v19  ;;  %v614_v49 = vadd.f32 %v2760_v56, %v613_v26  ;;  %v730_v34 = vand.u32 2147483647, %v720_v19  ;;  %vm726_vm2 = vweird.f32 %v720_v19 }
 0x185   :  { %v4702_v22 = vpop.eup %2765  ;;  %v631_v54 = vmul.f32 %v2764_v7, %v629_v61  ;;  %vm636_vm13 = vweird.f32 %v2764_v7 }
 0x186   :  { %v618_v45 = vsel %vm617_vm11, %v2760_v56, %v614_v49  ;;  %v742_v11 = vmul.f32 %v4702_v22, %v4691_v47  ;;  %vm637_vm15 = vmor %vm635_vm14, %vm636_vm13  ;;  %v642_v56 = vor.u32 1.1754944e-38, %v641_v21  ;;  %v732_v49 = vand.u32 2147483648, %v720_v19 }
 0x187   :  { %v632_v62 = vsub.f32 1.0, %v631_v54  ;;  %v623_v30 = vsel %vm620_vm12, %v622_v4, %v618_v45  ;;  %vm731_vm4 = vcmp.eq.f32.partialorder %v730_v34, 8.507059e+37  ;;  %vm747_vm5 = vweird.f32 %v4702_v22 }
 0x188   :  { %v649_v39 = vmul.f32 %v648_v9, %v623_v30  ;;  %v743_v50 = vsub.f32 1.0, %v742_v11  ;;  %v713_v54 = vpop.f32.mrf.mxu1  ;;  %vm748_vm7 = vmor %vm746_vm6, %vm747_vm5 }
 0x189   :  { %v633_v26 = vmul.f32 %v2764_v7, %v632_v62 }
 0x18a   :  { %v2768_v33 = vpop.eup %2767  ;;  %v650_v16 = vadd.f32 %v649_v39, %v543_v28  ;;  %v744_v62 = vmul.f32 %v4702_v22, %v743_v50 }
 0x18b   :  { %v722_v12 = vmul.f32 %v2768_v33, %v720_v19  ;;  %v634_v10 = vadd.f32 %v2764_v7, %v633_v26  ;;  %vm727_vm1 = vweird.f32 %v2768_v33  ;;  %v200_v26 = vadd.f32 %v4609_v48, %v4429_v44 }
 0x18c   :  { %2769 = vtanh.f32 %v650_v16  ;;  %vm728_vm3 = vmor %vm726_vm2, %vm727_vm1  ;;  %v733_v16 = vor.u32 1.1754944e-38, %v732_v49  ;;  %v752_v19 = vand.u32 2147483648, %v4691_v47  ;;  %v4741_v49 = vld [vmem:[%s7881_s5 + $0x130] sm:$0xff] }
 0x18d   :  { %v723_v45 = vsub.f32 1.0, %v722_v12  ;;  %v638_v4 = vsel %vm637_vm15, %v2764_v7, %v634_v10  ;;  %v756_v12 = vadd.f32 %v4399_v6, %v713_v54  ;;  %v745_v7 = vadd.f32 %v4702_v22, %v744_v62  ;;  %v4748_v54 = vld [vmem:[%s7881_s5 + $0x118] sm:$0xff] }
 0x18e   :  { %v643_v41 = vsel %vm640_vm0, %v642_v56, %v638_v4  ;;  %v753_v48 = vor.u32 1.1754944e-38, %v752_v19  ;;  %v4826_v19 = vld [vmem:[%s7881_s5 + $0x140] sm:$0xff] }
 0x18f   :  { %v724_v9 = vmul.f32 %v2768_v33, %v723_v45  ;;  %v652_v39 = vsub.f32 1.0, %v643_v41  ;;  %v654_v21 = vmul.f32 0.0, %v643_v41  ;;  %v749_v56 = vsel %vm748_vm7, %v4702_v22, %v745_v7  ;;  %v4723_v45 = vld [vmem:[%s7881_s5 + $0x178] sm:$0xff]  ;;  %v4735_v22 = vld [vmem:[%s7881_s5 + $0x148] sm:$0xff]  ;;  %v4808_v7 = vld [vmem:[%s7881_s5 + $0xd0] sm:$0xff] }
 0x190   :  { %8421 = vst [vmem:[#allocation45_spill] sm:$0xff] %v4808_v7 }
 0x191   :  { %v725_v30 = vadd.f32 %v2768_v33, %v724_v9 }
 0x192   :  { %v2770_v61 = vpop.eup %2769 }
 0x193   :  { %v729_v11 = vsel %vm728_vm3, %v2768_v33, %v725_v30  ;;  %v653_v10 = vmul.f32 %v2770_v61, %v652_v39  ;;  %v750_v33 = vand.u32 2147483647, %v4691_v47  ;;  %v4729_v47 = vld [vmem:[%s7881_s5 + $0x160] sm:$0xff]  ;;  %v4772_v61 = vld [vmem:[%s7881_s5 + $0x168] sm:$0xff] }
 0x194   :  { %v734_v28 = vsel %vm731_vm4, %v733_v16, %v729_v11  ;;  %v4756_v39 = vld [vmem:[%s7881_s5 + $0x100] sm:$0xff]  ;;  %v4778_v16 = vld [vmem:[%s7881_s5 + $0x170] sm:$0xff]  ;;  %v4784_v11 = vld [vmem:[%s7881_s5 + $0xe8] sm:$0xff] }
 0x195   :  { %v757_v14 = vmul.f32 %v756_v12, %v734_v28  ;;  %v4714_v50 = vadd.f32 %v654_v21, %v653_v10  ;;  %vm751_vm8 = vcmp.eq.f32.partialorder %v750_v33, 8.507059e+37  ;;  %v4790_v12 = vld [vmem:[%s7878_s2 + $0x160] sm:$0xff]  ;;  %v4796_v10 = vld [vmem:[%s7881_s5 + $0x150] sm:$0xff]  ;;  %v4802_v21 = vld [vmem:[%s7881_s5 + $0x158] sm:$0xff] }
 0x196   :  { %v754_v4 = vsel %vm751_vm8, %v753_v48, %v749_v56  ;;  %v4814_v28 = vld [vmem:[%s7878_s2 + $0x148] sm:$0xff]  ;;  %v4838_v33 = vld [vmem:[%s7878_s2 + $0x130] sm:$0xff]  ;;  %v4853_v56 = vld [vmem:[%s7881_s5 + $0x120] sm:$0xff] }
 0x197   :  { %v758_v6 = vadd.f32 %v757_v14, %v200_v26  ;;  %840 = vmatmul.f32.vlgmr.msra.gmra.mxu1 %v4714_v50  ;;  %v760_v34 = vsub.f32 1.0, %v754_v4  ;;  %v762_v62 = vmul.f32 %v754_v4, %v4492_v40  ;;  %v4766_v40 = vld [vmem:[%s7878_s2 + $0x178] sm:$0xff]  ;;  %v4859_v48 = vld [vmem:[%s7881_s5 + $0x128] sm:$0xff]  ;;  %v4865_v4 = vld [vmem:[%s7881_s5 + $0xa0] sm:$0xff] }
 0x198   :  { %1080 = vmatpush.msra.mxu1 %v4723_v45  ;;  %v4820_v26 = vld [vmem:[%s7881_s5 + $0x138] sm:$0xff]  ;;  %8423 = vst [vmem:[#allocation48_spill] sm:$0xff] %v4865_v4 }
 0x199   :  { %2771 = vtanh.f32 %v758_v6  ;;  %v4832_v14 = vld [vmem:[%s7881_s5 + $0xb8] sm:$0xff] }
 0x19a   :  { %1081 = vmatpush.msra.mxu1 %v4729_v47  ;;  %8422 = vst [vmem:[#allocation9_spill] sm:$0xff] %v4832_v14  ;;  %v4847_v6 = vld [vmem:[%s7878_s2 + $0x118] sm:$0xff] }
 0x19c   :  { %1082 = vmatpush.msra.mxu1 %v4735_v22 }
 0x19e   :  { %1083 = vmatpush.msra.mxu1 %v4741_v49 }
 0x19f   :  { %v2772_v41 = vpop.eup %2771 }
 0x1a0   :  { %v761_v9 = vmul.f32 %v2772_v41, %v760_v34  ;;  %1084 = vmatpush.msra.mxu1 %v4748_v54  ;;  %v4871_v34 = vld [vmem:[%s7878_s2 + $0x100] sm:$0xff]  ;;  %v4877_v41 = vld [vmem:[%s7881_s5 + $0x108] sm:$0xff] }
 0x1a2   :  { %v4751_v30 = vadd.f32 %v762_v62, %v761_v9  ;;  %1085 = vmatpush.msra.mxu1 %v4756_v39  ;;  %v4884_v9 = vld [vmem:[%s7881_s5 + $0x88] sm:$0xff] }
 0x1a3   :  { %8424 = vst [vmem:[#allocation74_spill] sm:$0xff] %v4884_v9  ;;  %v4890_v62 = vld [vmem:[%s7878_s2 + $0xe8] sm:$0xff] }
 0x1a4   :  { %780 = vmatmul.f32.vlgmr.msrb.gmra.mxu2 %v4751_v30  ;;  %800 = vmatmul.f32.vlgmr.msra.gmra.mxu3 %v4751_v30 }
 0x1a5   :  { %820 = vmatmul.f32.vlgmr.msra.gmra.mxu0 %v4751_v30  ;;  %968 = vmatmul.f32.vlgmr.msrb.gmra.mxu1 %v4751_v30 }
 0x1a6   :  { %972 = vmatpush.msrb.mxu2 %v4766_v40  ;;  %1040 = vmatpush.msra.mxu3 %v4772_v61 }
 0x1a7   :  { %1060 = vmatpush.msra.mxu0 %v4778_v16  ;;  %1086 = vmatpush.msra.mxu1 %v4784_v11 }
 0x1a8   :  { %973 = vmatpush.msrb.mxu2 %v4790_v12  ;;  %1041 = vmatpush.msra.mxu3 %v4796_v10 }
 0x1a9   :  { %1061 = vmatpush.msra.mxu0 %v4802_v21  ;;  %1087 = vmatpush.msra.mxu1 %v4808_v7  ;;  %v4934_v7 = vld [vmem:[%s7881_s5 + $0xc0] sm:$0xff] }
 0x1aa   :  { %974 = vmatpush.msrb.mxu2 %v4814_v28  ;;  %1042 = vmatpush.msra.mxu3 %v4820_v26  ;;  %8427 = vst [vmem:[#allocation76_spill] sm:$0xff] %v4934_v7 }
 0x1ab   :  { %1062 = vmatpush.msra.mxu0 %v4826_v19  ;;  %1088 = vmatpush.msra.mxu1 %v4832_v14  ;;  %v4915_v14 = vld [vmem:[%s7881_s5 + $0xd8] sm:$0xff] }
 0x1ac   :  { %975 = vmatpush.msrb.mxu2 %v4838_v33  ;;  %880 = vmatmul.f32.vlgmr.msrb.gmra.mxu3 %v4714_v50 }
 0x1ad   :  { %860 = vmatmul.f32.vlgmr.msra.gmra.mxu2 %v4714_v50  ;;  %948 = vmatmul.f32.vlgmr.msrb.gmra.mxu0 %v4751_v30 }
 0x1ae   :  { %976 = vmatpush.msrb.mxu2 %v4847_v6  ;;  %1043 = vmatpush.msra.mxu3 %v4853_v56 }
 0x1af   :  { %1063 = vmatpush.msra.mxu0 %v4859_v48  ;;  %1089 = vmatpush.msra.mxu1 %v4865_v4  ;;  %v4896_v4 = vld [vmem:[%s7881_s5 + $0xf0] sm:$0xff] }
 0x1b0   :  { %977 = vmatpush.msrb.mxu2 %v4871_v34  ;;  %1044 = vmatpush.msra.mxu3 %v4877_v41 }
 0x1b1   :  { %1064 = vmatpush.msra.mxu0 %v8322_v1  ;;  %1090 = vmatpush.msra.mxu1 %v4884_v9  ;;  %v4903_v1 = vld [vmem:[%s7881_s5 + $0x70] sm:$0xff] }
 0x1b2   :  { %978 = vmatpush.msrb.mxu2 %v4890_v62  ;;  %1045 = vmatpush.msra.mxu3 %v4896_v4  ;;  %8425 = vst [vmem:[#allocation10_spill] sm:$0xff] %v4903_v1  ;;  %v4909_v9 = vld [vmem:[%s7878_s2 + $0xd0] sm:$0xff] }
 0x1b3   :  { %1065 = vmatpush.msra.mxu0 %v8325_v29  ;;  %1091 = vmatpush.msra.mxu1 %v4903_v1  ;;  %v4922_v29 = vld [vmem:[%s7881_s5 + $0x58] sm:$0xff] }
 0x1b4   :  { %979 = vmatpush.msrb.mxu2 %v4909_v9  ;;  %1046 = vmatpush.msra.mxu3 %v4915_v14  ;;  %8426 = vst [vmem:[#allocation50_spill] sm:$0xff] %v4922_v29  ;;  %v4928_v1 = vld [vmem:[%s7878_s2 + $0xb8] sm:$0xff] }
 0x1b5   :  { %1066 = vmatpush.msra.mxu0 %v8328_v3  ;;  %1092 = vmatpush.msra.mxu1 %v4922_v29  ;;  %v4941_v3 = vld [vmem:[%s7881_s5 + $0x40] sm:$0xff] }
 0x1b6   :  { %980 = vmatpush.msrb.mxu2 %v4928_v1  ;;  %1047 = vmatpush.msra.mxu3 %v4934_v7  ;;  %8428 = vst [vmem:[#allocation12_spill] sm:$0xff] %v4941_v3  ;;  %v4947_v29 = vld [vmem:[%s7878_s2 + $0xa0] sm:$0xff]  ;;  %v4953_v7 = vld [vmem:[%s7881_s5 + $0xa8] sm:$0xff] }
 0x1b7   :  { %1067 = vmatpush.msra.mxu0 %v8331_v5  ;;  %1093 = vmatpush.msra.mxu1 %v4941_v3  ;;  %v4961_v5 = vld [vmem:[%s7878_s2 + $0x88] sm:$0xff]  ;;  %v4967_v3 = vld [vmem:[%s7881_s5 + $0x90] sm:$0xff] }
 0x1b8   :  { %981 = vmatpush.msrb.mxu2 %v4947_v29  ;;  %1048 = vmatpush.msra.mxu3 %v4953_v7 }
 0x1b9   :  { %1068 = vmatpush.msra.mxu0 %v4202_v38  ;;  %1094 = vmatpush.msra.mxu1 %v4166_v35  ;;  %v4975_v35 = vld [vmem:[%s7878_s2 + $0x70] sm:$0xff]  ;;  %v4981_v38 = vld [vmem:[%s7881_s5 + $0x78] sm:$0xff] }
 0x1ba   :  { %982 = vmatpush.msrb.mxu2 %v4961_v5  ;;  %1049 = vmatpush.msra.mxu3 %v4967_v3  ;;  %8429 = vst [vmem:[#allocation52_spill] sm:$0xff] %v4975_v35 }
 0x1bb   :  { %1069 = vmatpush.msra.mxu0 %v4216_v63  ;;  %1095 = vmatpush.msra.mxu1 %v4188_v51  ;;  %8430 = vst [vmem:[#allocation78_spill] sm:$0xff] %v4981_v38  ;;  %v4988_v63 = vld [vmem:[%s7878_s2 + $0x168] sm:$0xff]  ;;  %v4994_v51 = vld [vmem:[%s7878_s2 + $0x58] sm:$0xff] }
 0x1bc   :  { %983 = vmatpush.msrb.mxu2 %v4975_v35  ;;  %1050 = vmatpush.msra.mxu3 %v4981_v38  ;;  %8431 = vst [vmem:[#allocation14_spill] sm:$0xff] %v4988_v63  ;;  %v5000_v38 = vld [vmem:[%s7881_s5 + $0x60] sm:$0xff] }
 0x1bd   :  { %1070 = vmatpush.msra.mxu0 %v4232_v52  ;;  %1208 = vmatpush.msrb.mxu1 %v4988_v63  ;;  %8432 = vst [vmem:[#allocation54_spill] sm:$0xff] %v4994_v51  ;;  %v5007_v52 = vld [vmem:[%s7878_s2 + $0x150] sm:$0xff]  ;;  %v5013_v63 = vld [vmem:[%s7878_s2 + $0x40] sm:$0xff] }
 0x1be   :  { %984 = vmatpush.msrb.mxu2 %v4994_v51  ;;  %8433 = vst [vmem:[#allocation81_spill] sm:$0xff] %v5000_v38  ;;  %1051 = vmatpush.msra.mxu3 %v5000_v38  ;;  %v5019_v38 = vld [vmem:[%s7881_s5 + $0x48] sm:$0xff] }
 0x1bf   :  { %1071 = vmatpush.msra.mxu0 %v8340_v13  ;;  %8434 = vst [vmem:[#allocation25_spill] sm:$0xff] %v5007_v52  ;;  %1209 = vmatpush.msrb.mxu1 %v5007_v52  ;;  %v5026_v13 = vld [vmem:[%s7878_s2 + $0x138] sm:$0xff]  ;;  %v5032_v52 = vld [vmem:[%s7878_s2 + $0x28] sm:$0xff] }
 0x1c0   :  { %8435 = vst [vmem:[#allocation57_spill] sm:$0xff] %v5013_v63  ;;  %985 = vmatpush.msrb.mxu2 %v5013_v63  ;;  %1052 = vmatpush.msra.mxu3 %v5019_v38 }
 0x1c1   :  { %8436 = vst [vmem:[#allocation60_spill] sm:$0xff] %v5019_v38  ;;  %1072 = vmatpush.msra.mxu0 %v8343_v15  ;;  %1210 = vmatpush.msrb.mxu1 %v5026_v13  ;;  %v5038_v38 = vld [vmem:[%s7881_s5 + $0x30] sm:$0xff]  ;;  %v5045_v15 = vld [vmem:[%s7878_s2 + $0x120] sm:$0xff] }
 0x1c2   :  { %8437 = vst [vmem:[#allocation84_spill] sm:$0xff] %v5026_v13  ;;  %986 = vmatpush.msrb.mxu2 %v5032_v52  ;;  %1053 = vmatpush.msra.mxu3 %v5038_v38  ;;  %v5051_v13 = vld [vmem:[%s7878_s2 + $0x10] sm:$0xff] }
 0x1c3   :  { %8438 = vst [vmem:[#allocation26_spill] sm:$0xff] %v5032_v52  ;;  %1073 = vmatpush.msra.mxu0 %v8346_v18  ;;  %1211 = vmatpush.msrb.mxu1 %v5045_v15  ;;  %v5065_v18 = vld [vmem:[%s7882_s6 + $0x168] sm:$0xff] }
 0x1c4   :  { %8439 = vst [vmem:[#allocation62_spill] sm:$0xff] %v5038_v38  ;;  %987 = vmatpush.msrb.mxu2 %v5051_v13  ;;  %v5057_v38 = vld [vmem:[%s7881_s5 + $0x18] sm:$0xff] }
 0x1c5   :  { %8440 = vst [vmem:[#allocation28_spill] sm:$0xff] %v5045_v15  ;;  %1054 = vmatpush.msra.mxu3 %v5057_v38  ;;  %988 = vmatmul.f32.vlgmr.msrb.gmra.mxu2 %v4751_v30  ;;  %v5071_v15 = vld [vmem:[%s7881_s5] sm:$0xff] }
 0x1c6   :  { %8441 = vst [vmem:[#allocation64_spill] sm:$0xff] %v5051_v13  ;;  %1074 = vmatpush.msra.mxu0 %v8349_v20  ;;  %1100 = vmatpush.msra.mxu2 %v5065_v18  ;;  %v5084_v20 = vld [vmem:[%s7882_s6 + $0x150] sm:$0xff] }
 0x1c7   :  { %8442 = vst [vmem:[#allocation30_spill] sm:$0xff] %v5057_v38  ;;  %1055 = vmatpush.msra.mxu3 %v5071_v15  ;;  %v5077_v38 = vld [vmem:[%s7882_s6 + $0x170] sm:$0xff] }
 0x1c8   :  { %8443 = vst [vmem:[#allocation67_spill] sm:$0xff] %v5065_v18  ;;  %1075 = vmatpush.msra.mxu0 %v8353_v17  ;;  %1101 = vmatpush.msra.mxu2 %v5084_v20  ;;  %v5097_v17 = vld [vmem:[%s7878_s2 + $0x108] sm:$0xff] }
 0x1c9   :  { %8444 = vst [vmem:[#allocation32_spill] sm:$0xff] %v5071_v15  ;;  %1120 = vmatpush.msrb.mxu3 %v5077_v38  ;;  %v5091_v15 = vld [vmem:[%s7882_s6 + $0x158] sm:$0xff]  ;;  %1212 = vmatpush.msrb.mxu1 %v5097_v17  ;;  %v8506_v18 = vld [vmem:[#allocation43_spill] sm:$0xff] }
 0x1ca   :  { %8445 = vst [vmem:[#allocation69_spill] sm:$0xff] %v5077_v38  ;;  %1140 = vmatpush.msrb.mxu0 %v4327_v46  ;;  %v5103_v38 = vld [vmem:[%s7882_s6 + $0x138] sm:$0xff]  ;;  %v5110_v46 = vld [vmem:[%s7882_s6 + $0x140] sm:$0xff] }
 0x1cb   :  { %8446 = vst [vmem:[#allocation34_spill] sm:$0xff] %v5084_v20  ;;  %1121 = vmatpush.msrb.mxu3 %v5091_v15  ;;  %1102 = vmatpush.msra.mxu2 %v5103_v38 }
 0x1cc   :  { %8447 = vst [vmem:[#allocation89_spill] sm:$0xff] %v5091_v15  ;;  %1141 = vmatpush.msrb.mxu0 %v4343_v60  ;;  %v5122_v15 = vld [vmem:[%s7882_s6 + $0x120] sm:$0xff]  ;;  %v5129_v60 = vld [vmem:[%s7882_s6 + $0x128] sm:$0xff] }
 0x1cd   :  { %8448 = vst [vmem:[#allocation70_spill] sm:$0xff] %v5097_v17  ;;  %1122 = vmatpush.msrb.mxu3 %v5110_v46  ;;  %v5116_v17 = vld [vmem:[%s7878_s2 + $0xf0] sm:$0xff]  ;;  %1103 = vmatpush.msra.mxu2 %v5122_v15 }
 0x1ce   :  { %8449 = vst [vmem:[#allocation37_spill] sm:$0xff] %v5103_v38  ;;  %1213 = vmatpush.msrb.mxu1 %v5116_v17  ;;  %1142 = vmatpush.msrb.mxu0 %v4357_v57  ;;  %v5148_v57 = vld [vmem:[%s7882_s6 + $0x110] sm:$0xff] }
 0x1cf   :  { %8450 = vst [vmem:[#allocation90_spill] sm:$0xff] %v5110_v46  ;;  %1123 = vmatpush.msrb.mxu3 %v5129_v60  ;;  %v5141_v46 = vld [vmem:[%s7882_s6 + $0x108] sm:$0xff] }
 0x1d0   :  { %8451 = vst [vmem:[#allocation71_spill] sm:$0xff] %v5116_v17  ;;  %v5135_v17 = vld [vmem:[%s7878_s2 + $0xd8] sm:$0xff]  ;;  %1104 = vmatpush.msra.mxu2 %v5141_v46  ;;  %1143 = vmatpush.msrb.mxu0 %v4371_v0 }
 0x1d1   :  { %8452 = vst [vmem:[#allocation40_spill] sm:$0xff] %v5122_v15  ;;  %1214 = vmatpush.msrb.mxu1 %v5135_v17  ;;  %1124 = vmatpush.msrb.mxu3 %v5148_v57  ;;  %v5167_v0 = vld [vmem:[%s7882_s6 + $0xf8] sm:$0xff] }
 0x1d2   :  { %8453 = vst [vmem:[#allocation91_spill] sm:$0xff] %v5129_v60  ;;  %v5160_v60 = vld [vmem:[%s7882_s6 + $0xf0] sm:$0xff]  ;;  %1144 = vmatpush.msrb.mxu0 %v8363_v23  ;;  %v5186_v23 = vld [vmem:[%s7882_s6 + $0xe0] sm:$0xff] }
 0x1d3   :  { %8454 = vst [vmem:[#allocation73_spill] sm:$0xff] %v5135_v17  ;;  %v5154_v17 = vld [vmem:[%s7878_s2 + $0xc0] sm:$0xff]  ;;  %1105 = vmatpush.msra.mxu2 %v5160_v60  ;;  %1125 = vmatpush.msrb.mxu3 %v5167_v0 }
 0x1d4   :  { %8455 = vst [vmem:[#allocation42_spill] sm:$0xff] %v5141_v46  ;;  %1215 = vmatpush.msrb.mxu1 %v5154_v17  ;;  %1145 = vmatpush.msrb.mxu0 %v8366_v36  ;;  %v5205_v36 = vld [vmem:[%s7882_s6 + $0xc8] sm:$0xff] }
 0x1d5   :  { %8456 = vst [vmem:[#allocation75_spill] sm:$0xff] %v5148_v57  ;;  %v5179_v57 = vld [vmem:[%s7882_s6 + $0xd8] sm:$0xff]  ;;  %1126 = vmatpush.msrb.mxu3 %v5186_v23  ;;  %v8505_v46 = vld [vmem:[#allocation7_spill] sm:$0xff] }
 0x1d6   :  { %8457 = vst [vmem:[#allocation44_spill] sm:$0xff] %v5154_v17  ;;  %v5173_v17 = vld [vmem:[%s7878_s2 + $0xa8] sm:$0xff]  ;;  %1106 = vmatpush.msra.mxu2 %v5179_v57  ;;  %1146 = vmatpush.msrb.mxu0 %v8369_v25  ;;  %v5224_v25 = vld [vmem:[%s7882_s6 + $0xb0] sm:$0xff] }
 0x1d7   :  { %8458 = vst [vmem:[#allocation77_spill] sm:$0xff] %v5160_v60  ;;  %1216 = vmatpush.msrb.mxu1 %v5173_v17  ;;  %1127 = vmatpush.msrb.mxu3 %v5205_v36 }
 0x1d8   :  { %8459 = vst [vmem:[#allocation46_spill] sm:$0xff] %v5167_v0  ;;  %v5198_v0 = vld [vmem:[%s7882_s6 + $0xc0] sm:$0xff]  ;;  %1147 = vmatpush.msrb.mxu0 %v4421_v8  ;;  %v5243_v8 = vld [vmem:[%s7882_s6 + $0x98] sm:$0xff] }
 0x1d9   :  { %8460 = vst [vmem:[#allocation80_spill] sm:$0xff] %v5173_v17  ;;  %v5192_v17 = vld [vmem:[%s7878_s2 + $0x90] sm:$0xff]  ;;  %1107 = vmatpush.msra.mxu2 %v5198_v0  ;;  %1128 = vmatpush.msrb.mxu3 %v5224_v25 }
 0x1da   :  { %8461 = vst [vmem:[#allocation49_spill] sm:$0xff] %v5179_v57  ;;  %1217 = vmatpush.msrb.mxu1 %v5192_v17  ;;  %1148 = vmatpush.msrb.mxu0 %v4436_v32  ;;  %v5262_v32 = vld [vmem:[%s7882_s6 + $0x80] sm:$0xff] }
 0x1db   :  { %8462 = vst [vmem:[#allocation83_spill] sm:$0xff] %v5186_v23  ;;  %v5217_v23 = vld [vmem:[%s7882_s6 + $0xa8] sm:$0xff]  ;;  %1129 = vmatpush.msrb.mxu3 %v5243_v8 }
 0x1dc   :  { %8463 = vst [vmem:[#allocation51_spill] sm:$0xff] %v5192_v17  ;;  %v5211_v17 = vld [vmem:[%s7878_s2 + $0x78] sm:$0xff]  ;;  %1108 = vmatpush.msra.mxu2 %v5217_v23  ;;  %1149 = vmatpush.msrb.mxu0 %v4443_v2  ;;  %v5281_v2 = vld [vmem:[%s7882_s6 + $0x68] sm:$0xff] }
 0x1dd   :  { %8464 = vst [vmem:[#allocation85_spill] sm:$0xff] %v5198_v0  ;;  %1218 = vmatpush.msrb.mxu1 %v5211_v17  ;;  %1130 = vmatpush.msrb.mxu3 %v5262_v32 }
 0x1de   :  { %8465 = vst [vmem:[#allocation53_spill] sm:$0xff] %v5205_v36  ;;  %v5236_v36 = vld [vmem:[%s7882_s6 + $0x90] sm:$0xff]  ;;  %1150 = vmatpush.msrb.mxu0 %v4451_v53 }
 0x1df   :  { %8466 = vst [vmem:[#allocation86_spill] sm:$0xff] %v5211_v17  ;;  %v5230_v17 = vld [vmem:[%s7878_s2 + $0x60] sm:$0xff]  ;;  %1109 = vmatpush.msra.mxu2 %v5236_v36  ;;  %1131 = vmatpush.msrb.mxu3 %v5281_v2  ;;  %v5300_v53 = vld [vmem:[%s7882_s6 + $0x50] sm:$0xff] }
 0x1e0   :  { %8467 = vst [vmem:[#allocation56_spill] sm:$0xff] %v5217_v23  ;;  %1219 = vmatpush.msrb.mxu1 %v5230_v17  ;;  %1151 = vmatpush.msrb.mxu0 %v4458_v55  ;;  %v5319_v55 = vld [vmem:[%s7882_s6 + $0x38] sm:$0xff] }
 0x1e1   :  { %8468 = vst [vmem:[#allocation87_spill] sm:$0xff] %v5224_v25  ;;  %v5255_v25 = vld [vmem:[%s7882_s6 + $0x78] sm:$0xff]  ;;  %1132 = vmatpush.msrb.mxu3 %v5300_v53 }
 0x1e2   :  { %8469 = vst [vmem:[#allocation59_spill] sm:$0xff] %v5230_v17  ;;  %v5249_v17 = vld [vmem:[%s7878_s2 + $0x48] sm:$0xff]  ;;  %1110 = vmatpush.msra.mxu2 %v5255_v25  ;;  %1152 = vmatpush.msrb.mxu0 %v4465_v58  ;;  %v5333_v58 = vld [vmem:[%s7882_s6] sm:$0xff] }
 0x1e3   :  { %8470 = vst [vmem:[#allocation88_spill] sm:$0xff] %v5236_v36  ;;  %1220 = vmatpush.msrb.mxu1 %v5249_v17  ;;  %1133 = vmatpush.msrb.mxu3 %v5319_v55  ;;  %v8504_v36 = vld [vmem:[#allocation38_spill] sm:$0xff] }
 0x1e4   :  { %8471 = vst [vmem:[#allocation11_spill] sm:$0xff] %v5243_v8  ;;  %v5274_v8 = vld [vmem:[%s7882_s6 + $0x60] sm:$0xff]  ;;  %1153 = vmatpush.msrb.mxu0 %v4472_v31 }
 0x1e5   :  { %8472 = vst [vmem:[#allocation13_spill] sm:$0xff] %v5249_v17  ;;  %v5268_v17 = vld [vmem:[%s7878_s2 + $0x30] sm:$0xff]  ;;  %1111 = vmatpush.msra.mxu2 %v5274_v8  ;;  %1134 = vmatpush.msrb.mxu3 %v8384_v59  ;;  %v8487_v31 = vld [vmem:[#allocation2_spill] sm:$0xff]  ;;  %v8488_v59 = vld [vmem:[#allocation61_spill] sm:$0xff] }
 0x1e6   :  { %8473 = vst [vmem:[#allocation15_spill] sm:$0xff] %v5255_v25  ;;  %1221 = vmatpush.msrb.mxu1 %v5268_v17  ;;  %1154 = vmatpush.msrb.mxu0 %v4479_v37  ;;  %v5352_v37 = vld [vmem:[%s7878_s2 + $0xf8] sm:$0xff] }
 0x1e7   :  { %8474 = vst [vmem:[#allocation16_spill] sm:$0xff] %v5262_v32  ;;  %v5293_v32 = vld [vmem:[%s7882_s6 + $0x48] sm:$0xff]  ;;  %1135 = vmatpush.msrb.mxu3 %v8387_v42  ;;  %v5370_v42 = vld [vmem:[%s7878_s2 + $0xb0] sm:$0xff] }
 0x1e8   :  { %8475 = vst [vmem:[#allocation17_spill] sm:$0xff] %v5268_v17  ;;  %v5287_v17 = vld [vmem:[%s7878_s2 + $0x18] sm:$0xff]  ;;  %1112 = vmatpush.msra.mxu2 %v5293_v32  ;;  %1155 = vmatpush.msrb.mxu0 %v4486_v43  ;;  %v5358_v43 = vld [vmem:[%s7878_s2 + $0xe0] sm:$0xff] }
 0x1e9   :  { %8476 = vst [vmem:[#allocation18_spill] sm:$0xff] %v5274_v8  ;;  %1222 = vmatpush.msrb.mxu1 %v5287_v17 }
 0x1ea   :  { %8477 = vst [vmem:[#allocation19_spill] sm:$0xff] %v5281_v2  ;;  %v5312_v2 = vld [vmem:[%s7882_s6 + $0x30] sm:$0xff] }
 0x1eb   :  { %8478 = vst [vmem:[#allocation20_spill] sm:$0xff] %v5287_v17  ;;  %v5306_v17 = vld [vmem:[%s7878_s2] sm:$0xff]  ;;  %1113 = vmatpush.msra.mxu2 %v5312_v2 }
 0x1ec   :  { %8479 = vst [vmem:[#allocation21_spill] sm:$0xff] %v5293_v32  ;;  %1223 = vmatpush.msrb.mxu1 %v5306_v17  ;;  %v8503_v32 = vld [vmem:[#allocation41_spill] sm:$0xff] }
 0x1ed   :  { %8480 = vst [vmem:[#allocation22_spill] sm:$0xff] %v5300_v53 }
 0x1ee   :  { %8481 = vst [vmem:[#allocation23_spill] sm:$0xff] %v5306_v17  ;;  %v5325_v17 = vld [vmem:[%s7882_s6 + $0x18] sm:$0xff] }
 0x1ef   :  { %8482 = vst [vmem:[#allocation24_spill] sm:$0xff] %v5312_v2  ;;  %1114 = vmatpush.msra.mxu2 %v5325_v17 }
 0x1f0   :  { %8483 = vst [vmem:[#allocation35_spill] sm:$0xff] %v5319_v55  ;;  %v8486_v55 = vld [vmem:[#allocation58_spill] sm:$0xff] }
 0x1f1   :  { %8484 = vst [vmem:[#allocation27_spill] sm:$0xff] %v5325_v17  ;;  %1115 = vmatpush.msra.mxu2 %v5333_v58  ;;  %v5346_v17 = vld [vmem:[%s7878_s2 + $0x110] sm:$0xff] }
 0x1f2   :  { %8485 = vst [vmem:[#allocation93_spill] sm:$0xff] %v5333_v58 }
 0x1f3   :  { %1228 = vmatpush.msrb.mxu2 %v4622_v24  ;;  %8489 = vst [vmem:[#allocation58_spill] sm:$0xff] %v5346_v17  ;;  %v5364_v24 = vld [vmem:[%s7878_s2 + $0xc8] sm:$0xff] }
 0x1f4   :  { %8490 = vst [vmem:[#allocation2_spill] sm:$0xff] %v5352_v37 }
 0x1f5   :  { %1229 = vmatpush.msrb.mxu2 %v8486_v55  ;;  %8491 = vst [vmem:[#allocation61_spill] sm:$0xff] %v5358_v43  ;;  %v5376_v55 = vld [vmem:[%s7878_s2 + $0x98] sm:$0xff] }
 0x1f6   :  { %8492 = vst [vmem:[#allocation94_spill] sm:$0xff] %v5364_v24 }
 0x1f7   :  { %1230 = vmatpush.msrb.mxu2 %v8487_v31  ;;  %8493 = vst [vmem:[#allocation95_spill] sm:$0xff] %v5370_v42  ;;  %v5382_v31 = vld [vmem:[%s7878_s2 + $0x80] sm:$0xff] }
 0x1f8   :  { %8494 = vst [vmem:[#allocation96_spill] sm:$0xff] %v5376_v55 }
 0x1f9   :  { %1231 = vmatpush.msrb.mxu2 %v8488_v59  ;;  %8495 = vst [vmem:[#allocation97_spill] sm:$0xff] %v5382_v31  ;;  %v5388_v59 = vld [vmem:[%s7878_s2 + $0x68] sm:$0xff] }
 0x1fa   :  { %8496 = vst [vmem:[#allocation98_spill] sm:$0xff] %v5388_v59 }
 0x1fb   :  { %1232 = vmatpush.msrb.mxu2 %v5346_v17 }
 0x1fd   :  { %1233 = vmatpush.msrb.mxu2 %v5352_v37 }
 0x1ff   :  { %1234 = vmatpush.msrb.mxu2 %v5358_v43  ;;  %v8502_v43 = vld [vmem:[#allocation29_spill] sm:$0xff] }
 0x201   :  { %1235 = vmatpush.msrb.mxu2 %v5364_v24  ;;  %v8501_v24 = vld [vmem:[#allocation79_spill] sm:$0xff] }
 0x202   :  { %v162_v37 = vadd.f32 %v8502_v43, %v8501_v24 }
 0x203   :  { %1236 = vmatpush.msrb.mxu2 %v5370_v42  ;;  %v5394_v42 = vld [vmem:[%s7878_s2 + $0x50] sm:$0xff] }
 0x204   :  { %8497 = vst [vmem:[#allocation99_spill] sm:$0xff] %v5394_v42 }
 0x205   :  { %1237 = vmatpush.msrb.mxu2 %v5376_v55  ;;  %v5400_v55 = vld [vmem:[%s7878_s2 + $0x38] sm:$0xff] }
 0x206   :  { %8498 = vst [vmem:[#allocation100_spill] sm:$0xff] %v5400_v55 }
 0x207   :  { %1238 = vmatpush.msrb.mxu2 %v5382_v31  ;;  %v5406_v31 = vld [vmem:[%s7878_s2 + $0x20] sm:$0xff] }
 0x208   :  { %8499 = vst [vmem:[#allocation101_spill] sm:$0xff] %v5406_v31 }
 0x209   :  { %1239 = vmatpush.msrb.mxu2 %v5388_v59  ;;  %v5412_v59 = vld [vmem:[%s7878_s2 + $0x8] sm:$0xff] }
 0x20a   :  { %8500 = vst [vmem:[#allocation102_spill] sm:$0xff] %v5412_v59 }
 0x20b   :  { %1240 = vmatpush.msrb.mxu2 %v5394_v42 }
 0x20d   :  { %1241 = vmatpush.msrb.mxu2 %v5400_v55 }
 0x20f   :  { %1242 = vmatpush.msrb.mxu2 %v5406_v31 }
 0x211   :  { %1243 = vmatpush.msrb.mxu2 %v5412_v59 }
 0x214   :  { %v841_v42 = vpop.f32.mrf.mxu1 }
 0x222   :  { %v5417_v17 = vpop.f32.mrf.mxu0  ;;  %v969_v55 = vpop.f32.mrf.mxu1 }
 0x223   :  { %v1012_v58 = vadd.f32 %v969_v55, %v162_v37 }
 0x225   :  { %v2715_v53 = vmul.f32 -1.442695, %v1012_v58 }
 0x227   :  { %2773 = vpow2.f32 %v2715_v53  ;;  %v781_v2 = vpop.f32.mrf.mxu2  ;;  %v801_v57 = vpop.f32.mrf.mxu3 }
 0x228   :  { %v782_v31 = vadd.f32 %v781_v2, %v8503_v32  ;;  %v802_v43 = vadd.f32 %v801_v57, %v8505_v46 }
 0x22a   :  { %v884_v8 = vadd.f32 %v841_v42, %v782_v31  ;;  %v949_v25 = vpop.f32.mrf.mxu0 }
 0x22b   :  { %v992_v23 = vadd.f32 %v949_v25, %v8504_v36 }
 0x22c   :  { %v2712_v0 = vmul.f32 -1.442695, %v884_v8 }
 0x22d   :  { %v2774_v59 = vpop.eup %2773  ;;  %v2714_v60 = vmul.f32 -1.442695, %v992_v23 }
 0x22e   :  { %2775 = vpow2.f32 %v2712_v0  ;;  %v5422_v24 = vadd.f32 1.0, %v2774_v59 }
 0x22f   :  { %2777 = vpow2.f32 %v2714_v60 }
 0x230   :  { %v861_v37 = vpop.f32.mrf.mxu2  ;;  %2779 = vrcp.f32 %v5422_v24  ;;  %vm1022_vm4 = vweird.f32 %v5422_v24 }
 0x231   :  { %v904_v58 = vadd.f32 %v861_v37, %v802_v43  ;;  %v881_v37 = vpop.f32.mrf.mxu3 }
 0x232   :  { %v924_v13 = vadd.f32 %v8506_v18, %v881_v37 }
 0x233   :  { %v2713_v53 = vmul.f32 -1.442695, %v904_v58 }
 0x234   :  { %v2776_v55 = vpop.eup %2775 }
 0x235   :  { %v2778_v2 = vpop.eup %2777  ;;  %v888_v42 = vadd.f32 1.0, %v2776_v55  ;;  %2781 = vpow2.f32 %v2713_v53 }
 0x236   :  { %v996_v36 = vadd.f32 1.0, %v2778_v2  ;;  %v5425_v25 = vpop.eup %2779 }
 0x237   :  { %2783 = vrcp.f32 %v888_v42  ;;  %v1018_v8 = vmul.f32 %v5425_v25, %v5422_v24  ;;  %v898_v58 = vand.u32 2147483647, %v888_v42  ;;  %v900_v53 = vand.u32 2147483648, %v888_v42 }
 0x238   :  { %2785 = vrcp.f32 %v996_v36  ;;  %v1008_v32 = vand.u32 2147483648, %v996_v36  ;;  %v1006_v15 = vand.u32 2147483647, %v996_v36  ;;  %vm894_vm11 = vweird.f32 %v888_v42 }
 0x239   :  { %v1019_v2 = vsub.f32 1.0, %v1018_v8  ;;  %vm1002_vm13 = vweird.f32 %v996_v36  ;;  %vm899_vm14 = vcmp.eq.f32.partialorder %v898_v58, 8.507059e+37  ;;  %vm1023_vm2 = vweird.f32 %v5425_v25 }
 0x23a   :  { %vm1007_vm0 = vcmp.eq.f32.partialorder %v1006_v15, 8.507059e+37  ;;  %vm1024_vm6 = vmor %vm1022_vm4, %vm1023_vm2 }
 0x23b   :  { %v2782_v0 = vpop.eup %2781 }
 0x23c   :  { %v5427_v23 = vadd.f32 1.0, %v2782_v0 }
 0x23d   :  { %v2784_v60 = vpop.eup %2783 }
 0x23e   :  { %v2786_v57 = vpop.eup %2785  ;;  %2787 = vrcp.f32 %v5427_v23  ;;  %v890_v31 = vmul.f32 %v2784_v60, %v888_v42  ;;  %vm895_vm9 = vweird.f32 %v2784_v60  ;;  %vm914_vm3 = vweird.f32 %v5427_v23 }
 0x23f   :  { %v998_v59 = vmul.f32 %v2786_v57, %v996_v36  ;;  %vm1003_vm10 = vweird.f32 %v2786_v57  ;;  %vm896_vm12 = vmor %vm894_vm11, %vm895_vm9 }
 0x240   :  { %v891_v43 = vsub.f32 1.0, %v890_v31  ;;  %v901_v31 = vor.u32 1.1754944e-38, %v900_v53  ;;  %vm1004_vm15 = vmor %vm1002_vm13, %vm1003_vm10  ;;  %v920_v53 = vand.u32 2147483648, %v5427_v23 }
 0x241   :  { %v999_v55 = vsub.f32 1.0, %v998_v59  ;;  %v1020_v59 = vmul.f32 %v5425_v25, %v1019_v2 }
 0x242   :  { %v892_v46 = vmul.f32 %v2784_v60, %v891_v43  ;;  %v1009_v43 = vor.u32 1.1754944e-38, %v1008_v32 }
 0x243   :  { %v1000_v0 = vmul.f32 %v2786_v57, %v999_v55 }
 0x244   :  { %v2788_v38 = vpop.eup %2787  ;;  %v893_v20 = vadd.f32 %v2784_v60, %v892_v46  ;;  %v822_v46 = vadd.f32 %v5417_v17, %v4699_v27 }
 0x245   :  { %v910_v52 = vmul.f32 %v2788_v38, %v5427_v23  ;;  %v1001_v63 = vadd.f32 %v2786_v57, %v1000_v0  ;;  %vm915_vm1 = vweird.f32 %v2788_v38 }
 0x246   :  { %v897_v8 = vsel %vm896_vm12, %v2784_v60, %v893_v20  ;;  %v5441_v20 = vld [vmem:[%s7880_s4] ss:$0 sm:$0xff]  ;;  %v1026_v60 = vand.u32 2147483647, %v5422_v24  ;;  %vm916_vm5 = vmor %vm914_vm3, %vm915_vm1 }
 0x247   :  { %v911_v55 = vsub.f32 1.0, %v910_v52  ;;  %v902_v51 = vsel %vm899_vm14, %v901_v31, %v897_v8  ;;  %v1005_v35 = vsel %vm1004_vm15, %v2786_v57, %v1001_v63  ;;  %v918_v63 = vand.u32 2147483647, %v5427_v23  ;;  %v8507_v52 = vld [vmem:[#allocation31_spill] sm:$0xff] }
 0x248   :  { %v925_v18 = vmul.f32 %v924_v13, %v902_v51  ;;  %v989_v42 = vpop.f32.mrf.mxu2  ;;  %v1010_v37 = vsel %vm1007_vm0, %v1009_v43, %v1005_v35  ;;  %v203_v15 = vadd.f32 %v8507_v52, %v4429_v44  ;;  %v1021_v51 = vadd.f32 %v5425_v25, %v1020_v59  ;;  %v8532_v52 = vld [vmem:[#allocation37_spill] sm:$0xff] }
 0x249   :  { %v912_v0 = vmul.f32 %v2788_v38, %v911_v55  ;;  %v1032_v32 = vadd.f32 %v5441_v20, %v989_v42  ;;  %v1028_v13 = vand.u32 2147483648, %v5422_v24  ;;  %v921_v57 = vor.u32 1.1754944e-38, %v920_v53 }
 0x24a   :  { %v926_v35 = vadd.f32 %v925_v18, %v822_v46  ;;  %vm919_vm7 = vcmp.eq.f32.partialorder %v918_v63, 8.507059e+37  ;;  %v1025_v31 = vsel %vm1024_vm6, %v5425_v25, %v1021_v51  ;;  %vm1027_vm8 = vcmp.eq.f32.partialorder %v1026_v60, 8.507059e+37  ;;  %v5603_v63 = vld [vmem:[%s7881_s5 + $0x10] sm:$0xff]  ;;  %v5611_v51 = vld [vmem:[%s7882_s6 + $0x178] sm:$0xff] }
 0x24b   :  { %v1033_v17 = vmul.f32 %v1032_v32, %v1010_v37  ;;  %v913_v36 = vadd.f32 %v2788_v38, %v912_v0  ;;  %v1029_v8 = vor.u32 1.1754944e-38, %v1028_v13  ;;  %v8530_v0 = vld [vmem:[#allocation69_spill] sm:$0xff]  ;;  %v5597_v32 = vld [vmem:[%s7881_s5 + $0x8] sm:$0xff]  ;;  %8531 = vst [vmem:[#allocation38_spill] sm:$0xff] %v5603_v63  ;;  %v8535_v13 = vld [vmem:[#allocation40_spill] sm:$0xff] }
 0x24c   :  { %2789 = vtanh.f32 %v926_v35  ;;  %v8534_v35 = vld [vmem:[#allocation14_spill] sm:$0xff]  ;;  %v8537_v60 = vld [vmem:[#allocation25_spill] sm:$0xff] }
 0x24d   :  { %v1034_v58 = vadd.f32 %v1033_v17, %v203_v15  ;;  %v917_v2 = vsel %vm916_vm5, %v2788_v38, %v913_v36  ;;  %v1030_v23 = vsel %vm1027_vm8, %v1029_v8, %v1025_v31  ;;  %v8533_v15 = vld [vmem:[#allocation89_spill] sm:$0xff]  ;;  %v8536_v17 = vld [vmem:[#allocation90_spill] sm:$0xff]  ;;  %v8540_v31 = vld [vmem:[#allocation84_spill] sm:$0xff] }
 0x24e   :  { %v922_v59 = vsel %vm919_vm7, %v921_v57, %v917_v2  ;;  %v1036_v24 = vsub.f32 1.0, %v1030_v23  ;;  %v1038_v38 = vmul.f32 %v1030_v23, %v4751_v30  ;;  %v5526_v30 = vld [vmem:[%s7881_s5 + $0xb0] sm:$0xff]  ;;  %v5620_v36 = vld [vmem:[%s7882_s6 + $0x160] sm:$0xff]  ;;  %v5629_v2 = vld [vmem:[%s7882_s6 + $0x148] sm:$0xff] }
 0x24f   :  { %2791 = vtanh.f32 %v1034_v58  ;;  %v928_v43 = vsub.f32 1.0, %v922_v59  ;;  %v930_v18 = vmul.f32 %v922_v59, %v4714_v50  ;;  %v5490_v50 = vld [vmem:[%s7881_s5 + $0x110] sm:$0xff]  ;;  %v8538_v57 = vld [vmem:[#allocation42_spill] sm:$0xff]  ;;  %v8539_v58 = vld [vmem:[#allocation91_spill] sm:$0xff] }
 0x250   :  { %v8541_v59 = vld [vmem:[#allocation77_spill] sm:$0xff]  ;;  %v8542_v8 = vld [vmem:[#allocation75_spill] sm:$0xff]  ;;  %v5638_v23 = vld [vmem:[%s7882_s6 + $0x130] sm:$0xff] }
 0x252   :  { %v2790_v55 = vpop.eup %2789 }
 0x253   :  { %v929_v46 = vmul.f32 %v2790_v55, %v928_v43  ;;  %v8543_v43 = vld [vmem:[#allocation28_spill] sm:$0xff]  ;;  %v8544_v55 = vld [vmem:[#allocation49_spill] sm:$0xff] }
 0x255   :  { %v2792_v42 = vpop.eup %2791  ;;  %v5455_v37 = vadd.f32 %v930_v18, %v929_v46  ;;  %v8545_v46 = vld [vmem:[#allocation46_spill] sm:$0xff]  ;;  %v5647_v18 = vld [vmem:[%s7882_s6 + $0x118] sm:$0xff] }
 0x256   :  { %v1037_v53 = vmul.f32 %v2792_v42, %v1036_v24  ;;  %v8546_v24 = vld [vmem:[#allocation70_spill] sm:$0xff]  ;;  %v8547_v42 = vld [vmem:[#allocation85_spill] sm:$0xff] }
 0x257   :  { %1116 = vmatmul.f32.vlgmr.msra.gmra.mxu2 %v5455_v37 }
 0x258   :  { %v5459_v25 = vadd.f32 %v1038_v38, %v1037_v53  ;;  %1356 = vmatpush.msra.mxu2 %v4723_v45  ;;  %v5499_v45 = vld [vmem:[%s7881_s5 + $0xf8] sm:$0xff]  ;;  %v8548_v53 = vld [vmem:[#allocation83_spill] sm:$0xff]  ;;  %v5656_v38 = vld [vmem:[%s7882_s6 + $0x100] sm:$0xff] }
 0x25a   :  { %1056 = vmatmul.f32.vlgmr.msra.gmra.mxu3 %v5459_v25  ;;  %1076 = vmatmul.f32.vlgmr.msra.gmra.mxu0 %v5459_v25 }
 0x25b   :  { %1096 = vmatmul.f32.vlgmr.msra.gmra.mxu1 %v5459_v25  ;;  %1248 = vmatpush.msra.mxu3 %v4766_v40  ;;  %v5535_v40 = vld [vmem:[%s7881_s5 + $0x98] sm:$0xff] }
 0x25c   :  { %1316 = vmatpush.msra.mxu0 %v4772_v61  ;;  %1336 = vmatpush.msra.mxu1 %v4778_v16  ;;  %v8511_v61 = vld [vmem:[#allocation52_spill] sm:$0xff] }
 0x25d   :  { %1249 = vmatpush.msra.mxu3 %v4790_v12  ;;  %1357 = vmatpush.msra.mxu2 %v4729_v47  ;;  %v5508_v47 = vld [vmem:[%s7881_s5 + $0xe0] sm:$0xff]  ;;  %v8512_v16 = vld [vmem:[#allocation48_spill] sm:$0xff] }
 0x25e   :  { %1317 = vmatpush.msra.mxu0 %v4796_v10  ;;  %1337 = vmatpush.msra.mxu1 %v4802_v21  ;;  %v5544_v12 = vld [vmem:[%s7881_s5 + $0x80] sm:$0xff] }
 0x25f   :  { %1250 = vmatpush.msra.mxu3 %v4814_v28  ;;  %1244 = vmatmul.f32.vlgmr.msrb.gmra.mxu2 %v5459_v25  ;;  %v8514_v10 = vld [vmem:[#allocation54_spill] sm:$0xff]  ;;  %v5553_v28 = vld [vmem:[%s7881_s5 + $0x68] sm:$0xff] }
 0x260   :  { %1318 = vmatpush.msra.mxu0 %v4820_v26  ;;  %1338 = vmatpush.msra.mxu1 %v4826_v19  ;;  %v8515_v21 = vld [vmem:[#allocation74_spill] sm:$0xff]  ;;  %v8517_v26 = vld [vmem:[#allocation57_spill] sm:$0xff] }
 0x261   :  { %1251 = vmatpush.msra.mxu3 %v4838_v33  ;;  %1358 = vmatpush.msra.mxu2 %v4735_v22  ;;  %v8508_v22 = vld [vmem:[#allocation76_spill] sm:$0xff]  ;;  %v8518_v19 = vld [vmem:[#allocation10_spill] sm:$0xff] }
 0x262   :  { %1136 = vmatmul.f32.vlgmr.msrb.gmra.mxu3 %v5455_v37  ;;  %1156 = vmatmul.f32.vlgmr.msrb.gmra.mxu0 %v5455_v37  ;;  %v5562_v33 = vld [vmem:[%s7881_s5 + $0x50] sm:$0xff] }
 0x263   :  { %1224 = vmatmul.f32.vlgmr.msrb.gmra.mxu1 %v5459_v25  ;;  %1252 = vmatpush.msra.mxu3 %v4847_v6  ;;  %v8520_v6 = vld [vmem:[#allocation26_spill] sm:$0xff] }
 0x264   :  { %1319 = vmatpush.msra.mxu0 %v4853_v56  ;;  %1339 = vmatpush.msra.mxu1 %v4859_v48  ;;  %v8521_v56 = vld [vmem:[#allocation50_spill] sm:$0xff] }
 0x265   :  { %1253 = vmatpush.msra.mxu3 %v4871_v34  ;;  %1359 = vmatpush.msra.mxu2 %v4741_v49  ;;  %v5517_v49 = vld [vmem:[%s7881_s5 + $0xc8] sm:$0xff]  ;;  %v8522_v48 = vld [vmem:[#allocation62_spill] sm:$0xff]  ;;  %v8523_v34 = vld [vmem:[#allocation64_spill] sm:$0xff] }
 0x266   :  { %1320 = vmatpush.msra.mxu0 %v4877_v41  ;;  %1340 = vmatpush.msra.mxu1 %v5490_v50  ;;  %v8524_v41 = vld [vmem:[#allocation12_spill] sm:$0xff] }
 0x267   :  { %1254 = vmatpush.msra.mxu3 %v4890_v62  ;;  %1360 = vmatpush.msra.mxu2 %v4748_v54  ;;  %v8509_v54 = vld [vmem:[#allocation45_spill] sm:$0xff]  ;;  %v8526_v62 = vld [vmem:[#allocation67_spill] sm:$0xff] }
 0x268   :  { %1321 = vmatpush.msra.mxu0 %v4896_v4  ;;  %1341 = vmatpush.msra.mxu1 %v5499_v45  ;;  %v5571_v4 = vld [vmem:[%s7881_s5 + $0x38] sm:$0xff] }
 0x269   :  { %1255 = vmatpush.msra.mxu3 %v4909_v9  ;;  %1361 = vmatpush.msra.mxu2 %v4756_v39  ;;  %v8510_v39 = vld [vmem:[#allocation9_spill] sm:$0xff]  ;;  %v8525_v9 = vld [vmem:[#allocation30_spill] sm:$0xff] }
 0x26a   :  { %1322 = vmatpush.msra.mxu0 %v4915_v14  ;;  %1342 = vmatpush.msra.mxu1 %v5508_v47  ;;  %v8519_v14 = vld [vmem:[#allocation60_spill] sm:$0xff] }
 0x26b   :  { %1256 = vmatpush.msra.mxu3 %v4928_v1  ;;  %1362 = vmatpush.msra.mxu2 %v4784_v11  ;;  %v8513_v11 = vld [vmem:[#allocation78_spill] sm:$0xff] }
 0x26c   :  { %1323 = vmatpush.msra.mxu0 %v8508_v22  ;;  %1343 = vmatpush.msra.mxu1 %v5517_v49  ;;  %v5582_v1 = vld [vmem:[%s7881_s5 + $0x20] sm:$0xff]  ;;  %v8549_v22 = vld [vmem:[#allocation71_spill] sm:$0xff] }
 0x26d   :  { %1257 = vmatpush.msra.mxu3 %v4947_v29  ;;  %1363 = vmatpush.msra.mxu2 %v8509_v54  ;;  %v8527_v29 = vld [vmem:[#allocation32_spill] sm:$0xff] }
 0x26e   :  { %1324 = vmatpush.msra.mxu0 %v4953_v7  ;;  %1344 = vmatpush.msra.mxu1 %v5526_v30  ;;  %v8516_v7 = vld [vmem:[#allocation81_spill] sm:$0xff]  ;;  %v8550_v54 = vld [vmem:[#allocation56_spill] sm:$0xff] }
 0x26f   :  { %1258 = vmatpush.msra.mxu3 %v4961_v5  ;;  %1364 = vmatpush.msra.mxu2 %v8510_v39  ;;  %v8529_v5 = vld [vmem:[#allocation34_spill] sm:$0xff]  ;;  %v8551_v39 = vld [vmem:[#allocation53_spill] sm:$0xff] }
 0x270   :  { %1325 = vmatpush.msra.mxu0 %v4967_v3  ;;  %1345 = vmatpush.msra.mxu1 %v5535_v40  ;;  %v5589_v3 = vld [vmem:[%s7881_s5 + $0x28] sm:$0xff] }
 0x271   :  { %1259 = vmatpush.msra.mxu3 %v8511_v61  ;;  %1365 = vmatpush.msra.mxu2 %v8512_v16  ;;  %8528 = vst [vmem:[#allocation29_spill] sm:$0xff] %v5589_v3  ;;  %v5665_v61 = vld [vmem:[%s7882_s6 + $0xe8] sm:$0xff]  ;;  %v8552_v16 = vld [vmem:[#allocation73_spill] sm:$0xff] }
 0x272   :  { %1326 = vmatpush.msra.mxu0 %v8513_v11  ;;  %1346 = vmatpush.msra.mxu1 %v5544_v12  ;;  %v8553_v11 = vld [vmem:[#allocation88_spill] sm:$0xff] }
 0x273   :  { %1260 = vmatpush.msra.mxu3 %v8514_v10  ;;  %1366 = vmatpush.msra.mxu2 %v8515_v21  ;;  %v8554_v10 = vld [vmem:[#allocation87_spill] sm:$0xff]  ;;  %v5674_v21 = vld [vmem:[%s7882_s6 + $0xd0] sm:$0xff] }
 0x274   :  { %1327 = vmatpush.msra.mxu0 %v8516_v7  ;;  %1347 = vmatpush.msra.mxu1 %v5553_v28  ;;  %v8555_v7 = vld [vmem:[#allocation44_spill] sm:$0xff] }
 0x275   :  { %1261 = vmatpush.msra.mxu3 %v8517_v26  ;;  %1367 = vmatpush.msra.mxu2 %v8518_v19  ;;  %v8556_v26 = vld [vmem:[#allocation15_spill] sm:$0xff] }
 0x276   :  { %1328 = vmatpush.msra.mxu0 %v8519_v14  ;;  %1348 = vmatpush.msra.mxu1 %v5562_v33  ;;  %v8557_v19 = vld [vmem:[#allocation11_spill] sm:$0xff]  ;;  %v5683_v14 = vld [vmem:[%s7882_s6 + $0xb8] sm:$0xff] }
 0x277   :  { %1262 = vmatpush.msra.mxu3 %v8520_v6  ;;  %1368 = vmatpush.msra.mxu2 %v8521_v56  ;;  %v8558_v6 = vld [vmem:[#allocation80_spill] sm:$0xff]  ;;  %v8559_v56 = vld [vmem:[#allocation18_spill] sm:$0xff] }
 0x278   :  { %1329 = vmatpush.msra.mxu0 %v8522_v48  ;;  %1349 = vmatpush.msra.mxu1 %v5571_v4  ;;  %v8560_v48 = vld [vmem:[#allocation16_spill] sm:$0xff] }
 0x279   :  { %1263 = vmatpush.msra.mxu3 %v8523_v34  ;;  %1369 = vmatpush.msra.mxu2 %v8524_v41  ;;  %v5692_v34 = vld [vmem:[%s7882_s6 + $0xa0] sm:$0xff]  ;;  %v8561_v41 = vld [vmem:[#allocation51_spill] sm:$0xff] }
 0x27a   :  { %1264 = vmatmul.f32.vlgmr.msra.gmra.mxu3 %v5459_v25  ;;  %1330 = vmatpush.msra.mxu0 %v8525_v9  ;;  %v8562_v9 = vld [vmem:[#allocation21_spill] sm:$0xff] }
 0x27b   :  { %1376 = vmatpush.msrb.mxu3 %v8526_v62  ;;  %1350 = vmatpush.msra.mxu1 %v5582_v1  ;;  %v8563_v62 = vld [vmem:[#allocation19_spill] sm:$0xff] }
 0x27c   :  { %1331 = vmatpush.msra.mxu0 %v8527_v29  ;;  %1370 = vmatpush.msra.mxu2 %v5589_v3  ;;  %v5701_v29 = vld [vmem:[%s7882_s6 + $0x88] sm:$0xff] }
 0x27d   :  { %1377 = vmatpush.msrb.mxu3 %v8529_v5  ;;  %1351 = vmatpush.msra.mxu1 %v5597_v32  ;;  %v8564_v5 = vld [vmem:[#allocation86_spill] sm:$0xff] }
 0x27e   :  { %1396 = vmatpush.msrb.mxu0 %v8530_v0  ;;  %1371 = vmatpush.msra.mxu2 %v5603_v63  ;;  %v8565_v0 = vld [vmem:[#allocation24_spill] sm:$0xff] }
 0x27f   :  { %1378 = vmatpush.msrb.mxu3 %v8532_v52  ;;  %1416 = vmatpush.msrb.mxu1 %v5611_v51  ;;  %v8566_v52 = vld [vmem:[#allocation22_spill] sm:$0xff] }
 0x280   :  { %1397 = vmatpush.msrb.mxu0 %v8533_v15  ;;  %1484 = vmatpush.msrb.mxu2 %v8534_v35  ;;  %v5710_v15 = vld [vmem:[%s7882_s6 + $0x70] sm:$0xff]  ;;  %v8567_v35 = vld [vmem:[#allocation59_spill] sm:$0xff] }
 0x281   :  { %1379 = vmatpush.msrb.mxu3 %v8535_v13  ;;  %1417 = vmatpush.msrb.mxu1 %v5620_v36  ;;  %v8568_v13 = vld [vmem:[#allocation27_spill] sm:$0xff] }
 0x282   :  { %1398 = vmatpush.msrb.mxu0 %v8536_v17  ;;  %1485 = vmatpush.msrb.mxu2 %v8537_v60  ;;  %v8569_v17 = vld [vmem:[#allocation35_spill] sm:$0xff]  ;;  %v5719_v60 = vld [vmem:[%s7882_s6 + $0x58] sm:$0xff] }
 0x283   :  { %1380 = vmatpush.msrb.mxu3 %v8538_v57  ;;  %1418 = vmatpush.msrb.mxu1 %v5629_v2  ;;  %v8570_v57 = vld [vmem:[#allocation13_spill] sm:$0xff] }
 0x284   :  { %1399 = vmatpush.msrb.mxu0 %v8539_v58  ;;  %1486 = vmatpush.msrb.mxu2 %v8540_v31  ;;  %v8571_v58 = vld [vmem:[#allocation93_spill] sm:$0xff]  ;;  %v5727_v31 = vld [vmem:[%s7882_s6 + $0x20] sm:$0xff] }
 0x285   :  { %1381 = vmatpush.msrb.mxu3 %v8541_v59  ;;  %1419 = vmatpush.msrb.mxu1 %v5638_v23  ;;  %v5733_v59 = vld [vmem:[%s7878_s2 + $0x170] sm:$0xff] }
 0x286   :  { %1400 = vmatpush.msrb.mxu0 %v8542_v8  ;;  %1487 = vmatpush.msrb.mxu2 %v8543_v43  ;;  %v5739_v8 = vld [vmem:[%s7882_s6 + $0x40] sm:$0xff]  ;;  %v5745_v43 = vld [vmem:[%s7882_s6 + $0x8] sm:$0xff] }
 0x287   :  { %1382 = vmatpush.msrb.mxu3 %v8544_v55  ;;  %1420 = vmatpush.msrb.mxu1 %v5647_v18  ;;  %v8572_v55 = vld [vmem:[#allocation17_spill] sm:$0xff] }
 0x288   :  { %1401 = vmatpush.msrb.mxu0 %v8545_v46  ;;  %1488 = vmatpush.msrb.mxu2 %v8546_v24  ;;  %v5752_v46 = vld [vmem:[%s7878_s2 + $0x158] sm:$0xff]  ;;  %v5758_v24 = vld [vmem:[%s7882_s6 + $0x28] sm:$0xff] }
 0x289   :  { %1383 = vmatpush.msrb.mxu3 %v8547_v42  ;;  %1421 = vmatpush.msrb.mxu1 %v5656_v38  ;;  %8573 = vst [vmem:[#allocation43_spill] sm:$0xff] %v5752_v46  ;;  %v8575_v42 = vld [vmem:[#allocation20_spill] sm:$0xff] }
 0x28a   :  { %1402 = vmatpush.msrb.mxu0 %v8548_v53  ;;  %1489 = vmatpush.msrb.mxu2 %v8549_v22  ;;  %8574 = vst [vmem:[#allocation31_spill] sm:$0xff] %v5758_v24  ;;  %v5765_v53 = vld [vmem:[%s7878_s2 + $0x140] sm:$0xff]  ;;  %v5771_v22 = vld [vmem:[%s7882_s6 + $0x10] sm:$0xff] }
 0x28b   :  { %1384 = vmatpush.msrb.mxu3 %v8550_v54  ;;  %1422 = vmatpush.msrb.mxu1 %v5665_v61  ;;  %8576 = vst [vmem:[#allocation76_spill] sm:$0xff] %v5765_v53  ;;  %v8578_v54 = vld [vmem:[#allocation23_spill] sm:$0xff] }
 0x28c   :  { %1403 = vmatpush.msrb.mxu0 %v8551_v39  ;;  %1490 = vmatpush.msrb.mxu2 %v8552_v16  ;;  %8577 = vst [vmem:[#allocation45_spill] sm:$0xff] %v5771_v22  ;;  %v5778_v39 = vld [vmem:[%s7878_s2 + $0x128] sm:$0xff]  ;;  %v8580_v16 = vld [vmem:[#allocation58_spill] sm:$0xff] }
 0x28d   :  { %1385 = vmatpush.msrb.mxu3 %v8553_v11  ;;  %1423 = vmatpush.msrb.mxu1 %v5674_v21  ;;  %8579 = vst [vmem:[#allocation9_spill] sm:$0xff] %v5778_v39  ;;  %v8581_v11 = vld [vmem:[#allocation2_spill] sm:$0xff] }
 0x28e   :  { %1404 = vmatpush.msrb.mxu0 %v8554_v10  ;;  %1491 = vmatpush.msrb.mxu2 %v8555_v7  ;;  %v8582_v10 = vld [vmem:[#allocation61_spill] sm:$0xff]  ;;  %v8583_v7 = vld [vmem:[#allocation94_spill] sm:$0xff] }
 0x28f   :  { %1386 = vmatpush.msrb.mxu3 %v8556_v26  ;;  %1424 = vmatpush.msrb.mxu1 %v5683_v14  ;;  %v8584_v26 = vld [vmem:[#allocation95_spill] sm:$0xff] }
 0x290   :  { %1405 = vmatpush.msrb.mxu0 %v8557_v19  ;;  %1492 = vmatpush.msrb.mxu2 %v8558_v6  ;;  %v8585_v19 = vld [vmem:[#allocation96_spill] sm:$0xff]  ;;  %v8586_v6 = vld [vmem:[#allocation97_spill] sm:$0xff] }
 0x291   :  { %1387 = vmatpush.msrb.mxu3 %v8559_v56  ;;  %1425 = vmatpush.msrb.mxu1 %v5692_v34  ;;  %v8587_v56 = vld [vmem:[#allocation98_spill] sm:$0xff] }
 0x292   :  { %1406 = vmatpush.msrb.mxu0 %v8560_v48  ;;  %1493 = vmatpush.msrb.mxu2 %v8561_v41  ;;  %v8588_v48 = vld [vmem:[#allocation99_spill] sm:$0xff]  ;;  %v8589_v41 = vld [vmem:[#allocation100_spill] sm:$0xff] }
 0x293   :  { %1388 = vmatpush.msrb.mxu3 %v8562_v9  ;;  %1426 = vmatpush.msrb.mxu1 %v5701_v29  ;;  %v8590_v9 = vld [vmem:[#allocation101_spill] sm:$0xff] }
 0x294   :  { %1407 = vmatpush.msrb.mxu0 %v8563_v62  ;;  %1494 = vmatpush.msrb.mxu2 %v8564_v5  ;;  %v8591_v62 = vld [vmem:[#allocation102_spill] sm:$0xff] }
 0x295   :  { %1389 = vmatpush.msrb.mxu3 %v8565_v0  ;;  %1427 = vmatpush.msrb.mxu1 %v5710_v15 }
 0x296   :  { %1408 = vmatpush.msrb.mxu0 %v8566_v52  ;;  %1495 = vmatpush.msrb.mxu2 %v8567_v35  ;;  %v8592_v35 = vld [vmem:[#allocation41_spill] sm:$0xff] }
 0x297   :  { %1390 = vmatpush.msrb.mxu3 %v8568_v13  ;;  %1428 = vmatpush.msrb.mxu1 %v5719_v60 }
 0x298   :  { %1409 = vmatpush.msrb.mxu0 %v8569_v17  ;;  %1496 = vmatpush.msrb.mxu2 %v8570_v57 }
 0x299   :  { %1391 = vmatpush.msrb.mxu3 %v8571_v58  ;;  %1429 = vmatpush.msrb.mxu1 %v5739_v8  ;;  %v8593_v58 = vld [vmem:[#allocation79_spill] sm:$0xff] }
 0x29a   :  { %1410 = vmatpush.msrb.mxu0 %v5727_v31  ;;  %1497 = vmatpush.msrb.mxu2 %v8572_v55  ;;  %v8594_v55 = vld [vmem:[#allocation3_spill] sm:$0xff] }
 0x29b   :  { %1504 = vmatpush.msra.mxu3 %v5733_v59  ;;  %1430 = vmatpush.msrb.mxu1 %v5758_v24 }
 0x29c   :  { %1411 = vmatpush.msrb.mxu0 %v5745_v43  ;;  %1498 = vmatpush.msrb.mxu2 %v8575_v42  ;;  %v165_v42 = vadd.f32 %v8594_v55, %v8593_v58 }
 0x29d   :  { %1505 = vmatpush.msra.mxu3 %v5752_v46  ;;  %1431 = vmatpush.msrb.mxu1 %v5771_v22 }
 0x29e   :  { %1499 = vmatpush.msrb.mxu2 %v8578_v54 }
 0x29f   :  { %1506 = vmatpush.msra.mxu3 %v5765_v53 }
 0x2a1   :  { %1507 = vmatpush.msra.mxu3 %v5778_v39  ;;  %v5814_v39 = vld [vmem:[%s7884_s8] ss:$0 sm:$0xff] }
 0x2a2   :  { %8598 = vst [vmem:[#allocation52_spill] sm:$0xff] %v5814_v39 }
 0x2a3   :  { %1508 = vmatpush.msra.mxu3 %v8580_v16  ;;  %v8595_v16 = vld [vmem:[#allocation47_spill] sm:$0xff] }
 0x2a5   :  { %1509 = vmatpush.msra.mxu3 %v8581_v11 }
 0x2a7   :  { %1510 = vmatpush.msra.mxu3 %v8582_v10 }
 0x2a9   :  { %1511 = vmatpush.msra.mxu3 %v8583_v7 }
 0x2ab   :  { %1512 = vmatpush.msra.mxu3 %v8584_v26 }
 0x2ad   :  { %1513 = vmatpush.msra.mxu3 %v8585_v19 }
 0x2af   :  { %1514 = vmatpush.msra.mxu3 %v8586_v6  ;;  %v8596_v6 = vld [vmem:[#allocation7_spill] sm:$0xff] }
 0x2b1   :  { %1515 = vmatpush.msra.mxu3 %v8587_v56 }
 0x2b3   :  { %1516 = vmatpush.msra.mxu3 %v8588_v48 }
 0x2b5   :  { %1517 = vmatpush.msra.mxu3 %v8589_v41 }
 0x2b7   :  { %1518 = vmatpush.msra.mxu3 %v8590_v9 }
 0x2b9   :  { %1519 = vmatpush.msra.mxu3 %v8591_v62 }
 0x2d7   :  { %v1077_v54 = vpop.f32.mrf.mxu0 }
 0x2d8   :  { %v1097_v5 = vpop.f32.mrf.mxu1  ;;  %v1078_v56 = vadd.f32 %v1077_v54, %v8596_v6 }
 0x2da   :  { %v1117_v0 = vpop.f32.mrf.mxu2 }
 0x2dd   :  { %v1057_v52 = vpop.f32.mrf.mxu3 }
 0x2de   :  { %v1058_v13 = vadd.f32 %v1057_v52, %v8592_v35 }
 0x2e0   :  { %v1160_v17 = vadd.f32 %v1117_v0, %v1058_v13  ;;  %v1225_v57 = vpop.f32.mrf.mxu1 }
 0x2e1   :  { %v1268_v11 = vadd.f32 %v1225_v57, %v8595_v16 }
 0x2e2   :  { %v2716_v10 = vmul.f32 -1.442695, %v1160_v17  ;;  %v1245_v7 = vpop.f32.mrf.mxu2 }
 0x2e3   :  { %v2718_v26 = vmul.f32 -1.442695, %v1268_v11  ;;  %v1288_v19 = vadd.f32 %v1245_v7, %v165_v42 }
 0x2e4   :  { %2793 = vpow2.f32 %v2716_v10 }
 0x2e5   :  { %2795 = vpow2.f32 %v2718_v26  ;;  %v2719_v48 = vmul.f32 -1.442695, %v1288_v19  ;;  %v1137_v41 = vpop.f32.mrf.mxu3  ;;  %v8597_v26 = vld [vmem:[#allocation33_spill] sm:$0xff] }
 0x2e6   :  { %v1180_v9 = vadd.f32 %v1137_v41, %v1078_v56  ;;  %v206_v19 = vadd.f32 %v8597_v26, %v4429_v44  ;;  %v1098_v56 = vadd.f32 %v1097_v5, %v4699_v27 }
 0x2e7   :  { %2797 = vpow2.f32 %v2719_v48 }
 0x2e8   :  { %v2717_v62 = vmul.f32 -1.442695, %v1180_v9 }
 0x2ea   :  { %v2794_v0 = vpop.eup %2793  ;;  %2799 = vpow2.f32 %v2717_v62 }
 0x2eb   :  { %v2796_v52 = vpop.eup %2795  ;;  %v1164_v13 = vadd.f32 1.0, %v2794_v0 }
 0x2ec   :  { %v1272_v55 = vadd.f32 1.0, %v2796_v52 }
 0x2ed   :  { %v2798_v58 = vpop.eup %2797  ;;  %2801 = vrcp.f32 %v1164_v13  ;;  %v1174_v41 = vand.u32 2147483647, %v1164_v13  ;;  %v1176_v9 = vand.u32 2147483648, %v1164_v13  ;;  %vm1170_vm11 = vweird.f32 %v1164_v13 }
 0x2ee   :  { %2803 = vrcp.f32 %v1272_v55  ;;  %v5798_v17 = vadd.f32 1.0, %v2798_v58  ;;  %v1157_v58 = vpop.f32.mrf.mxu0  ;;  %v1284_v6 = vand.u32 2147483648, %v1272_v55  ;;  %vm1278_vm12 = vweird.f32 %v1272_v55 }
 0x2ef   :  { %v1200_v5 = vadd.f32 %v5814_v39, %v1157_v58  ;;  %vm1175_vm14 = vcmp.eq.f32.partialorder %v1174_v41, 8.507059e+37 }
 0x2f0   :  { %v2800_v57 = vpop.eup %2799  ;;  %2805 = vrcp.f32 %v5798_v17  ;;  %v1285_v46 = vor.u32 1.1754944e-38, %v1284_v6  ;;  %vm1298_vm4 = vweird.f32 %v5798_v17 }
 0x2f1   :  { %v5801_v42 = vadd.f32 1.0, %v2800_v57  ;;  %v1282_v57 = vand.u32 2147483647, %v1272_v55 }
 0x2f3   :  { %v2802_v54 = vpop.eup %2801  ;;  %2807 = vrcp.f32 %v5801_v42  ;;  %vm1283_vm0 = vcmp.eq.f32.partialorder %v1282_v57, 8.507059e+37  ;;  %vm1190_vm3 = vweird.f32 %v5801_v42 }
 0x2f4   :  { %v2804_v16 = vpop.eup %2803  ;;  %v1166_v11 = vmul.f32 %v2802_v54, %v1164_v13  ;;  %vm1171_vm9 = vweird.f32 %v2802_v54  ;;  %v1196_v13 = vand.u32 2147483648, %v5801_v42 }
 0x2f5   :  { %v1274_v10 = vmul.f32 %v2804_v16, %v1272_v55  ;;  %vm1279_vm10 = vweird.f32 %v2804_v16  ;;  %vm1172_vm13 = vmor %vm1170_vm11, %vm1171_vm9 }
 0x2f6   :  { %v5804_v7 = vpop.eup %2805  ;;  %v1167_v48 = vsub.f32 1.0, %v1166_v11  ;;  %vm1280_vm15 = vmor %vm1278_vm12, %vm1279_vm10 }
 0x2f7   :  { %v1294_v62 = vmul.f32 %v5804_v7, %v5798_v17  ;;  %v1275_v0 = vsub.f32 1.0, %v1274_v10  ;;  %v1177_v10 = vor.u32 1.1754944e-38, %v1176_v9  ;;  %vm1299_vm2 = vweird.f32 %v5804_v7 }
 0x2f8   :  { %v1168_v52 = vmul.f32 %v2802_v54, %v1167_v48  ;;  %vm1300_vm6 = vmor %vm1298_vm4, %vm1299_vm2 }
 0x2f9   :  { %v2808_v35 = vpop.eup %2807  ;;  %v1295_v26 = vsub.f32 1.0, %v1294_v62  ;;  %v1276_v11 = vmul.f32 %v2804_v16, %v1275_v0 }
 0x2fa   :  { %v1169_v44 = vadd.f32 %v2802_v54, %v1168_v52  ;;  %v1186_v27 = vmul.f32 %v2808_v35, %v5801_v42  ;;  %vm1191_vm1 = vweird.f32 %v2808_v35 }
 0x2fb   :  { %v1296_v48 = vmul.f32 %v5804_v7, %v1295_v26  ;;  %v1277_v22 = vadd.f32 %v2804_v16, %v1276_v11  ;;  %vm1192_vm5 = vmor %vm1190_vm3, %vm1191_vm1 }
 0x2fc   :  { %v1173_v53 = vsel %vm1172_vm13, %v2802_v54, %v1169_v44  ;;  %v1187_v24 = vsub.f32 1.0, %v1186_v27  ;;  %v1304_v44 = vand.u32 2147483648, %v5798_v17  ;;  %v1194_v27 = vand.u32 2147483647, %v5801_v42 }
 0x2fd   :  { %v1178_v58 = vsel %vm1175_vm14, %v1177_v10, %v1173_v53  ;;  %v1265_v62 = vpop.f32.mrf.mxu3  ;;  %v1281_v0 = vsel %vm1280_vm15, %v2804_v16, %v1277_v22  ;;  %v1297_v9 = vadd.f32 %v5804_v7, %v1296_v48  ;;  %v1197_v54 = vor.u32 1.1754944e-38, %v1196_v13  ;;  %v5873_v13 = vld [vmem:[%s7881_s5 + $0x160] sm:$0xff] }
 0x2fe   :  { %v1201_v52 = vmul.f32 %v1200_v5, %v1178_v58  ;;  %v1188_v39 = vmul.f32 %v2808_v35, %v1187_v24  ;;  %v1286_v55 = vsel %vm1283_vm0, %v1285_v46, %v1281_v0  ;;  %v1308_v41 = vadd.f32 %v5441_v20, %v1265_v62  ;;  %v5861_v62 = vld [vmem:[%s7881_s5 + $0x170] sm:$0xff]  ;;  %v5867_v0 = vld [vmem:[%s7878_s2 + $0x160] sm:$0xff] }
 0x2ff   :  { %v1302_v24 = vand.u32 2147483647, %v5798_v17  ;;  %v1301_v16 = vsel %vm1300_vm6, %v5804_v7, %v1297_v9  ;;  %vm1195_vm7 = vcmp.eq.f32.partialorder %v1194_v27, 8.507059e+37  ;;  %v1305_v57 = vor.u32 1.1754944e-38, %v1304_v44  ;;  %v5840_v7 = vld [vmem:[%s7881_s5 + $0x178] sm:$0xff]  ;;  %v5897_v9 = vld [vmem:[%s7881_s5 + $0x148] sm:$0xff] }
 0x300   :  { %v1202_v6 = vadd.f32 %v1201_v52, %v1098_v56  ;;  %v1309_v53 = vmul.f32 %v1308_v41, %v1286_v55  ;;  %v1189_v22 = vadd.f32 %v2808_v35, %v1188_v39  ;;  %v5879_v52 = vld [vmem:[%s7881_s5 + $0x150] sm:$0xff]  ;;  %v5885_v55 = vld [vmem:[%s7881_s5 + $0x158] sm:$0xff]  ;;  %v5891_v41 = vld [vmem:[%s7878_s2 + $0x148] sm:$0xff] }
 0x301   :  { %vm1303_vm8 = vcmp.eq.f32.partialorder %v1302_v24, 8.507059e+37  ;;  %v5904_v44 = vld [vmem:[%s7881_s5 + $0x138] sm:$0xff]  ;;  %v5910_v27 = vld [vmem:[%s7878_s2 + $0x130] sm:$0xff]  ;;  %v5937_v24 = vld [vmem:[%s7881_s5 + $0x128] sm:$0xff] }
 0x302   :  { %2809 = vtanh.f32 %v1202_v6  ;;  %v1310_v20 = vadd.f32 %v1309_v53, %v206_v19  ;;  %v1193_v46 = vsel %vm1192_vm5, %v2808_v35, %v1189_v22  ;;  %v1306_v42 = vsel %vm1303_vm8, %v1305_v57, %v1301_v16  ;;  %v5916_v6 = vld [vmem:[%s7881_s5 + $0x140] sm:$0xff]  ;;  %v5925_v53 = vld [vmem:[%s7878_s2 + $0x118] sm:$0xff]  ;;  %v5962_v16 = vld [vmem:[%s7878_s2 + $0xe8] sm:$0xff] }
 0x303   :  { %v1198_v56 = vsel %vm1195_vm7, %v1197_v54, %v1193_v46  ;;  %v1312_v26 = vsub.f32 1.0, %v1306_v42  ;;  %v1314_v19 = vmul.f32 %v1306_v42, %v5459_v25  ;;  %v5855_v25 = vld [vmem:[%s7881_s5 + $0x168] sm:$0xff]  ;;  %v5931_v22 = vld [vmem:[%s7881_s5 + $0x120] sm:$0xff]  ;;  %v5949_v46 = vld [vmem:[%s7881_s5 + $0x130] sm:$0xff] }
 0x304   :  { %2811 = vtanh.f32 %v1310_v20  ;;  %v1204_v39 = vsub.f32 1.0, %v1198_v56  ;;  %v1206_v17 = vmul.f32 %v1198_v56, %v5455_v37  ;;  %v5849_v37 = vld [vmem:[%s7878_s2 + $0x178] sm:$0xff]  ;;  %v5943_v20 = vld [vmem:[%s7878_s2 + $0x100] sm:$0xff]  ;;  %v5955_v54 = vld [vmem:[%s7881_s5 + $0x108] sm:$0xff] }
 0x305   :  { %v5968_v57 = vld [vmem:[%s7881_s5 + $0x118] sm:$0xff]  ;;  %v5974_v56 = vld [vmem:[%s7881_s5 + $0xf0] sm:$0xff]  ;;  %v5987_v42 = vld [vmem:[%s7881_s5 + $0x100] sm:$0xff] }
 0x308   :  { %v2810_v5 = vpop.eup %2809 }
 0x309   :  { %v1205_v11 = vmul.f32 %v2810_v5, %v1204_v39  ;;  %v5993_v39 = vld [vmem:[%s7881_s5 + $0xd8] sm:$0xff]  ;;  %v6006_v5 = vld [vmem:[%s7881_s5 + $0xe8] sm:$0xff] }
 0x30a   :  { %v2812_v10 = vpop.eup %2811 }
 0x30b   :  { %v1313_v48 = vmul.f32 %v2812_v10, %v1312_v26  ;;  %v5832_v35 = vadd.f32 %v1206_v17, %v1205_v11  ;;  %v6012_v26 = vld [vmem:[%s7881_s5 + $0xc0] sm:$0xff]  ;;  %v6025_v11 = vld [vmem:[%s7881_s5 + $0xd0] sm:$0xff]  ;;  %v6031_v17 = vld [vmem:[%s7881_s5 + $0xa8] sm:$0xff] }
 0x30c   :  { %8600 = vst [vmem:[#allocation78_spill] sm:$0xff] %v6031_v17  ;;  %v6044_v10 = vld [vmem:[%s7881_s5 + $0xb8] sm:$0xff] }
 0x30d   :  { %v5834_v58 = vadd.f32 %v1314_v19, %v1313_v48  ;;  %1392 = vmatmul.f32.vlgmr.msrb.gmra.mxu3 %v5832_v35  ;;  %v6050_v48 = vld [vmem:[%s7881_s5 + $0x90] sm:$0xff]  ;;  %v6063_v19 = vld [vmem:[%s7881_s5 + $0xa0] sm:$0xff] }
 0x30e   :  { %1632 = vmatpush.msrb.mxu3 %v5840_v7  ;;  %8602 = vst [vmem:[#allocation74_spill] sm:$0xff] %v6050_v48 }
 0x30f   :  { %1332 = vmatmul.f32.vlgmr.msra.gmra.mxu0 %v5834_v58  ;;  %1352 = vmatmul.f32.vlgmr.msra.gmra.mxu1 %v5834_v58 }
 0x310   :  { %1372 = vmatmul.f32.vlgmr.msra.gmra.mxu2 %v5834_v58  ;;  %1524 = vmatpush.msra.mxu0 %v5849_v37 }
 0x311   :  { %1592 = vmatpush.msra.mxu1 %v5855_v25  ;;  %1612 = vmatpush.msra.mxu2 %v5861_v62 }
 0x312   :  { %1525 = vmatpush.msra.mxu0 %v5867_v0  ;;  %1633 = vmatpush.msrb.mxu3 %v5873_v13 }
 0x313   :  { %1593 = vmatpush.msra.mxu1 %v5879_v52  ;;  %1613 = vmatpush.msra.mxu2 %v5885_v55 }
 0x314   :  { %1526 = vmatpush.msra.mxu0 %v5891_v41  ;;  %1634 = vmatpush.msrb.mxu3 %v5897_v9 }
 0x315   :  { %1520 = vmatmul.f32.vlgmr.msra.gmra.mxu3 %v5834_v58  ;;  %1594 = vmatpush.msra.mxu1 %v5904_v44 }
 0x316   :  { %1527 = vmatpush.msra.mxu0 %v5910_v27  ;;  %1614 = vmatpush.msra.mxu2 %v5916_v6 }
 0x317   :  { %1412 = vmatmul.f32.vlgmr.msrb.gmra.mxu0 %v5832_v35  ;;  %1432 = vmatmul.f32.vlgmr.msrb.gmra.mxu1 %v5832_v35 }
 0x318   :  { %1500 = vmatmul.f32.vlgmr.msrb.gmra.mxu2 %v5834_v58  ;;  %1528 = vmatpush.msra.mxu0 %v5925_v53 }
 0x319   :  { %1595 = vmatpush.msra.mxu1 %v5931_v22  ;;  %1615 = vmatpush.msra.mxu2 %v5937_v24 }
 0x31a   :  { %1529 = vmatpush.msra.mxu0 %v5943_v20  ;;  %1635 = vmatpush.msrb.mxu3 %v5949_v46 }
 0x31b   :  { %1596 = vmatpush.msra.mxu1 %v5955_v54  ;;  %1616 = vmatpush.msra.mxu2 %v5490_v50  ;;  %v5981_v50 = vld [vmem:[%s7878_s2 + $0xd0] sm:$0xff] }
 0x31c   :  { %1530 = vmatpush.msra.mxu0 %v5962_v16  ;;  %1636 = vmatpush.msrb.mxu3 %v5968_v57 }
 0x31d   :  { %1597 = vmatpush.msra.mxu1 %v5974_v56  ;;  %1617 = vmatpush.msra.mxu2 %v5499_v45  ;;  %v6000_v45 = vld [vmem:[%s7878_s2 + $0xb8] sm:$0xff] }
 0x31e   :  { %1531 = vmatpush.msra.mxu0 %v5981_v50  ;;  %1637 = vmatpush.msrb.mxu3 %v5987_v42 }
 0x31f   :  { %1598 = vmatpush.msra.mxu1 %v5993_v39  ;;  %1618 = vmatpush.msra.mxu2 %v5508_v47  ;;  %v6019_v47 = vld [vmem:[%s7878_s2 + $0xa0] sm:$0xff] }
 0x320   :  { %1532 = vmatpush.msra.mxu0 %v6000_v45  ;;  %1638 = vmatpush.msrb.mxu3 %v6006_v5  ;;  %8599 = vst [vmem:[#allocation48_spill] sm:$0xff] %v6019_v47 }
 0x321   :  { %1599 = vmatpush.msra.mxu1 %v6012_v26  ;;  %1619 = vmatpush.msra.mxu2 %v5517_v49  ;;  %v6038_v49 = vld [vmem:[%s7878_s2 + $0x88] sm:$0xff] }
 0x322   :  { %1533 = vmatpush.msra.mxu0 %v6019_v47  ;;  %1639 = vmatpush.msrb.mxu3 %v6025_v11  ;;  %8601 = vst [vmem:[#allocation54_spill] sm:$0xff] %v6038_v49 }
 0x323   :  { %1600 = vmatpush.msra.mxu1 %v6031_v17  ;;  %1620 = vmatpush.msra.mxu2 %v5526_v30  ;;  %v6057_v30 = vld [vmem:[%s7878_s2 + $0x70] sm:$0xff] }
 0x324   :  { %1534 = vmatpush.msra.mxu0 %v6038_v49  ;;  %1640 = vmatpush.msrb.mxu3 %v6044_v10  ;;  %8603 = vst [vmem:[#allocation81_spill] sm:$0xff] %v6057_v30 }
 0x325   :  { %1601 = vmatpush.msra.mxu1 %v6050_v48  ;;  %1621 = vmatpush.msra.mxu2 %v5535_v40  ;;  %v6069_v48 = vld [vmem:[%s7881_s5 + $0x78] sm:$0xff] }
 0x326   :  { %1535 = vmatpush.msra.mxu0 %v6057_v30  ;;  %1641 = vmatpush.msrb.mxu3 %v6063_v19  ;;  %8604 = vst [vmem:[#allocation57_spill] sm:$0xff] %v6069_v48  ;;  %v6076_v40 = vld [vmem:[%s7878_s2 + $0x58] sm:$0xff]  ;;  %v6082_v30 = vld [vmem:[%s7881_s5 + $0x88] sm:$0xff] }
 0x327   :  { %1602 = vmatpush.msra.mxu1 %v6069_v48  ;;  %1622 = vmatpush.msra.mxu2 %v5544_v12  ;;  %8605 = vst [vmem:[#allocation10_spill] sm:$0xff] %v6076_v40  ;;  %v6088_v48 = vld [vmem:[%s7881_s5 + $0x60] sm:$0xff] }
 0x328   :  { %1536 = vmatpush.msra.mxu0 %v6076_v40  ;;  %1642 = vmatpush.msrb.mxu3 %v6082_v30  ;;  %8606 = vst [vmem:[#allocation60_spill] sm:$0xff] %v6088_v48  ;;  %v6095_v12 = vld [vmem:[%s7878_s2 + $0x40] sm:$0xff]  ;;  %v6101_v40 = vld [vmem:[%s7881_s5 + $0x70] sm:$0xff] }
 0x329   :  { %1603 = vmatpush.msra.mxu1 %v6088_v48  ;;  %1623 = vmatpush.msra.mxu2 %v5553_v28  ;;  %8607 = vst [vmem:[#allocation26_spill] sm:$0xff] %v6095_v12  ;;  %v6107_v48 = vld [vmem:[%s7881_s5 + $0x48] sm:$0xff] }
 0x32a   :  { %1537 = vmatpush.msra.mxu0 %v6095_v12  ;;  %1643 = vmatpush.msrb.mxu3 %v6101_v40  ;;  %8608 = vst [vmem:[#allocation50_spill] sm:$0xff] %v6107_v48  ;;  %v6114_v28 = vld [vmem:[%s7878_s2 + $0x28] sm:$0xff]  ;;  %v6120_v12 = vld [vmem:[%s7881_s5 + $0x58] sm:$0xff] }
 0x32b   :  { %1604 = vmatpush.msra.mxu1 %v6107_v48  ;;  %1624 = vmatpush.msra.mxu2 %v5562_v33  ;;  %8609 = vst [vmem:[#allocation62_spill] sm:$0xff] %v6114_v28  ;;  %v6126_v48 = vld [vmem:[%s7881_s5 + $0x30] sm:$0xff] }
 0x32c   :  { %1538 = vmatpush.msra.mxu0 %v6114_v28  ;;  %1644 = vmatpush.msrb.mxu3 %v6120_v12  ;;  %8610 = vst [vmem:[#allocation64_spill] sm:$0xff] %v6126_v48  ;;  %v6133_v33 = vld [vmem:[%s7878_s2 + $0x10] sm:$0xff]  ;;  %v6139_v28 = vld [vmem:[%s7881_s5 + $0x40] sm:$0xff] }
 0x32d   :  { %1605 = vmatpush.msra.mxu1 %v6126_v48  ;;  %1625 = vmatpush.msra.mxu2 %v5571_v4  ;;  %8611 = vst [vmem:[#allocation12_spill] sm:$0xff] %v6133_v33  ;;  %v6146_v4 = vld [vmem:[%s7881_s5 + $0x18] sm:$0xff]  ;;  %v6159_v48 = vld [vmem:[%s7881_s5] sm:$0xff] }
 0x32e   :  { %1539 = vmatpush.msra.mxu0 %v6133_v33  ;;  %1645 = vmatpush.msrb.mxu3 %v6139_v28  ;;  %8612 = vst [vmem:[#allocation30_spill] sm:$0xff] %v6146_v4  ;;  %v6152_v33 = vld [vmem:[%s7882_s6 + $0x168] sm:$0xff] }
 0x32f   :  { %1540 = vmatmul.f32.vlgmr.msra.gmra.mxu0 %v5834_v58  ;;  %1606 = vmatpush.msra.mxu1 %v6146_v4  ;;  %8613 = vst [vmem:[#allocation67_spill] sm:$0xff] %v6152_v33  ;;  %v6166_v4 = vld [vmem:[%s7882_s6 + $0x150] sm:$0xff] }
 0x330   :  { %1652 = vmatpush.msrb.mxu0 %v6152_v33  ;;  %1626 = vmatpush.msra.mxu2 %v5582_v1  ;;  %8614 = vst [vmem:[#allocation32_spill] sm:$0xff] %v6159_v48  ;;  %v6172_v1 = vld [vmem:[%s7882_s6 + $0x170] sm:$0xff] }
 0x331   :  { %1607 = vmatpush.msra.mxu1 %v6159_v48  ;;  %1646 = vmatpush.msrb.mxu3 %v5589_v3  ;;  %8615 = vst [vmem:[#allocation34_spill] sm:$0xff] %v6166_v4  ;;  %v6180_v48 = vld [vmem:[%s7882_s6 + $0x138] sm:$0xff] }
 0x332   :  { %1653 = vmatpush.msrb.mxu0 %v6166_v4  ;;  %8616 = vst [vmem:[#allocation69_spill] sm:$0xff] %v6172_v1  ;;  %1627 = vmatpush.msra.mxu2 %v5597_v32  ;;  %v6186_v4 = vld [vmem:[%s7882_s6 + $0x158] sm:$0xff]  ;;  %v6193_v32 = vld [vmem:[%s7878_s2 + $0x168] sm:$0xff] }
 0x333   :  { %1672 = vmatpush.msrb.mxu1 %v6172_v1  ;;  %1647 = vmatpush.msrb.mxu3 %v5603_v63  ;;  %8617 = vst [vmem:[#allocation37_spill] sm:$0xff] %v6180_v48 }
 0x334   :  { %1654 = vmatpush.msrb.mxu0 %v6180_v48  ;;  %8618 = vst [vmem:[#allocation89_spill] sm:$0xff] %v6186_v4  ;;  %1692 = vmatpush.msrb.mxu2 %v5611_v51  ;;  %v6199_v48 = vld [vmem:[%s7882_s6 + $0x120] sm:$0xff]  ;;  %v6212_v51 = vld [vmem:[%s7878_s2 + $0x150] sm:$0xff] }
 0x335   :  { %1673 = vmatpush.msrb.mxu1 %v6186_v4  ;;  %8619 = vst [vmem:[#allocation14_spill] sm:$0xff] %v6193_v32  ;;  %1760 = vmatpush.msra.mxu3 %v6193_v32  ;;  %v6205_v4 = vld [vmem:[%s7882_s6 + $0x140] sm:$0xff] }
 0x336   :  { %8620 = vst [vmem:[#allocation40_spill] sm:$0xff] %v6199_v48  ;;  %1655 = vmatpush.msrb.mxu0 %v6199_v48  ;;  %1693 = vmatpush.msrb.mxu2 %v5620_v36  ;;  %v6218_v48 = vld [vmem:[%s7882_s6 + $0x108] sm:$0xff]  ;;  %v6231_v36 = vld [vmem:[%s7878_s2 + $0x138] sm:$0xff] }
 0x337   :  { %8621 = vst [vmem:[#allocation90_spill] sm:$0xff] %v6205_v4  ;;  %1674 = vmatpush.msrb.mxu1 %v6205_v4  ;;  %1761 = vmatpush.msra.mxu3 %v6212_v51  ;;  %v6224_v4 = vld [vmem:[%s7882_s6 + $0x128] sm:$0xff] }
 0x338   :  { %8622 = vst [vmem:[#allocation25_spill] sm:$0xff] %v6212_v51  ;;  %1656 = vmatpush.msrb.mxu0 %v6218_v48  ;;  %1694 = vmatpush.msrb.mxu2 %v5629_v2  ;;  %v6250_v2 = vld [vmem:[%s7878_s2 + $0x120] sm:$0xff]  ;;  %v8681_v51 = vld [vmem:[#allocation55_spill] sm:$0xff] }
 0x339   :  { %8623 = vst [vmem:[#allocation42_spill] sm:$0xff] %v6218_v48  ;;  %1675 = vmatpush.msrb.mxu1 %v6224_v4  ;;  %1762 = vmatpush.msra.mxu3 %v6231_v36  ;;  %v6237_v48 = vld [vmem:[%s7882_s6 + $0xf0] sm:$0xff] }
 0x33a   :  { %8624 = vst [vmem:[#allocation91_spill] sm:$0xff] %v6224_v4  ;;  %1657 = vmatpush.msrb.mxu0 %v6237_v48  ;;  %v6243_v4 = vld [vmem:[%s7882_s6 + $0x110] sm:$0xff]  ;;  %1695 = vmatpush.msrb.mxu2 %v5638_v23  ;;  %v6269_v23 = vld [vmem:[%s7878_s2 + $0x108] sm:$0xff] }
 0x33b   :  { %8625 = vst [vmem:[#allocation84_spill] sm:$0xff] %v6231_v36  ;;  %1676 = vmatpush.msrb.mxu1 %v6243_v4  ;;  %1763 = vmatpush.msra.mxu3 %v6250_v2 }
 0x33c   :  { %8626 = vst [vmem:[#allocation77_spill] sm:$0xff] %v6237_v48  ;;  %v6256_v48 = vld [vmem:[%s7882_s6 + $0xd8] sm:$0xff]  ;;  %1696 = vmatpush.msrb.mxu2 %v5647_v18  ;;  %v6288_v18 = vld [vmem:[%s7878_s2 + $0xf0] sm:$0xff] }
 0x33d   :  { %8627 = vst [vmem:[#allocation75_spill] sm:$0xff] %v6243_v4  ;;  %1658 = vmatpush.msrb.mxu0 %v6256_v48  ;;  %v6262_v4 = vld [vmem:[%s7882_s6 + $0xf8] sm:$0xff]  ;;  %1764 = vmatpush.msra.mxu3 %v6269_v23 }
 0x33e   :  { %8628 = vst [vmem:[#allocation28_spill] sm:$0xff] %v6250_v2  ;;  %1677 = vmatpush.msrb.mxu1 %v6262_v4  ;;  %1697 = vmatpush.msrb.mxu2 %v5656_v38  ;;  %v6307_v38 = vld [vmem:[%s7878_s2 + $0xd8] sm:$0xff] }
 0x33f   :  { %8629 = vst [vmem:[#allocation49_spill] sm:$0xff] %v6256_v48  ;;  %v6275_v48 = vld [vmem:[%s7882_s6 + $0xc0] sm:$0xff]  ;;  %1765 = vmatpush.msra.mxu3 %v6288_v18 }
 0x340   :  { %8630 = vst [vmem:[#allocation46_spill] sm:$0xff] %v6262_v4  ;;  %1659 = vmatpush.msrb.mxu0 %v6275_v48  ;;  %v6281_v4 = vld [vmem:[%s7882_s6 + $0xe0] sm:$0xff]  ;;  %1698 = vmatpush.msrb.mxu2 %v5665_v61 }
 0x341   :  { %8631 = vst [vmem:[#allocation70_spill] sm:$0xff] %v6269_v23  ;;  %1678 = vmatpush.msrb.mxu1 %v6281_v4  ;;  %1766 = vmatpush.msra.mxu3 %v6307_v38  ;;  %v6326_v61 = vld [vmem:[%s7878_s2 + $0xc0] sm:$0xff] }
 0x342   :  { %8632 = vst [vmem:[#allocation85_spill] sm:$0xff] %v6275_v48  ;;  %v6294_v48 = vld [vmem:[%s7882_s6 + $0xa8] sm:$0xff]  ;;  %1699 = vmatpush.msrb.mxu2 %v5674_v21 }
 0x343   :  { %8633 = vst [vmem:[#allocation83_spill] sm:$0xff] %v6281_v4  ;;  %1660 = vmatpush.msrb.mxu0 %v6294_v48  ;;  %v6300_v4 = vld [vmem:[%s7882_s6 + $0xc8] sm:$0xff]  ;;  %1767 = vmatpush.msra.mxu3 %v6326_v61 }
 0x344   :  { %8634 = vst [vmem:[#allocation71_spill] sm:$0xff] %v6288_v18  ;;  %1679 = vmatpush.msrb.mxu1 %v6300_v4  ;;  %1700 = vmatpush.msrb.mxu2 %v5683_v14  ;;  %v6345_v21 = vld [vmem:[%s7878_s2 + $0xa8] sm:$0xff]  ;;  %v6364_v14 = vld [vmem:[%s7878_s2 + $0x90] sm:$0xff] }
 0x345   :  { %8635 = vst [vmem:[#allocation56_spill] sm:$0xff] %v6294_v48  ;;  %v6313_v48 = vld [vmem:[%s7882_s6 + $0x90] sm:$0xff]  ;;  %1768 = vmatpush.msra.mxu3 %v6345_v21  ;;  %v8680_v18 = vld [vmem:[#allocation63_spill] sm:$0xff] }
 0x346   :  { %8636 = vst [vmem:[#allocation53_spill] sm:$0xff] %v6300_v4  ;;  %1661 = vmatpush.msrb.mxu0 %v6313_v48  ;;  %v6319_v4 = vld [vmem:[%s7882_s6 + $0xb0] sm:$0xff]  ;;  %1701 = vmatpush.msrb.mxu2 %v5692_v34  ;;  %v6383_v34 = vld [vmem:[%s7878_s2 + $0x78] sm:$0xff] }
 0x347   :  { %8637 = vst [vmem:[#allocation73_spill] sm:$0xff] %v6307_v38  ;;  %1680 = vmatpush.msrb.mxu1 %v6319_v4  ;;  %1769 = vmatpush.msra.mxu3 %v6364_v14  ;;  %v8679_v38 = vld [vmem:[#allocation79_spill] sm:$0xff] }
 0x348   :  { %8638 = vst [vmem:[#allocation88_spill] sm:$0xff] %v6313_v48  ;;  %v6332_v48 = vld [vmem:[%s7882_s6 + $0x78] sm:$0xff]  ;;  %1702 = vmatpush.msrb.mxu2 %v5701_v29  ;;  %v6402_v29 = vld [vmem:[%s7878_s2 + $0x60] sm:$0xff]  ;;  %v168_v23 = vadd.f32 %v8680_v18, %v8679_v38 }
 0x349   :  { %8639 = vst [vmem:[#allocation87_spill] sm:$0xff] %v6319_v4  ;;  %1662 = vmatpush.msrb.mxu0 %v6332_v48  ;;  %v6338_v4 = vld [vmem:[%s7882_s6 + $0x98] sm:$0xff]  ;;  %1770 = vmatpush.msra.mxu3 %v6383_v34 }
 0x34a   :  { %8640 = vst [vmem:[#allocation44_spill] sm:$0xff] %v6326_v61  ;;  %1681 = vmatpush.msrb.mxu1 %v6338_v4  ;;  %1703 = vmatpush.msrb.mxu2 %v5710_v15  ;;  %v6421_v15 = vld [vmem:[%s7878_s2 + $0x48] sm:$0xff] }
 0x34b   :  { %8641 = vst [vmem:[#allocation15_spill] sm:$0xff] %v6332_v48  ;;  %v6351_v48 = vld [vmem:[%s7882_s6 + $0x60] sm:$0xff]  ;;  %1771 = vmatpush.msra.mxu3 %v6402_v29 }
 0x34c   :  { %8642 = vst [vmem:[#allocation11_spill] sm:$0xff] %v6338_v4  ;;  %1663 = vmatpush.msrb.mxu0 %v6351_v48  ;;  %v6357_v4 = vld [vmem:[%s7882_s6 + $0x80] sm:$0xff]  ;;  %1704 = vmatpush.msrb.mxu2 %v5719_v60  ;;  %v6437_v60 = vld [vmem:[%s7878_s2 + $0x30] sm:$0xff] }
 0x34d   :  { %8643 = vst [vmem:[#allocation80_spill] sm:$0xff] %v6345_v21  ;;  %1682 = vmatpush.msrb.mxu1 %v6357_v4  ;;  %1772 = vmatpush.msra.mxu3 %v6421_v15 }
 0x34e   :  { %8644 = vst [vmem:[#allocation18_spill] sm:$0xff] %v6351_v48  ;;  %v6370_v48 = vld [vmem:[%s7882_s6 + $0x48] sm:$0xff]  ;;  %1705 = vmatpush.msrb.mxu2 %v5739_v8  ;;  %v8662_v8 = vld [vmem:[#allocation45_spill] sm:$0xff] }
 0x34f   :  { %8645 = vst [vmem:[#allocation16_spill] sm:$0xff] %v6357_v4  ;;  %1664 = vmatpush.msrb.mxu0 %v6370_v48  ;;  %v6376_v4 = vld [vmem:[%s7882_s6 + $0x68] sm:$0xff]  ;;  %1773 = vmatpush.msra.mxu3 %v6437_v60 }
 0x350   :  { %8646 = vst [vmem:[#allocation51_spill] sm:$0xff] %v6364_v14  ;;  %1683 = vmatpush.msrb.mxu1 %v6376_v4 }
 0x351   :  { %8647 = vst [vmem:[#allocation21_spill] sm:$0xff] %v6370_v48  ;;  %v6389_v48 = vld [vmem:[%s7882_s6 + $0x30] sm:$0xff] }
 0x352   :  { %8648 = vst [vmem:[#allocation19_spill] sm:$0xff] %v6376_v4  ;;  %1665 = vmatpush.msrb.mxu0 %v6389_v48  ;;  %v6395_v4 = vld [vmem:[%s7882_s6 + $0x50] sm:$0xff] }
 0x353   :  { %8649 = vst [vmem:[#allocation86_spill] sm:$0xff] %v6383_v34  ;;  %1684 = vmatpush.msrb.mxu1 %v6395_v4 }
 0x354   :  { %8650 = vst [vmem:[#allocation24_spill] sm:$0xff] %v6389_v48  ;;  %v6408_v48 = vld [vmem:[%s7882_s6 + $0x18] sm:$0xff] }
 0x355   :  { %8651 = vst [vmem:[#allocation22_spill] sm:$0xff] %v6395_v4  ;;  %1666 = vmatpush.msrb.mxu0 %v6408_v48  ;;  %v6414_v4 = vld [vmem:[%s7882_s6 + $0x38] sm:$0xff] }
 0x356   :  { %8652 = vst [vmem:[#allocation59_spill] sm:$0xff] %v6402_v29  ;;  %1685 = vmatpush.msrb.mxu1 %v6414_v4  ;;  %v8678_v29 = vld [vmem:[#allocation7_spill] sm:$0xff] }
 0x357   :  { %8653 = vst [vmem:[#allocation27_spill] sm:$0xff] %v6408_v48  ;;  %v6427_v48 = vld [vmem:[%s7882_s6] sm:$0xff] }
 0x358   :  { %8654 = vst [vmem:[#allocation35_spill] sm:$0xff] %v6414_v4  ;;  %1667 = vmatpush.msrb.mxu0 %v6427_v48  ;;  %1686 = vmatpush.msrb.mxu1 %v5727_v31  ;;  %v8658_v4 = vld [vmem:[#allocation43_spill] sm:$0xff]  ;;  %v6445_v31 = vld [vmem:[%s7878_s2 + $0x18] sm:$0xff] }
 0x359   :  { %8655 = vst [vmem:[#allocation13_spill] sm:$0xff] %v6421_v15  ;;  %v8659_v15 = vld [vmem:[#allocation31_spill] sm:$0xff]  ;;  %1774 = vmatpush.msra.mxu3 %v6445_v31 }
 0x35a   :  { %8656 = vst [vmem:[#allocation93_spill] sm:$0xff] %v6427_v48  ;;  %1780 = vmatpush.msra.mxu0 %v5733_v59  ;;  %1687 = vmatpush.msrb.mxu1 %v5745_v43  ;;  %v8661_v59 = vld [vmem:[#allocation76_spill] sm:$0xff]  ;;  %v6453_v43 = vld [vmem:[%s7878_s2] sm:$0xff]  ;;  %v8677_v48 = vld [vmem:[#allocation41_spill] sm:$0xff] }
 0x35b   :  { %8657 = vst [vmem:[#allocation17_spill] sm:$0xff] %v6437_v60  ;;  %1706 = vmatpush.msrb.mxu2 %v8659_v15  ;;  %1775 = vmatpush.msra.mxu3 %v6453_v43  ;;  %v6460_v15 = vld [vmem:[%s7878_s2 + $0x110] sm:$0xff] }
 0x35c   :  { %1781 = vmatpush.msra.mxu0 %v8658_v4  ;;  %8660 = vst [vmem:[#allocation20_spill] sm:$0xff] %v6445_v31  ;;  %v8664_v4 = vld [vmem:[#allocation9_spill] sm:$0xff] }
 0x35d   :  { %1707 = vmatpush.msrb.mxu2 %v8662_v8  ;;  %8663 = vst [vmem:[#allocation23_spill] sm:$0xff] %v6453_v43  ;;  %v6472_v8 = vld [vmem:[%s7878_s2 + $0xe0] sm:$0xff] }
 0x35e   :  { %1782 = vmatpush.msra.mxu0 %v8661_v59  ;;  %8665 = vst [vmem:[#allocation58_spill] sm:$0xff] %v6460_v15  ;;  %v6466_v59 = vld [vmem:[%s7878_s2 + $0xf8] sm:$0xff] }
 0x35f   :  { %8666 = vst [vmem:[#allocation2_spill] sm:$0xff] %v6466_v59 }
 0x360   :  { %1783 = vmatpush.msra.mxu0 %v8664_v4  ;;  %8667 = vst [vmem:[#allocation61_spill] sm:$0xff] %v6472_v8  ;;  %v6478_v4 = vld [vmem:[%s7878_s2 + $0xc8] sm:$0xff] }
 0x361   :  { %8668 = vst [vmem:[#allocation94_spill] sm:$0xff] %v6478_v4 }
 0x362   :  { %1784 = vmatpush.msra.mxu0 %v6460_v15  ;;  %v6484_v15 = vld [vmem:[%s7878_s2 + $0xb0] sm:$0xff] }
 0x363   :  { %8669 = vst [vmem:[#allocation95_spill] sm:$0xff] %v6484_v15 }
 0x364   :  { %1785 = vmatpush.msra.mxu0 %v6466_v59  ;;  %v6490_v59 = vld [vmem:[%s7878_s2 + $0x98] sm:$0xff] }
 0x365   :  { %8670 = vst [vmem:[#allocation96_spill] sm:$0xff] %v6490_v59 }
 0x366   :  { %1786 = vmatpush.msra.mxu0 %v6472_v8  ;;  %v6496_v8 = vld [vmem:[%s7878_s2 + $0x80] sm:$0xff] }
 0x367   :  { %8671 = vst [vmem:[#allocation97_spill] sm:$0xff] %v6496_v8 }
 0x368   :  { %1787 = vmatpush.msra.mxu0 %v6478_v4  ;;  %v6502_v4 = vld [vmem:[%s7878_s2 + $0x68] sm:$0xff] }
 0x369   :  { %8672 = vst [vmem:[#allocation98_spill] sm:$0xff] %v6502_v4 }
 0x36a   :  { %1788 = vmatpush.msra.mxu0 %v6484_v15  ;;  %v6508_v15 = vld [vmem:[%s7878_s2 + $0x50] sm:$0xff] }
 0x36b   :  { %8673 = vst [vmem:[#allocation99_spill] sm:$0xff] %v6508_v15 }
 0x36c   :  { %1789 = vmatpush.msra.mxu0 %v6490_v59  ;;  %v6514_v59 = vld [vmem:[%s7878_s2 + $0x38] sm:$0xff] }
 0x36d   :  { %8674 = vst [vmem:[#allocation100_spill] sm:$0xff] %v6514_v59 }
 0x36e   :  { %1790 = vmatpush.msra.mxu0 %v6496_v8  ;;  %v6520_v8 = vld [vmem:[%s7878_s2 + $0x20] sm:$0xff] }
 0x36f   :  { %8675 = vst [vmem:[#allocation101_spill] sm:$0xff] %v6520_v8 }
 0x370   :  { %1791 = vmatpush.msra.mxu0 %v6502_v4  ;;  %v6526_v4 = vld [vmem:[%s7878_s2 + $0x8] sm:$0xff] }
 0x371   :  { %8676 = vst [vmem:[#allocation102_spill] sm:$0xff] %v6526_v4 }
 0x372   :  { %1792 = vmatpush.msra.mxu0 %v6508_v15 }
 0x374   :  { %1793 = vmatpush.msra.mxu0 %v6514_v59 }
 0x376   :  { %1794 = vmatpush.msra.mxu0 %v6520_v8 }
 0x378   :  { %1795 = vmatpush.msra.mxu0 %v6526_v4 }
 0x38c   :  { %v1333_v15 = vpop.f32.mrf.mxu0  ;;  %v1353_v31 = vpop.f32.mrf.mxu1 }
 0x38d   :  { %v1334_v43 = vadd.f32 %v1333_v15, %v8677_v48  ;;  %v1354_v34 = vadd.f32 %v1353_v31, %v8678_v29 }
 0x390   :  { %v1393_v60 = vpop.f32.mrf.mxu3 }
 0x391   :  { %v1436_v59 = vadd.f32 %v1393_v60, %v1334_v43 }
 0x393   :  { %v2720_v14 = vmul.f32 -1.442695, %v1436_v59  ;;  %v1373_v21 = vpop.f32.mrf.mxu2 }
 0x394   :  { %v1413_v61 = vpop.f32.mrf.mxu0 }
 0x395   :  { %2813 = vpow2.f32 %v2720_v14  ;;  %v1456_v8 = vadd.f32 %v1413_v61, %v1354_v34 }
 0x397   :  { %v2721_v1 = vmul.f32 -1.442695, %v1456_v8 }
 0x398   :  { %v1521_v33 = vpop.f32.mrf.mxu3 }
 0x399   :  { %2815 = vpow2.f32 %v2721_v1  ;;  %v1564_v4 = vadd.f32 %v1521_v33, %v168_v23 }
 0x39b   :  { %v2814_v2 = vpop.eup %2813  ;;  %v2723_v36 = vmul.f32 -1.442695, %v1564_v4  ;;  %v1501_v15 = vpop.f32.mrf.mxu2 }
 0x39c   :  { %v1440_v48 = vadd.f32 1.0, %v2814_v2  ;;  %v1544_v60 = vadd.f32 %v1501_v15, %v8681_v51  ;;  %v1433_v15 = vpop.f32.mrf.mxu1 }
 0x39d   :  { %2817 = vpow2.f32 %v2723_v36 }
 0x39e   :  { %2819 = vrcp.f32 %v1440_v48  ;;  %v2722_v43 = vmul.f32 -1.442695, %v1544_v60  ;;  %v1452_v2 = vand.u32 2147483648, %v1440_v48  ;;  %v1450_v4 = vand.u32 2147483647, %v1440_v48 }
 0x39f   :  { %v2816_v31 = vpop.eup %2815  ;;  %vm1446_vm10 = vweird.f32 %v1440_v48 }
 0x3a0   :  { %v1460_v59 = vadd.f32 1.0, %v2816_v31  ;;  %2821 = vpow2.f32 %v2722_v43  ;;  %vm1451_vm12 = vcmp.eq.f32.partialorder %v1450_v4, 8.507059e+37 }
 0x3a2   :  { %2823 = vrcp.f32 %v1460_v59  ;;  %vm1466_vm14 = vweird.f32 %v1460_v59  ;;  %v1470_v17 = vand.u32 2147483647, %v1460_v59 }
 0x3a3   :  { %v2818_v61 = vpop.eup %2817 }
 0x3a4   :  { %v2820_v14 = vpop.eup %2819  ;;  %v6534_v18 = vadd.f32 1.0, %v2818_v61  ;;  %v1453_v61 = vor.u32 1.1754944e-38, %v1452_v2  ;;  %vm1471_vm0 = vcmp.eq.f32.partialorder %v1470_v17, 8.507059e+37  ;;  %v6548_v17 = vld [vmem:[%s7880_s4] ss:$0 sm:$0xff] }
 0x3a5   :  { %v1442_v34 = vmul.f32 %v2820_v14, %v1440_v48  ;;  %vm1447_vm9 = vweird.f32 %v2820_v14 }
 0x3a6   :  { %2825 = vrcp.f32 %v6534_v18  ;;  %v2822_v33 = vpop.eup %2821  ;;  %vm1448_vm11 = vmor %vm1446_vm10, %vm1447_vm9  ;;  %vm1574_vm6 = vweird.f32 %v6534_v18 }
 0x3a7   :  { %v1443_v1 = vsub.f32 1.0, %v1442_v34  ;;  %v1548_v8 = vadd.f32 1.0, %v2822_v33  ;;  %v8682_v34 = vld [vmem:[#allocation52_spill] sm:$0xff] }
 0x3a8   :  { %v2824_v23 = vpop.eup %2823  ;;  %v1476_v32 = vadd.f32 %v8682_v34, %v1433_v15 }
 0x3a9   :  { %v1462_v51 = vmul.f32 %v2824_v23, %v1460_v59  ;;  %v1444_v36 = vmul.f32 %v2820_v14, %v1443_v1  ;;  %2827 = vrcp.f32 %v1548_v8  ;;  %vm1467_vm13 = vweird.f32 %v2824_v23  ;;  %v8683_v1 = vld [vmem:[#allocation8_spill] sm:$0xff] }
 0x3aa   :  { %v1374_v49 = vadd.f32 %v1373_v21, %v8683_v1  ;;  %vm1468_vm15 = vmor %vm1466_vm14, %vm1467_vm13  ;;  %vm1554_vm2 = vweird.f32 %v1548_v8 }
 0x3ab   :  { %v1463_v60 = vsub.f32 1.0, %v1462_v51  ;;  %v1445_v31 = vadd.f32 %v2820_v14, %v1444_v36  ;;  %v1472_v36 = vand.u32 2147483648, %v1460_v59 }
 0x3ac   :  { %v6537_v43 = vpop.eup %2825 }
 0x3ad   :  { %v1464_v29 = vmul.f32 %v2824_v23, %v1463_v60  ;;  %v1449_v38 = vsel %vm1448_vm11, %v2820_v14, %v1445_v31  ;;  %v1570_v33 = vmul.f32 %v6537_v43, %v6534_v18  ;;  %v1560_v60 = vand.u32 2147483648, %v1548_v8 }
 0x3ae   :  { %v1454_v63 = vsel %vm1451_vm12, %v1453_v61, %v1449_v38  ;;  %v1473_v38 = vor.u32 1.1754944e-38, %v1472_v36  ;;  %v1558_v61 = vand.u32 2147483647, %v1548_v8  ;;  %vm1575_vm4 = vweird.f32 %v6537_v43  ;;  %v8684_v36 = vld [vmem:[#allocation92_spill] sm:$0xff] }
 0x3af   :  { %v1477_v3 = vmul.f32 %v1476_v32, %v1454_v63  ;;  %v1465_v51 = vadd.f32 %v2824_v23, %v1464_v29  ;;  %v2828_v48 = vpop.eup %2827  ;;  %v1571_v14 = vsub.f32 1.0, %v1570_v33  ;;  %v1541_v32 = vpop.f32.mrf.mxu0  ;;  %vm1576_vm7 = vmor %vm1574_vm6, %vm1575_vm4 }
 0x3b0   :  { %v1550_v2 = vmul.f32 %v2828_v48, %v1548_v8  ;;  %vm1555_vm1 = vweird.f32 %v2828_v48  ;;  %vm1559_vm5 = vcmp.eq.f32.partialorder %v1558_v61, 8.507059e+37 }
 0x3b1   :  { %v1478_v47 = vadd.f32 %v1477_v3, %v1374_v49  ;;  %v1469_v4 = vsel %vm1468_vm15, %v2824_v23, %v1465_v51  ;;  %v1572_v63 = vmul.f32 %v6537_v43, %v1571_v14  ;;  %vm1556_vm3 = vmor %vm1554_vm2, %vm1555_vm1  ;;  %v1561_v3 = vor.u32 1.1754944e-38, %v1560_v60 }
 0x3b2   :  { %v1551_v15 = vsub.f32 1.0, %v1550_v2  ;;  %v1474_v21 = vsel %vm1471_vm0, %v1473_v38, %v1469_v4  ;;  %v1584_v23 = vadd.f32 %v6548_v17, %v1541_v32  ;;  %v8685_v2 = vld [vmem:[#allocation4_spill] sm:$0xff]  ;;  %v1580_v4 = vand.u32 2147483648, %v6534_v18 }
 0x3b3   :  { %2829 = vtanh.f32 %v1478_v47  ;;  %v1480_v49 = vsub.f32 1.0, %v1474_v21  ;;  %v1573_v34 = vadd.f32 %v6537_v43, %v1572_v63  ;;  %v1482_v8 = vmul.f32 %v1474_v21, %v5832_v35 }
 0x3b4   :  { %v1552_v31 = vmul.f32 %v2828_v48, %v1551_v15  ;;  %v209_v14 = vadd.f32 %v8685_v2, %v8684_v36  ;;  %v1578_v15 = vand.u32 2147483647, %v6534_v18  ;;  %v1581_v35 = vor.u32 1.1754944e-38, %v1580_v4  ;;  %v8709_v2 = vld [vmem:[#allocation34_spill] sm:$0xff]  ;;  %v8710_v4 = vld [vmem:[#allocation89_spill] sm:$0xff] }
 0x3b6   :  { %v1553_v29 = vadd.f32 %v2828_v48, %v1552_v31  ;;  %v1577_v31 = vsel %vm1576_vm7, %v6537_v43, %v1573_v34  ;;  %vm1579_vm8 = vcmp.eq.f32.partialorder %v1578_v15, 8.507059e+37  ;;  %v8706_v34 = vld [vmem:[#allocation67_spill] sm:$0xff]  ;;  %v8712_v15 = vld [vmem:[#allocation37_spill] sm:$0xff] }
 0x3b7   :  { %v1582_v61 = vsel %vm1579_vm8, %v1581_v35, %v1577_v31  ;;  %v8713_v31 = vld [vmem:[#allocation90_spill] sm:$0xff]  ;;  %v8714_v35 = vld [vmem:[#allocation71_spill] sm:$0xff] }
 0x3b8   :  { %v1557_v47 = vsel %vm1556_vm3, %v2828_v48, %v1553_v29  ;;  %v1588_v18 = vsub.f32 1.0, %v1582_v61  ;;  %v1590_v32 = vmul.f32 %v1582_v61, %v5834_v58  ;;  %v6602_v58 = vld [vmem:[%s7881_s5 + $0x110] sm:$0xff] }
 0x3b9   :  { %v2830_v59 = vpop.eup %2829  ;;  %v1562_v33 = vsel %vm1559_vm5, %v1561_v3, %v1557_v47  ;;  %v8702_v29 = vld [vmem:[#allocation64_spill] sm:$0xff]  ;;  %v6683_v3 = vld [vmem:[%s7881_s5 + $0x38] sm:$0xff]  ;;  %v8705_v47 = vld [vmem:[#allocation30_spill] sm:$0xff] }
 0x3ba   :  { %v1481_v51 = vmul.f32 %v2830_v59, %v1480_v49  ;;  %v1585_v48 = vmul.f32 %v1584_v23, %v1562_v33  ;;  %v8703_v49 = vld [vmem:[#allocation28_spill] sm:$0xff]  ;;  %v6693_v23 = vld [vmem:[%s7881_s5 + $0x20] sm:$0xff] }
 0x3bb   :  { %v8704_v59 = vld [vmem:[#allocation12_spill] sm:$0xff] }
 0x3bc   :  { %v6558_v38 = vadd.f32 %v1482_v8, %v1481_v51  ;;  %v1586_v60 = vadd.f32 %v1585_v48, %v209_v14  ;;  %v8707_v33 = vld [vmem:[#allocation32_spill] sm:$0xff]  ;;  %v8708_v51 = vld [vmem:[#allocation69_spill] sm:$0xff]  ;;  %v6702_v8 = vld [vmem:[%s7881_s5 + $0x8] sm:$0xff] }
 0x3bd   :  { %v6709_v14 = vld [vmem:[%s7882_s6 + $0x178] sm:$0xff]  ;;  %v8711_v48 = vld [vmem:[#allocation70_spill] sm:$0xff]  ;;  %v8715_v61 = vld [vmem:[#allocation40_spill] sm:$0xff] }
 0x3be   :  { %1668 = vmatmul.f32.vlgmr.msrb.gmra.mxu0 %v6558_v38  ;;  %2831 = vtanh.f32 %v1586_v60  ;;  %v6718_v60 = vld [vmem:[%s7882_s6 + $0x160] sm:$0xff] }
 0x3bf   :  { %1908 = vmatpush.msrb.mxu0 %v5840_v7  ;;  %v6611_v7 = vld [vmem:[%s7881_s5 + $0xf8] sm:$0xff] }
 0x3c1   :  { %1909 = vmatpush.msrb.mxu0 %v5873_v13  ;;  %v6638_v13 = vld [vmem:[%s7881_s5 + $0xb0] sm:$0xff] }
 0x3c3   :  { %1910 = vmatpush.msrb.mxu0 %v5897_v9  ;;  %v6647_v9 = vld [vmem:[%s7881_s5 + $0x98] sm:$0xff] }
 0x3c4   :  { %v2832_v21 = vpop.eup %2831 }
 0x3c5   :  { %1911 = vmatpush.msrb.mxu0 %v5949_v46  ;;  %v1589_v63 = vmul.f32 %v2832_v21, %v1588_v18  ;;  %v6727_v18 = vld [vmem:[%s7882_s6 + $0x148] sm:$0xff] }
 0x3c6   :  { %v8716_v21 = vld [vmem:[#allocation91_spill] sm:$0xff] }
 0x3c7   :  { %1912 = vmatpush.msrb.mxu0 %v5968_v57  ;;  %v6570_v43 = vadd.f32 %v1590_v32, %v1589_v63  ;;  %v8717_v63 = vld [vmem:[#allocation73_spill] sm:$0xff]  ;;  %v8718_v32 = vld [vmem:[#allocation42_spill] sm:$0xff] }
 0x3c9   :  { %1913 = vmatpush.msrb.mxu0 %v5987_v42  ;;  %1608 = vmatmul.f32.vlgmr.msra.gmra.mxu1 %v6570_v43 }
 0x3ca   :  { %1628 = vmatmul.f32.vlgmr.msra.gmra.mxu2 %v6570_v43  ;;  %1648 = vmatmul.f32.vlgmr.msrb.gmra.mxu3 %v6570_v43 }
 0x3cb   :  { %1796 = vmatmul.f32.vlgmr.msra.gmra.mxu0 %v6570_v43  ;;  %1800 = vmatpush.msra.mxu1 %v5849_v37  ;;  %v6620_v37 = vld [vmem:[%s7881_s5 + $0xe0] sm:$0xff] }
 0x3cc   :  { %1868 = vmatpush.msra.mxu2 %v5855_v25  ;;  %1888 = vmatpush.msrb.mxu3 %v5861_v62  ;;  %v6629_v25 = vld [vmem:[%s7881_s5 + $0xc8] sm:$0xff]  ;;  %v8686_v62 = vld [vmem:[#allocation48_spill] sm:$0xff] }
 0x3cd   :  { %1914 = vmatpush.msrb.mxu0 %v6006_v5  ;;  %1801 = vmatpush.msra.mxu1 %v5867_v0  ;;  %v8687_v0 = vld [vmem:[#allocation78_spill] sm:$0xff] }
 0x3ce   :  { %1869 = vmatpush.msra.mxu2 %v5879_v52  ;;  %1889 = vmatpush.msrb.mxu3 %v5885_v55  ;;  %v8688_v52 = vld [vmem:[#allocation29_spill] sm:$0xff]  ;;  %v8689_v55 = vld [vmem:[#allocation54_spill] sm:$0xff] }
 0x3cf   :  { %1915 = vmatpush.msrb.mxu0 %v6025_v11  ;;  %1802 = vmatpush.msra.mxu1 %v5891_v41  ;;  %v8690_v41 = vld [vmem:[#allocation74_spill] sm:$0xff] }
 0x3d0   :  { %1870 = vmatpush.msra.mxu2 %v5904_v44  ;;  %1890 = vmatpush.msrb.mxu3 %v5916_v6  ;;  %v8691_v44 = vld [vmem:[#allocation38_spill] sm:$0xff]  ;;  %v8693_v6 = vld [vmem:[#allocation57_spill] sm:$0xff] }
 0x3d1   :  { %1916 = vmatpush.msrb.mxu0 %v6044_v10  ;;  %1803 = vmatpush.msra.mxu1 %v5910_v27  ;;  %v8692_v27 = vld [vmem:[#allocation81_spill] sm:$0xff] }
 0x3d2   :  { %1708 = vmatmul.f32.vlgmr.msrb.gmra.mxu2 %v6558_v38  ;;  %1688 = vmatmul.f32.vlgmr.msrb.gmra.mxu1 %v6558_v38 }
 0x3d3   :  { %1776 = vmatmul.f32.vlgmr.msra.gmra.mxu3 %v6570_v43  ;;  %1804 = vmatpush.msra.mxu1 %v5925_v53  ;;  %v6656_v53 = vld [vmem:[%s7881_s5 + $0x80] sm:$0xff] }
 0x3d4   :  { %1871 = vmatpush.msra.mxu2 %v5931_v22  ;;  %1891 = vmatpush.msrb.mxu3 %v5937_v24  ;;  %v8694_v22 = vld [vmem:[#allocation14_spill] sm:$0xff] }
 0x3d5   :  { %1917 = vmatpush.msrb.mxu0 %v6063_v19  ;;  %1805 = vmatpush.msra.mxu1 %v5943_v20  ;;  %v8695_v24 = vld [vmem:[#allocation10_spill] sm:$0xff]  ;;  %v8696_v20 = vld [vmem:[#allocation60_spill] sm:$0xff] }
 0x3d6   :  { %1872 = vmatpush.msra.mxu2 %v5955_v54  ;;  %1892 = vmatpush.msrb.mxu3 %v6602_v58  ;;  %v6665_v54 = vld [vmem:[%s7881_s5 + $0x68] sm:$0xff] }
 0x3d7   :  { %1918 = vmatpush.msrb.mxu0 %v6082_v30  ;;  %1806 = vmatpush.msra.mxu1 %v5962_v16  ;;  %v8697_v16 = vld [vmem:[#allocation25_spill] sm:$0xff] }
 0x3d8   :  { %1873 = vmatpush.msra.mxu2 %v5974_v56  ;;  %1893 = vmatpush.msrb.mxu3 %v6611_v7  ;;  %v8698_v56 = vld [vmem:[#allocation26_spill] sm:$0xff] }
 0x3d9   :  { %1919 = vmatpush.msrb.mxu0 %v6101_v40  ;;  %1807 = vmatpush.msra.mxu1 %v5981_v50  ;;  %v8699_v50 = vld [vmem:[#allocation50_spill] sm:$0xff] }
 0x3da   :  { %1874 = vmatpush.msra.mxu2 %v5993_v39  ;;  %1894 = vmatpush.msrb.mxu3 %v6620_v37  ;;  %v6674_v39 = vld [vmem:[%s7881_s5 + $0x50] sm:$0xff] }
 0x3db   :  { %1920 = vmatpush.msrb.mxu0 %v6120_v12  ;;  %1808 = vmatpush.msra.mxu1 %v6000_v45  ;;  %v8700_v45 = vld [vmem:[#allocation84_spill] sm:$0xff] }
 0x3dc   :  { %1875 = vmatpush.msra.mxu2 %v6012_v26  ;;  %1895 = vmatpush.msrb.mxu3 %v6629_v25  ;;  %v8701_v26 = vld [vmem:[#allocation62_spill] sm:$0xff] }
 0x3dd   :  { %1921 = vmatpush.msrb.mxu0 %v6139_v28  ;;  %1809 = vmatpush.msra.mxu1 %v8686_v62  ;;  %v6736_v62 = vld [vmem:[%s7882_s6 + $0x130] sm:$0xff] }
 0x3de   :  { %1876 = vmatpush.msra.mxu2 %v8687_v0  ;;  %1896 = vmatpush.msrb.mxu3 %v6638_v13  ;;  %v8719_v0 = vld [vmem:[#allocation75_spill] sm:$0xff] }
 0x3df   :  { %1922 = vmatpush.msrb.mxu0 %v8688_v52  ;;  %1810 = vmatpush.msra.mxu1 %v8689_v55  ;;  %v8720_v52 = vld [vmem:[#allocation44_spill] sm:$0xff]  ;;  %v8721_v55 = vld [vmem:[#allocation77_spill] sm:$0xff] }
 0x3e0   :  { %1877 = vmatpush.msra.mxu2 %v8690_v41  ;;  %1897 = vmatpush.msrb.mxu3 %v6647_v9  ;;  %v6745_v41 = vld [vmem:[%s7882_s6 + $0x118] sm:$0xff] }
 0x3e1   :  { %1923 = vmatpush.msrb.mxu0 %v8691_v44  ;;  %1811 = vmatpush.msra.mxu1 %v8692_v27  ;;  %v8722_v44 = vld [vmem:[#allocation46_spill] sm:$0xff]  ;;  %v8723_v27 = vld [vmem:[#allocation80_spill] sm:$0xff] }
 0x3e2   :  { %1878 = vmatpush.msra.mxu2 %v8693_v6  ;;  %1898 = vmatpush.msrb.mxu3 %v6656_v53  ;;  %v8724_v6 = vld [vmem:[#allocation49_spill] sm:$0xff] }
 0x3e3   :  { %2036 = vmatpush.msra.mxu0 %v8694_v22  ;;  %1812 = vmatpush.msra.mxu1 %v8695_v24  ;;  %v6754_v24 = vld [vmem:[%s7882_s6 + $0x100] sm:$0xff] }
 0x3e4   :  { %1879 = vmatpush.msra.mxu2 %v8696_v20  ;;  %1899 = vmatpush.msrb.mxu3 %v6665_v54  ;;  %v8725_v20 = vld [vmem:[#allocation83_spill] sm:$0xff] }
 0x3e5   :  { %2037 = vmatpush.msra.mxu0 %v8697_v16  ;;  %1813 = vmatpush.msra.mxu1 %v8698_v56  ;;  %v8726_v56 = vld [vmem:[#allocation51_spill] sm:$0xff] }
 0x3e6   :  { %1880 = vmatpush.msra.mxu2 %v8699_v50  ;;  %1900 = vmatpush.msrb.mxu3 %v6674_v39  ;;  %v8727_v50 = vld [vmem:[#allocation85_spill] sm:$0xff] }
 0x3e7   :  { %2038 = vmatpush.msra.mxu0 %v8700_v45  ;;  %1814 = vmatpush.msra.mxu1 %v8701_v26  ;;  %v6763_v26 = vld [vmem:[%s7882_s6 + $0xe8] sm:$0xff] }
 0x3e8   :  { %1881 = vmatpush.msra.mxu2 %v8702_v29  ;;  %1901 = vmatpush.msrb.mxu3 %v6683_v3  ;;  %v8728_v29 = vld [vmem:[#allocation53_spill] sm:$0xff] }
 0x3e9   :  { %2039 = vmatpush.msra.mxu0 %v8703_v49  ;;  %1815 = vmatpush.msra.mxu1 %v8704_v59  ;;  %v8729_v59 = vld [vmem:[#allocation86_spill] sm:$0xff] }
 0x3ea   :  { %1882 = vmatpush.msra.mxu2 %v8705_v47  ;;  %1816 = vmatmul.f32.vlgmr.msra.gmra.mxu1 %v6570_v43  ;;  %v8730_v47 = vld [vmem:[#allocation56_spill] sm:$0xff] }
 0x3eb   :  { %1902 = vmatpush.msrb.mxu3 %v6693_v23  ;;  %1928 = vmatpush.msrb.mxu1 %v8706_v34  ;;  %v6772_v34 = vld [vmem:[%s7882_s6 + $0xd0] sm:$0xff] }
 0x3ec   :  { %1883 = vmatpush.msra.mxu2 %v8707_v33  ;;  %2040 = vmatpush.msra.mxu0 %v8711_v48  ;;  %8731 = vst [vmem:[#allocation3_spill] sm:$0xff] %v6772_v34  ;;  %v8732_v33 = vld [vmem:[#allocation87_spill] sm:$0xff] }
 0x3ed   :  { %1903 = vmatpush.msrb.mxu3 %v6702_v8  ;;  %1929 = vmatpush.msrb.mxu1 %v8709_v2  ;;  %v8734_v2 = vld [vmem:[#allocation88_spill] sm:$0xff] }
 0x3ee   :  { %1948 = vmatpush.msrb.mxu2 %v8708_v51  ;;  %2041 = vmatpush.msra.mxu0 %v8714_v35  ;;  %v8733_v51 = vld [vmem:[#allocation59_spill] sm:$0xff] }
 0x3ef   :  { %1968 = vmatpush.msra.mxu3 %v6709_v14  ;;  %1930 = vmatpush.msrb.mxu1 %v8712_v15  ;;  %v8736_v15 = vld [vmem:[#allocation11_spill] sm:$0xff] }
 0x3f0   :  { %1949 = vmatpush.msrb.mxu2 %v8710_v4  ;;  %2042 = vmatpush.msra.mxu0 %v8717_v63  ;;  %v6781_v4 = vld [vmem:[%s7882_s6 + $0xb8] sm:$0xff]  ;;  %v8738_v35 = vld [vmem:[#allocation15_spill] sm:$0xff] }
 0x3f1   :  { %1969 = vmatpush.msra.mxu3 %v6718_v60  ;;  %1931 = vmatpush.msrb.mxu1 %v8715_v61  ;;  %8735 = vst [vmem:[#allocation47_spill] sm:$0xff] %v6781_v4  ;;  %v6790_v61 = vld [vmem:[%s7882_s6 + $0xa0] sm:$0xff]  ;;  %v8741_v63 = vld [vmem:[#allocation17_spill] sm:$0xff] }
 0x3f2   :  { %1950 = vmatpush.msrb.mxu2 %v8713_v31  ;;  %2043 = vmatpush.msra.mxu0 %v8720_v52  ;;  %v8737_v31 = vld [vmem:[#allocation13_spill] sm:$0xff]  ;;  %8739 = vst [vmem:[#allocation33_spill] sm:$0xff] %v6790_v61  ;;  %v8744_v52 = vld [vmem:[#allocation19_spill] sm:$0xff] }
 0x3f3   :  { %1970 = vmatpush.msra.mxu3 %v6727_v18  ;;  %1932 = vmatpush.msrb.mxu1 %v8718_v32  ;;  %v8742_v32 = vld [vmem:[#allocation18_spill] sm:$0xff] }
 0x3f4   :  { %1951 = vmatpush.msrb.mxu2 %v8716_v21  ;;  %2044 = vmatpush.msra.mxu0 %v8723_v27  ;;  %v8740_v21 = vld [vmem:[#allocation16_spill] sm:$0xff] }
 0x3f5   :  { %1971 = vmatpush.msra.mxu3 %v6736_v62  ;;  %1933 = vmatpush.msrb.mxu1 %v8721_v55  ;;  %v8745_v55 = vld [vmem:[#allocation20_spill] sm:$0xff] }
 0x3f6   :  { %1952 = vmatpush.msrb.mxu2 %v8719_v0  ;;  %2045 = vmatpush.msra.mxu0 %v8726_v56  ;;  %v6799_v0 = vld [vmem:[%s7882_s6 + $0x88] sm:$0xff]  ;;  %v6808_v27 = vld [vmem:[%s7882_s6 + $0x70] sm:$0xff] }
 0x3f7   :  { %1972 = vmatpush.msra.mxu3 %v6745_v41  ;;  %1934 = vmatpush.msrb.mxu1 %v8724_v6  ;;  %8743 = vst [vmem:[#allocation43_spill] sm:$0xff] %v6799_v0  ;;  %v8748_v6 = vld [vmem:[#allocation22_spill] sm:$0xff]  ;;  %v8750_v56 = vld [vmem:[#allocation24_spill] sm:$0xff] }
 0x3f8   :  { %1953 = vmatpush.msrb.mxu2 %v8722_v44  ;;  %2046 = vmatpush.msra.mxu0 %v8729_v59  ;;  %v8746_v44 = vld [vmem:[#allocation21_spill] sm:$0xff]  ;;  %8747 = vst [vmem:[#allocation31_spill] sm:$0xff] %v6808_v27  ;;  %v8753_v59 = vld [vmem:[#allocation27_spill] sm:$0xff] }
 0x3f9   :  { %1973 = vmatpush.msra.mxu3 %v6754_v24  ;;  %1935 = vmatpush.msrb.mxu1 %v8727_v50  ;;  %v6817_v50 = vld [vmem:[%s7882_s6 + $0x58] sm:$0xff] }
 0x3fa   :  { %1954 = vmatpush.msrb.mxu2 %v8725_v20  ;;  %2047 = vmatpush.msra.mxu0 %v8733_v51  ;;  %v8749_v20 = vld [vmem:[#allocation23_spill] sm:$0xff]  ;;  %8751 = vst [vmem:[#allocation76_spill] sm:$0xff] %v6817_v50  ;;  %v8756_v51 = vld [vmem:[#allocation93_spill] sm:$0xff] }
 0x3fb   :  { %1974 = vmatpush.msra.mxu3 %v6763_v26  ;;  %1936 = vmatpush.msrb.mxu1 %v8730_v47  ;;  %v6825_v47 = vld [vmem:[%s7882_s6 + $0x40] sm:$0xff] }
 0x3fc   :  { %1955 = vmatpush.msrb.mxu2 %v8728_v29  ;;  %2048 = vmatpush.msra.mxu0 %v8737_v31  ;;  %v8752_v29 = vld [vmem:[#allocation35_spill] sm:$0xff]  ;;  %8754 = vst [vmem:[#allocation45_spill] sm:$0xff] %v6825_v47 }
 0x3fd   :  { %1975 = vmatpush.msra.mxu3 %v6772_v34  ;;  %1937 = vmatpush.msrb.mxu1 %v8734_v2  ;;  %v6838_v2 = vld [vmem:[%s7882_s6 + $0x28] sm:$0xff] }
 0x3fe   :  { %1956 = vmatpush.msrb.mxu2 %v8732_v33  ;;  %2049 = vmatpush.msra.mxu0 %v8741_v63  ;;  %v6831_v33 = vld [vmem:[%s7882_s6 + $0x20] sm:$0xff]  ;;  %8757 = vst [vmem:[#allocation63_spill] sm:$0xff] %v6838_v2  ;;  %v6850_v31 = vld [vmem:[%s7882_s6 + $0x8] sm:$0xff] }
 0x3ff   :  { %1976 = vmatpush.msra.mxu3 %v6781_v4  ;;  %1938 = vmatpush.msrb.mxu1 %v8738_v35  ;;  %8755 = vst [vmem:[#allocation9_spill] sm:$0xff] %v6831_v33  ;;  %v6856_v35 = vld [vmem:[%s7882_s6 + $0x10] sm:$0xff]  ;;  %v6868_v63 = vld [vmem:[%s7878_s2 + $0x140] sm:$0xff] }
 0x400   :  { %1957 = vmatpush.msrb.mxu2 %v8736_v15  ;;  %2050 = vmatpush.msra.mxu0 %v8745_v55  ;;  %v6844_v15 = vld [vmem:[%s7878_s2 + $0x170] sm:$0xff]  ;;  %8759 = vst [vmem:[#allocation52_spill] sm:$0xff] %v6850_v31  ;;  %v8765_v55 = vld [vmem:[#allocation2_spill] sm:$0xff] }
 0x401   :  { %1977 = vmatpush.msra.mxu3 %v6790_v61  ;;  %1939 = vmatpush.msrb.mxu1 %v8742_v32  ;;  %8758 = vst [vmem:[#allocation55_spill] sm:$0xff] %v6844_v15  ;;  %v6874_v32 = vld [vmem:[%s7878_s2 + $0x128] sm:$0xff] }
 0x402   :  { %1958 = vmatpush.msrb.mxu2 %v8740_v21  ;;  %2051 = vmatpush.msra.mxu0 %v8749_v20  ;;  %8760 = vst [vmem:[#allocation92_spill] sm:$0xff] %v6856_v35  ;;  %v6862_v21 = vld [vmem:[%s7878_s2 + $0x158] sm:$0xff]  ;;  %v8768_v20 = vld [vmem:[#allocation95_spill] sm:$0xff] }
 0x403   :  { %1978 = vmatpush.msra.mxu3 %v6799_v0  ;;  %1940 = vmatpush.msrb.mxu1 %v8746_v44  ;;  %8761 = vst [vmem:[#allocation4_spill] sm:$0xff] %v6862_v21  ;;  %v8766_v44 = vld [vmem:[#allocation61_spill] sm:$0xff] }
 0x404   :  { %1959 = vmatpush.msrb.mxu2 %v8744_v52  ;;  %8762 = vst [vmem:[#allocation48_spill] sm:$0xff] %v6868_v63  ;;  %v8764_v52 = vld [vmem:[#allocation58_spill] sm:$0xff] }
 0x405   :  { %1979 = vmatpush.msra.mxu3 %v6808_v27  ;;  %1941 = vmatpush.msrb.mxu1 %v8750_v56  ;;  %8763 = vst [vmem:[#allocation78_spill] sm:$0xff] %v6874_v32  ;;  %v8769_v56 = vld [vmem:[#allocation96_spill] sm:$0xff] }
 0x406   :  { %1960 = vmatpush.msrb.mxu2 %v8748_v6  ;;  %v8767_v6 = vld [vmem:[#allocation94_spill] sm:$0xff] }
 0x407   :  { %1980 = vmatpush.msra.mxu3 %v6817_v50  ;;  %1942 = vmatpush.msrb.mxu1 %v8753_v59  ;;  %v8771_v59 = vld [vmem:[#allocation98_spill] sm:$0xff] }
 0x408   :  { %1961 = vmatpush.msrb.mxu2 %v8752_v29  ;;  %v8770_v29 = vld [vmem:[#allocation97_spill] sm:$0xff] }
 0x409   :  { %1981 = vmatpush.msra.mxu3 %v6825_v47  ;;  %1943 = vmatpush.msrb.mxu1 %v8756_v51  ;;  %v8772_v51 = vld [vmem:[#allocation99_spill] sm:$0xff] }
 0x40a   :  { %1962 = vmatpush.msrb.mxu2 %v6831_v33 }
 0x40b   :  { %1982 = vmatpush.msra.mxu3 %v6838_v2  ;;  %2056 = vmatpush.msra.mxu1 %v6844_v15 }
 0x40c   :  { %1963 = vmatpush.msrb.mxu2 %v6850_v31  ;;  %v8778_v31 = vld [vmem:[#allocation36_spill] sm:$0xff] }
 0x40d   :  { %1983 = vmatpush.msra.mxu3 %v6856_v35  ;;  %2057 = vmatpush.msra.mxu1 %v6862_v21  ;;  %v8776_v21 = vld [vmem:[#allocation41_spill] sm:$0xff] }
 0x40f   :  { %2058 = vmatpush.msra.mxu1 %v6868_v63  ;;  %v8773_v63 = vld [vmem:[#allocation100_spill] sm:$0xff] }
 0x411   :  { %2059 = vmatpush.msra.mxu1 %v6874_v32  ;;  %v8774_v32 = vld [vmem:[#allocation101_spill] sm:$0xff] }
 0x413   :  { %2060 = vmatpush.msra.mxu1 %v8764_v52  ;;  %v8775_v52 = vld [vmem:[#allocation102_spill] sm:$0xff] }
 0x415   :  { %2061 = vmatpush.msra.mxu1 %v8765_v55 }
 0x417   :  { %2062 = vmatpush.msra.mxu1 %v8766_v44 }
 0x419   :  { %2063 = vmatpush.msra.mxu1 %v8767_v6 }
 0x41b   :  { %2064 = vmatpush.msra.mxu1 %v8768_v20  ;;  %v8777_v20 = vld [vmem:[#allocation79_spill] sm:$0xff] }
 0x41d   :  { %2065 = vmatpush.msra.mxu1 %v8769_v56  ;;  %v171_v56 = vadd.f32 %v8778_v31, %v8777_v20 }
 0x41f   :  { %2066 = vmatpush.msra.mxu1 %v8770_v29 }
 0x421   :  { %2067 = vmatpush.msra.mxu1 %v8771_v59 }
 0x423   :  { %2068 = vmatpush.msra.mxu1 %v8772_v51  ;;  %v8779_v51 = vld [vmem:[#allocation7_spill] sm:$0xff] }
 0x425   :  { %2069 = vmatpush.msra.mxu1 %v8773_v63 }
 0x427   :  { %2070 = vmatpush.msra.mxu1 %v8774_v32 }
 0x429   :  { %2071 = vmatpush.msra.mxu1 %v8775_v52 }
 0x43b   :  { %v1669_v55 = vpop.f32.mrf.mxu0 }
 0x446   :  { %v1609_v44 = vpop.f32.mrf.mxu1 }
 0x447   :  { %v1610_v6 = vadd.f32 %v1609_v44, %v8776_v21  ;;  %v8780_v21 = vld [vmem:[#allocation66_spill] sm:$0xff] }
 0x448   :  { %v1797_v35 = vpop.f32.mrf.mxu0 }
 0x449   :  { %v1712_v15 = vadd.f32 %v1669_v55, %v1610_v6  ;;  %v1840_v29 = vadd.f32 %v1797_v35, %v171_v56 }
 0x44b   :  { %v2724_v2 = vmul.f32 -1.442695, %v1712_v15  ;;  %v2727_v47 = vmul.f32 -1.442695, %v1840_v29 }
 0x44d   :  { %v1629_v59 = vpop.f32.mrf.mxu2  ;;  %2833 = vpow2.f32 %v2724_v2  ;;  %v1649_v63 = vpop.f32.mrf.mxu3 }
 0x44e   :  { %v1630_v33 = vadd.f32 %v1629_v59, %v8779_v51  ;;  %2835 = vpow2.f32 %v2727_v47 }
 0x44f   :  { %v1689_v32 = vpop.f32.mrf.mxu1 }
 0x450   :  { %v1732_v50 = vadd.f32 %v1689_v32, %v1630_v33 }
 0x452   :  { %v2725_v52 = vmul.f32 -1.442695, %v1732_v50 }
 0x453   :  { %v2834_v27 = vpop.eup %2833 }
 0x454   :  { %v1716_v0 = vadd.f32 1.0, %v2834_v27  ;;  %2837 = vpow2.f32 %v2725_v52  ;;  %v2836_v55 = vpop.eup %2835 }
 0x455   :  { %v6894_v6 = vadd.f32 1.0, %v2836_v55  ;;  %v1709_v32 = vpop.f32.mrf.mxu2 }
 0x456   :  { %v1777_v44 = vpop.f32.mrf.mxu3  ;;  %2839 = vrcp.f32 %v1716_v0  ;;  %v1728_v47 = vand.u32 2147483648, %v1716_v0  ;;  %v1726_v59 = vand.u32 2147483647, %v1716_v0  ;;  %vm1722_vm10 = vweird.f32 %v1716_v0 }
 0x457   :  { %v1820_v31 = vadd.f32 %v1777_v44, %v8780_v21  ;;  %vm1850_vm6 = vweird.f32 %v6894_v6 }
 0x458   :  { %v1729_v55 = vor.u32 1.1754944e-38, %v1728_v47  ;;  %vm1727_vm12 = vcmp.eq.f32.partialorder %v1726_v59, 8.507059e+37 }
 0x459   :  { %v2726_v35 = vmul.f32 -1.442695, %v1820_v31 }
 0x45a   :  { %v2838_v15 = vpop.eup %2837 }
 0x45b   :  { %v1736_v2 = vadd.f32 1.0, %v2838_v15  ;;  %2841 = vpow2.f32 %v2726_v35 }
 0x45c   :  { %v2840_v56 = vpop.eup %2839 }
 0x45d   :  { %2843 = vrcp.f32 %v1736_v2  ;;  %v1718_v29 = vmul.f32 %v2840_v56, %v1716_v0  ;;  %vm1723_vm9 = vweird.f32 %v2840_v56  ;;  %v1748_v20 = vand.u32 2147483648, %v1736_v2 }
 0x45e   :  { %2845 = vrcp.f32 %v6894_v6  ;;  %vm1724_vm11 = vmor %vm1722_vm10, %vm1723_vm9  ;;  %vm1742_vm14 = vweird.f32 %v1736_v2 }
 0x45f   :  { %v1719_v50 = vsub.f32 1.0, %v1718_v29  ;;  %v6902_v29 = vld [vmem:[%s7884_s8] ss:$0 sm:$0xff] }
 0x460   :  { %8781 = vst [vmem:[#allocation29_spill] sm:$0xff] %v6902_v29 }
 0x461   :  { %v2842_v27 = vpop.eup %2841  ;;  %v1720_v33 = vmul.f32 %v2840_v56, %v1719_v50  ;;  %v1752_v50 = vadd.f32 %v6902_v29, %v1709_v32  ;;  %v1749_v32 = vor.u32 1.1754944e-38, %v1748_v20 }
 0x462   :  { %v1824_v21 = vadd.f32 1.0, %v2842_v27 }
 0x463   :  { %v2844_v52 = vpop.eup %2843  ;;  %v1721_v44 = vadd.f32 %v2840_v56, %v1720_v33  ;;  %v1650_v33 = vadd.f32 %v1649_v63, %v8683_v1 }
 0x464   :  { %v1738_v31 = vmul.f32 %v2844_v52, %v1736_v2  ;;  %2847 = vrcp.f32 %v1824_v21  ;;  %v6897_v35 = vpop.eup %2845  ;;  %vm1743_vm13 = vweird.f32 %v2844_v52  ;;  %v1834_v1 = vand.u32 2147483647, %v1824_v21 }
 0x465   :  { %v1725_v15 = vsel %vm1724_vm11, %v2840_v56, %v1721_v44  ;;  %v1846_v47 = vmul.f32 %v6897_v35, %v6894_v6  ;;  %v1746_v56 = vand.u32 2147483647, %v1736_v2  ;;  %vm1744_vm15 = vmor %vm1742_vm14, %vm1743_vm13  ;;  %vm1830_vm2 = vweird.f32 %v1824_v21 }
 0x466   :  { %v1739_v51 = vsub.f32 1.0, %v1738_v31  ;;  %v1730_v27 = vsel %vm1727_vm12, %v1729_v55, %v1725_v15  ;;  %vm1835_vm4 = vcmp.eq.f32.partialorder %v1834_v1, 8.507059e+37  ;;  %vm1851_vm5 = vweird.f32 %v6897_v35 }
 0x467   :  { %v1753_v0 = vmul.f32 %v1752_v50, %v1730_v27  ;;  %v1847_v31 = vsub.f32 1.0, %v1846_v47  ;;  %vm1747_vm0 = vcmp.eq.f32.partialorder %v1746_v56, 8.507059e+37  ;;  %v1836_v50 = vand.u32 2147483648, %v1824_v21  ;;  %v1817_v29 = vpop.f32.mrf.mxu1  ;;  %vm1852_vm7 = vmor %vm1850_vm6, %vm1851_vm5 }
 0x468   :  { %v1740_v61 = vmul.f32 %v2844_v52, %v1739_v51 }
 0x469   :  { %v1754_v59 = vadd.f32 %v1753_v0, %v1650_v33  ;;  %v1848_v51 = vmul.f32 %v6897_v35, %v1847_v31 }
 0x46a   :  { %v2848_v44 = vpop.eup %2847  ;;  %v1741_v4 = vadd.f32 %v2844_v52, %v1740_v61  ;;  %v1837_v61 = vor.u32 1.1754944e-38, %v1836_v50 }
 0x46b   :  { %2849 = vtanh.f32 %v1754_v59  ;;  %v1826_v34 = vmul.f32 %v2848_v44, %v1824_v21  ;;  %vm1831_vm1 = vweird.f32 %v2848_v44  ;;  %v1856_v21 = vand.u32 2147483648, %v6894_v6 }
 0x46c   :  { %v1745_v55 = vsel %vm1744_vm15, %v2844_v52, %v1741_v4  ;;  %vm1832_vm3 = vmor %vm1830_vm2, %vm1831_vm1  ;;  %v1849_v52 = vadd.f32 %v6897_v35, %v1848_v51 }
 0x46d   :  { %v1827_v63 = vsub.f32 1.0, %v1826_v34  ;;  %v1750_v15 = vsel %vm1747_vm0, %v1749_v32, %v1745_v55  ;;  %v1860_v34 = vadd.f32 %v6548_v17, %v1817_v29  ;;  %v8782_v32 = vld [vmem:[#allocation65_spill] sm:$0xff] }
 0x46e   :  { %v1756_v33 = vsub.f32 1.0, %v1750_v15  ;;  %v1758_v20 = vmul.f32 %v1750_v15, %v6558_v38  ;;  %v212_v31 = vadd.f32 %v8782_v32, %v8684_v36  ;;  %v1854_v38 = vand.u32 2147483647, %v6894_v6  ;;  %v6924_v17 = vld [vmem:[%s7881_s5 + $0x178] sm:$0xff]  ;;  %v6937_v15 = vld [vmem:[%s7881_s5 + $0x148] sm:$0xff] }
 0x46f   :  { %v1828_v27 = vmul.f32 %v2848_v44, %v1827_v63  ;;  %v1853_v29 = vsel %vm1852_vm7, %v6897_v35, %v1849_v52  ;;  %v6931_v63 = vld [vmem:[%s7881_s5 + $0x160] sm:$0xff]  ;;  %v7059_v52 = vld [vmem:[%s7881_s5 + $0xf0] sm:$0xff]  ;;  %v7119_v32 = vld [vmem:[%s7878_s2 + $0x88] sm:$0xff] }
 0x470   :  { %vm1855_vm8 = vcmp.eq.f32.partialorder %v1854_v38, 8.507059e+37  ;;  %v7229_v38 = vld [vmem:[%s7882_s6 + $0x158] sm:$0xff] }
 0x471   :  { %v2850_v0 = vpop.eup %2849  ;;  %v1829_v2 = vadd.f32 %v2848_v44, %v1828_v27  ;;  %8796 = vst [vmem:[#allocation64_spill] sm:$0xff] %v7229_v38 }
 0x472   :  { %v1757_v59 = vmul.f32 %v2850_v0, %v1756_v33  ;;  %v6985_v0 = vld [vmem:[%s7881_s5 + $0x158] sm:$0xff] }
 0x473   :  { %v1833_v4 = vsel %vm1832_vm3, %v2848_v44, %v1829_v2  ;;  %v1857_v44 = vor.u32 1.1754944e-38, %v1856_v21  ;;  %v6998_v2 = vld [vmem:[%s7881_s5 + $0x138] sm:$0xff] }
 0x474   :  { %v1838_v47 = vsel %vm1835_vm4, %v1837_v61, %v1833_v4  ;;  %v6913_v56 = vadd.f32 %v1758_v20, %v1757_v59  ;;  %v7004_v61 = vld [vmem:[%s7881_s5 + $0x140] sm:$0xff]  ;;  %v7020_v59 = vld [vmem:[%s7878_s2 + $0x118] sm:$0xff]  ;;  %v7032_v20 = vld [vmem:[%s7881_s5 + $0x128] sm:$0xff] }
 0x475   :  { %v1861_v55 = vmul.f32 %v1860_v34, %v1838_v47  ;;  %v1858_v6 = vsel %vm1855_vm8, %v1857_v44, %v1853_v29  ;;  %v7039_v4 = vld [vmem:[%s7878_s2 + $0x100] sm:$0xff]  ;;  %v7045_v34 = vld [vmem:[%s7881_s5 + $0x108] sm:$0xff]  ;;  %v7139_v21 = vld [vmem:[%s7881_s5 + $0x78] sm:$0xff] }
 0x476   :  { %1944 = vmatmul.f32.vlgmr.msrb.gmra.mxu1 %v6913_v56  ;;  %v1864_v35 = vsub.f32 1.0, %v1858_v6  ;;  %v1866_v51 = vmul.f32 %v1858_v6, %v6570_v43  ;;  %v6979_v43 = vld [vmem:[%s7881_s5 + $0x150] sm:$0xff]  ;;  %v7106_v47 = vld [vmem:[%s7881_s5 + $0xa8] sm:$0xff]  ;;  %v3249_v29 = vld [vmem:[%s7878_s2 + $0xd8] sm:$0xff] }
 0x477   :  { %v1862_v1 = vadd.f32 %v1861_v55, %v212_v31  ;;  %2184 = vmatpush.msrb.mxu1 %v6924_v17  ;;  %v7125_v31 = vld [vmem:[%s7881_s5 + $0x90] sm:$0xff]  ;;  %v7254_v44 = vld [vmem:[%s7882_s6 + $0x120] sm:$0xff] }
 0x478   :  { %v7215_v55 = vld [vmem:[%s7882_s6 + $0x170] sm:$0xff]  ;;  %8799 = vst [vmem:[#allocation30_spill] sm:$0xff] %v7254_v44  ;;  %v3252_v6 = vld [vmem:[%s7878_s2 + $0xc0] sm:$0xff] }
 0x479   :  { %2851 = vtanh.f32 %v1862_v1  ;;  %2185 = vmatpush.msrb.mxu1 %v6931_v63  ;;  %8794 = vst [vmem:[#allocation84_spill] sm:$0xff] %v7215_v55  ;;  %v7238_v1 = vld [vmem:[%s7882_s6 + $0x138] sm:$0xff] }
 0x47a   :  { %8797 = vst [vmem:[#allocation28_spill] sm:$0xff] %v7238_v1 }
 0x47b   :  { %2186 = vmatpush.msrb.mxu1 %v6937_v15 }
 0x47d   :  { %2187 = vmatpush.msrb.mxu1 %v5949_v46  ;;  %v6954_v46 = vld [vmem:[%s7878_s2 + $0x178] sm:$0xff] }
 0x47f   :  { %v2852_v50 = vpop.eup %2851  ;;  %2188 = vmatpush.msrb.mxu1 %v5968_v57  ;;  %v6960_v57 = vld [vmem:[%s7881_s5 + $0x168] sm:$0xff] }
 0x480   :  { %v1865_v27 = vmul.f32 %v2852_v50, %v1864_v35  ;;  %v7270_v35 = vld [vmem:[%s7882_s6 + $0x108] sm:$0xff] }
 0x481   :  { %2189 = vmatpush.msrb.mxu1 %v5987_v42  ;;  %v6966_v42 = vld [vmem:[%s7881_s5 + $0x170] sm:$0xff]  ;;  %8801 = vst [vmem:[#allocation32_spill] sm:$0xff] %v7270_v35  ;;  %v3255_v50 = vld [vmem:[%s7878_s2 + $0xa8] sm:$0xff] }
 0x482   :  { %v6944_v33 = vadd.f32 %v1866_v51, %v1865_v27  ;;  %v7286_v27 = vld [vmem:[%s7882_s6 + $0xf0] sm:$0xff] }
 0x483   :  { %2190 = vmatpush.msrb.mxu1 %v6006_v5  ;;  %v6973_v5 = vld [vmem:[%s7878_s2 + $0x160] sm:$0xff]  ;;  %8803 = vst [vmem:[#allocation34_spill] sm:$0xff] %v7286_v27  ;;  %v3258_v51 = vld [vmem:[%s7878_s2 + $0x90] sm:$0xff] }
 0x484   :  { %1884 = vmatmul.f32.vlgmr.msra.gmra.mxu2 %v6944_v33  ;;  %1904 = vmatmul.f32.vlgmr.msrb.gmra.mxu3 %v6944_v33 }
 0x485   :  { %1924 = vmatmul.f32.vlgmr.msrb.gmra.mxu0 %v6944_v33  ;;  %2072 = vmatmul.f32.vlgmr.msra.gmra.mxu1 %v6944_v33 }
 0x486   :  { %2076 = vmatpush.msra.mxu2 %v6954_v46  ;;  %2144 = vmatpush.msrb.mxu3 %v6960_v57 }
 0x487   :  { %2164 = vmatpush.msrb.mxu0 %v6966_v42  ;;  %2191 = vmatpush.msrb.mxu1 %v6025_v11  ;;  %v6992_v11 = vld [vmem:[%s7878_s2 + $0x148] sm:$0xff] }
 0x488   :  { %2077 = vmatpush.msra.mxu2 %v6973_v5  ;;  %2145 = vmatpush.msrb.mxu3 %v6979_v43 }
 0x489   :  { %2165 = vmatpush.msrb.mxu0 %v6985_v0  ;;  %2192 = vmatpush.msrb.mxu1 %v6044_v10  ;;  %v7011_v10 = vld [vmem:[%s7878_s2 + $0x130] sm:$0xff] }
 0x48a   :  { %2078 = vmatpush.msra.mxu2 %v6992_v11  ;;  %2146 = vmatpush.msrb.mxu3 %v6998_v2 }
 0x48b   :  { %2166 = vmatpush.msrb.mxu0 %v7004_v61  ;;  %2193 = vmatpush.msrb.mxu1 %v6063_v19  ;;  %v7026_v19 = vld [vmem:[%s7881_s5 + $0x120] sm:$0xff] }
 0x48c   :  { %2079 = vmatpush.msra.mxu2 %v7011_v10  ;;  %1984 = vmatmul.f32.vlgmr.msra.gmra.mxu3 %v6913_v56 }
 0x48d   :  { %1964 = vmatmul.f32.vlgmr.msrb.gmra.mxu2 %v6913_v56  ;;  %2052 = vmatmul.f32.vlgmr.msra.gmra.mxu0 %v6944_v33 }
 0x48e   :  { %2080 = vmatpush.msra.mxu2 %v7020_v59  ;;  %2147 = vmatpush.msrb.mxu3 %v7026_v19 }
 0x48f   :  { %2167 = vmatpush.msrb.mxu0 %v7032_v20  ;;  %2194 = vmatpush.msrb.mxu1 %v6082_v30  ;;  %v7053_v30 = vld [vmem:[%s7878_s2 + $0xe8] sm:$0xff] }
 0x490   :  { %2081 = vmatpush.msra.mxu2 %v7039_v4  ;;  %2148 = vmatpush.msrb.mxu3 %v7045_v34 }
 0x491   :  { %2168 = vmatpush.msrb.mxu0 %v6602_v58  ;;  %2195 = vmatpush.msrb.mxu1 %v6101_v40  ;;  %v7067_v40 = vld [vmem:[%s7878_s2 + $0xd0] sm:$0xff]  ;;  %v7073_v58 = vld [vmem:[%s7881_s5 + $0xd8] sm:$0xff] }
 0x492   :  { %2082 = vmatpush.msra.mxu2 %v7053_v30  ;;  %2149 = vmatpush.msrb.mxu3 %v7059_v52 }
 0x493   :  { %2169 = vmatpush.msrb.mxu0 %v6611_v7  ;;  %2196 = vmatpush.msrb.mxu1 %v6120_v12  ;;  %v7081_v12 = vld [vmem:[%s7878_s2 + $0xb8] sm:$0xff]  ;;  %v7087_v7 = vld [vmem:[%s7881_s5 + $0xc0] sm:$0xff] }
 0x494   :  { %2083 = vmatpush.msra.mxu2 %v7067_v40  ;;  %2150 = vmatpush.msrb.mxu3 %v7073_v58 }
 0x495   :  { %2170 = vmatpush.msrb.mxu0 %v6620_v37  ;;  %2197 = vmatpush.msrb.mxu1 %v6139_v28  ;;  %v7094_v28 = vld [vmem:[%s7881_s5 + $0x28] sm:$0xff]  ;;  %v7100_v37 = vld [vmem:[%s7878_s2 + $0xa0] sm:$0xff] }
 0x496   :  { %2084 = vmatpush.msra.mxu2 %v7081_v12  ;;  %2151 = vmatpush.msrb.mxu3 %v7087_v7  ;;  %8783 = vst [vmem:[#allocation54_spill] sm:$0xff] %v7094_v28 }
 0x497   :  { %2171 = vmatpush.msrb.mxu0 %v6629_v25  ;;  %2198 = vmatpush.msrb.mxu1 %v7094_v28  ;;  %v7113_v25 = vld [vmem:[%s7881_s5 + $0x10] sm:$0xff] }
 0x498   :  { %2085 = vmatpush.msra.mxu2 %v7100_v37  ;;  %2152 = vmatpush.msrb.mxu3 %v7106_v47  ;;  %8784 = vst [vmem:[#allocation74_spill] sm:$0xff] %v7113_v25 }
 0x499   :  { %2172 = vmatpush.msrb.mxu0 %v6638_v13  ;;  %2199 = vmatpush.msrb.mxu1 %v7113_v25  ;;  %v7133_v13 = vld [vmem:[%s7878_s2 + $0x70] sm:$0xff] }
 0x49a   :  { %2086 = vmatpush.msra.mxu2 %v7119_v32  ;;  %2153 = vmatpush.msrb.mxu3 %v7125_v31 }
 0x49b   :  { %2173 = vmatpush.msrb.mxu0 %v6647_v9  ;;  %2312 = vmatpush.msra.mxu1 %v8694_v22  ;;  %v7147_v9 = vld [vmem:[%s7878_s2 + $0x58] sm:$0xff]  ;;  %v7153_v22 = vld [vmem:[%s7881_s5 + $0x60] sm:$0xff] }
 0x49c   :  { %2087 = vmatpush.msra.mxu2 %v7133_v13  ;;  %2154 = vmatpush.msrb.mxu3 %v7139_v21  ;;  %8785 = vst [vmem:[#allocation38_spill] sm:$0xff] %v7153_v22 }
 0x49d   :  { %2174 = vmatpush.msrb.mxu0 %v6656_v53  ;;  %2313 = vmatpush.msra.mxu1 %v8697_v16  ;;  %v7161_v53 = vld [vmem:[%s7878_s2 + $0x40] sm:$0xff]  ;;  %v7167_v16 = vld [vmem:[%s7881_s5 + $0x48] sm:$0xff] }
 0x49e   :  { %2088 = vmatpush.msra.mxu2 %v7147_v9  ;;  %2155 = vmatpush.msrb.mxu3 %v7153_v22  ;;  %8786 = vst [vmem:[#allocation81_spill] sm:$0xff] %v7161_v53 }
 0x49f   :  { %2175 = vmatpush.msrb.mxu0 %v6665_v54  ;;  %2314 = vmatpush.msra.mxu1 %v8700_v45  ;;  %8787 = vst [vmem:[#allocation57_spill] sm:$0xff] %v7167_v16  ;;  %v7175_v54 = vld [vmem:[%s7878_s2 + $0x28] sm:$0xff]  ;;  %v7181_v45 = vld [vmem:[%s7881_s5 + $0x30] sm:$0xff] }
 0x4a0   :  { %2089 = vmatpush.msra.mxu2 %v7161_v53  ;;  %2156 = vmatpush.msrb.mxu3 %v7167_v16  ;;  %8788 = vst [vmem:[#allocation14_spill] sm:$0xff] %v7175_v54 }
 0x4a1   :  { %2176 = vmatpush.msrb.mxu0 %v6674_v39  ;;  %2315 = vmatpush.msra.mxu1 %v8703_v49  ;;  %8789 = vst [vmem:[#allocation10_spill] sm:$0xff] %v7181_v45  ;;  %v7189_v39 = vld [vmem:[%s7878_s2 + $0x10] sm:$0xff]  ;;  %v7195_v49 = vld [vmem:[%s7881_s5 + $0x18] sm:$0xff] }
 0x4a2   :  { %2090 = vmatpush.msra.mxu2 %v7175_v54  ;;  %2157 = vmatpush.msrb.mxu3 %v7181_v45  ;;  %8790 = vst [vmem:[#allocation60_spill] sm:$0xff] %v7189_v39 }
 0x4a3   :  { %2177 = vmatpush.msrb.mxu0 %v6683_v3  ;;  %2316 = vmatpush.msra.mxu1 %v8711_v48  ;;  %8791 = vst [vmem:[#allocation25_spill] sm:$0xff] %v7195_v49  ;;  %v7203_v3 = vld [vmem:[%s7882_s6 + $0x168] sm:$0xff]  ;;  %v7209_v48 = vld [vmem:[%s7881_s5] sm:$0xff] }
 0x4a4   :  { %2091 = vmatpush.msra.mxu2 %v7189_v39  ;;  %2158 = vmatpush.msrb.mxu3 %v7195_v49  ;;  %8792 = vst [vmem:[#allocation26_spill] sm:$0xff] %v7203_v3  ;;  %v8843_v49 = vld [vmem:[#allocation29_spill] sm:$0xff] }
 0x4a5   :  { %2092 = vmatmul.f32.vlgmr.msra.gmra.mxu2 %v6944_v33  ;;  %2178 = vmatpush.msrb.mxu0 %v6693_v23  ;;  %8793 = vst [vmem:[#allocation50_spill] sm:$0xff] %v7209_v48  ;;  %v7222_v23 = vld [vmem:[%s7882_s6 + $0x150] sm:$0xff] }
 0x4a6   :  { %2204 = vmatpush.msrb.mxu2 %v7203_v3  ;;  %2159 = vmatpush.msrb.mxu3 %v7209_v48  ;;  %8795 = vst [vmem:[#allocation62_spill] sm:$0xff] %v7222_v23 }
 0x4a7   :  { %2179 = vmatpush.msrb.mxu0 %v6702_v8  ;;  %v3246_v8 = vld [vmem:[%s7878_s2 + $0xf0] sm:$0xff] }
 0x4a8   :  { %2224 = vmatpush.msra.mxu3 %v7215_v55  ;;  %2205 = vmatpush.msrb.mxu2 %v7222_v23  ;;  %v8842_v23 = vld [vmem:[#allocation7_spill] sm:$0xff] }
 0x4a9   :  { %2244 = vmatpush.msra.mxu0 %v6709_v14  ;;  %2317 = vmatpush.msra.mxu1 %v3246_v8  ;;  %v7245_v14 = vld [vmem:[%s7882_s6 + $0x140] sm:$0xff]  ;;  %v7302_v8 = vld [vmem:[%s7882_s6 + $0xd8] sm:$0xff] }
 0x4aa   :  { %2225 = vmatpush.msra.mxu3 %v7229_v38  ;;  %2206 = vmatpush.msrb.mxu2 %v7238_v1  ;;  %8798 = vst [vmem:[#allocation12_spill] sm:$0xff] %v7245_v14 }
 0x4ab   :  { %2245 = vmatpush.msra.mxu0 %v6718_v60  ;;  %2318 = vmatpush.msra.mxu1 %v3249_v29  ;;  %v7261_v60 = vld [vmem:[%s7882_s6 + $0x128] sm:$0xff]  ;;  %8805 = vst [vmem:[#allocation70_spill] sm:$0xff] %v7302_v8  ;;  %v3261_v29 = vld [vmem:[%s7878_s2 + $0x78] sm:$0xff] }
 0x4ac   :  { %2226 = vmatpush.msra.mxu3 %v7245_v14  ;;  %2207 = vmatpush.msrb.mxu2 %v7254_v44  ;;  %8800 = vst [vmem:[#allocation67_spill] sm:$0xff] %v7261_v60  ;;  %v8841_v44 = vld [vmem:[#allocation72_spill] sm:$0xff] }
 0x4ad   :  { %2246 = vmatpush.msra.mxu0 %v6727_v18  ;;  %2319 = vmatpush.msra.mxu1 %v3252_v6  ;;  %v7277_v18 = vld [vmem:[%s7882_s6 + $0x110] sm:$0xff]  ;;  %v7318_v6 = vld [vmem:[%s7882_s6 + $0xc0] sm:$0xff] }
 0x4ae   :  { %2227 = vmatpush.msra.mxu3 %v7261_v60  ;;  %2208 = vmatpush.msrb.mxu2 %v7270_v35  ;;  %8802 = vst [vmem:[#allocation69_spill] sm:$0xff] %v7277_v18  ;;  %v8840_v60 = vld [vmem:[#allocation41_spill] sm:$0xff] }
 0x4af   :  { %2247 = vmatpush.msra.mxu0 %v6736_v62  ;;  %2320 = vmatpush.msra.mxu1 %v3255_v50  ;;  %v7293_v62 = vld [vmem:[%s7882_s6 + $0xf8] sm:$0xff]  ;;  %8807 = vst [vmem:[#allocation90_spill] sm:$0xff] %v7318_v6  ;;  %v3264_v50 = vld [vmem:[%s7878_s2 + $0x60] sm:$0xff] }
 0x4b0   :  { %2228 = vmatpush.msra.mxu3 %v7277_v18  ;;  %2209 = vmatpush.msrb.mxu2 %v7286_v27  ;;  %8804 = vst [vmem:[#allocation89_spill] sm:$0xff] %v7293_v62 }
 0x4b1   :  { %2248 = vmatpush.msra.mxu0 %v6745_v41  ;;  %2321 = vmatpush.msra.mxu1 %v3258_v51  ;;  %v7309_v41 = vld [vmem:[%s7882_s6 + $0xe0] sm:$0xff]  ;;  %v7334_v51 = vld [vmem:[%s7882_s6 + $0xa8] sm:$0xff] }
 0x4b2   :  { %2229 = vmatpush.msra.mxu3 %v7293_v62  ;;  %2210 = vmatpush.msrb.mxu2 %v7302_v8  ;;  %8806 = vst [vmem:[#allocation37_spill] sm:$0xff] %v7309_v41  ;;  %v8834_v62 = vld [vmem:[#allocation92_spill] sm:$0xff] }
 0x4b3   :  { %2249 = vmatpush.msra.mxu0 %v6754_v24  ;;  %2322 = vmatpush.msra.mxu1 %v3261_v29  ;;  %v7325_v24 = vld [vmem:[%s7882_s6 + $0xc8] sm:$0xff]  ;;  %8809 = vst [vmem:[#allocation40_spill] sm:$0xff] %v7334_v51  ;;  %v7341_v29 = vld [vmem:[%s7882_s6 + $0xb0] sm:$0xff] }
 0x4b4   :  { %2230 = vmatpush.msra.mxu3 %v7309_v41  ;;  %2211 = vmatpush.msrb.mxu2 %v7318_v6  ;;  %8808 = vst [vmem:[#allocation71_spill] sm:$0xff] %v7325_v24  ;;  %v8829_v41 = vld [vmem:[#allocation9_spill] sm:$0xff]  ;;  %v8833_v6 = vld [vmem:[#allocation52_spill] sm:$0xff] }
 0x4b5   :  { %2250 = vmatpush.msra.mxu0 %v6763_v26  ;;  %2323 = vmatpush.msra.mxu1 %v3264_v50  ;;  %v8810_v26 = vld [vmem:[#allocation3_spill] sm:$0xff]  ;;  %8811 = vst [vmem:[#allocation91_spill] sm:$0xff] %v7341_v29  ;;  %v3283_v8 = vld [vmem:[%s7878_s2 + $0x110] sm:$0xff] }
 0x4b6   :  { %2231 = vmatpush.msra.mxu3 %v7325_v24  ;;  %2212 = vmatpush.msrb.mxu2 %v7334_v51  ;;  %v3267_v50 = vld [vmem:[%s7878_s2 + $0x48] sm:$0xff]  ;;  %v7350_v24 = vld [vmem:[%s7882_s6 + $0x90] sm:$0xff]  ;;  %v7357_v51 = vld [vmem:[%s7882_s6 + $0x98] sm:$0xff] }
 0x4b7   :  { %2251 = vmatpush.msra.mxu0 %v8810_v26  ;;  %2324 = vmatpush.msra.mxu1 %v3267_v50  ;;  %8812 = vst [vmem:[#allocation73_spill] sm:$0xff] %v7350_v24  ;;  %v8813_v26 = vld [vmem:[#allocation47_spill] sm:$0xff]  ;;  %v3270_v50 = vld [vmem:[%s7878_s2 + $0x30] sm:$0xff] }
 0x4b8   :  { %2232 = vmatpush.msra.mxu3 %v7341_v29  ;;  %2213 = vmatpush.msrb.mxu2 %v7350_v24  ;;  %8814 = vst [vmem:[#allocation42_spill] sm:$0xff] %v7357_v51  ;;  %v7366_v29 = vld [vmem:[%s7882_s6 + $0x78] sm:$0xff]  ;;  %v7373_v24 = vld [vmem:[%s7882_s6 + $0x80] sm:$0xff] }
 0x4b9   :  { %2252 = vmatpush.msra.mxu0 %v8813_v26  ;;  %2325 = vmatpush.msra.mxu1 %v3270_v50  ;;  %8815 = vst [vmem:[#allocation75_spill] sm:$0xff] %v7366_v29  ;;  %v8816_v26 = vld [vmem:[#allocation33_spill] sm:$0xff] }
 0x4ba   :  { %2233 = vmatpush.msra.mxu3 %v7357_v51  ;;  %2214 = vmatpush.msrb.mxu2 %v7366_v29  ;;  %8817 = vst [vmem:[#allocation44_spill] sm:$0xff] %v7373_v24  ;;  %v3273_v50 = vld [vmem:[%s7878_s2 + $0x18] sm:$0xff]  ;;  %v7382_v51 = vld [vmem:[%s7882_s6 + $0x60] sm:$0xff]  ;;  %v7389_v29 = vld [vmem:[%s7882_s6 + $0x68] sm:$0xff] }
 0x4bb   :  { %2253 = vmatpush.msra.mxu0 %v8816_v26  ;;  %2326 = vmatpush.msra.mxu1 %v3273_v50  ;;  %8818 = vst [vmem:[#allocation77_spill] sm:$0xff] %v7382_v51  ;;  %v8819_v26 = vld [vmem:[#allocation43_spill] sm:$0xff]  ;;  %v3276_v50 = vld [vmem:[%s7878_s2] sm:$0xff] }
 0x4bc   :  { %2234 = vmatpush.msra.mxu3 %v7373_v24  ;;  %2215 = vmatpush.msrb.mxu2 %v7382_v51  ;;  %8820 = vst [vmem:[#allocation46_spill] sm:$0xff] %v7389_v29  ;;  %v7398_v24 = vld [vmem:[%s7882_s6 + $0x48] sm:$0xff]  ;;  %v7405_v51 = vld [vmem:[%s7882_s6 + $0x50] sm:$0xff] }
 0x4bd   :  { %2254 = vmatpush.msra.mxu0 %v8819_v26  ;;  %2327 = vmatpush.msra.mxu1 %v3276_v50  ;;  %8821 = vst [vmem:[#allocation80_spill] sm:$0xff] %v7398_v24  ;;  %v8822_v26 = vld [vmem:[#allocation31_spill] sm:$0xff]  ;;  %v7411_v50 = vld [vmem:[%s7882_s6 + $0x30] sm:$0xff] }
 0x4be   :  { %2235 = vmatpush.msra.mxu3 %v7389_v29  ;;  %2216 = vmatpush.msrb.mxu2 %v7398_v24  ;;  %8823 = vst [vmem:[#allocation49_spill] sm:$0xff] %v7405_v51  ;;  %v8825_v29 = vld [vmem:[#allocation76_spill] sm:$0xff]  ;;  %v8828_v24 = vld [vmem:[#allocation45_spill] sm:$0xff] }
 0x4bf   :  { %2255 = vmatpush.msra.mxu0 %v8822_v26  ;;  %8824 = vst [vmem:[#allocation83_spill] sm:$0xff] %v7411_v50  ;;  %v7418_v26 = vld [vmem:[%s7882_s6 + $0x38] sm:$0xff] }
 0x4c0   :  { %2236 = vmatpush.msra.mxu3 %v7405_v51  ;;  %2217 = vmatpush.msrb.mxu2 %v7411_v50  ;;  %8826 = vst [vmem:[#allocation51_spill] sm:$0xff] %v7418_v26  ;;  %v7424_v51 = vld [vmem:[%s7882_s6 + $0x18] sm:$0xff]  ;;  %v8831_v50 = vld [vmem:[#allocation63_spill] sm:$0xff] }
 0x4c1   :  { %2256 = vmatpush.msra.mxu0 %v8825_v29  ;;  %8827 = vst [vmem:[#allocation85_spill] sm:$0xff] %v7424_v51  ;;  %v7432_v29 = vld [vmem:[%s7882_s6] sm:$0xff] }
 0x4c2   :  { %2237 = vmatpush.msra.mxu3 %v7418_v26  ;;  %2218 = vmatpush.msrb.mxu2 %v7424_v51  ;;  %8830 = vst [vmem:[#allocation53_spill] sm:$0xff] %v7432_v29  ;;  %v8832_v26 = vld [vmem:[#allocation55_spill] sm:$0xff]  ;;  %v8835_v51 = vld [vmem:[#allocation4_spill] sm:$0xff] }
 0x4c3   :  { %2257 = vmatpush.msra.mxu0 %v8828_v24  ;;  %v8836_v24 = vld [vmem:[#allocation48_spill] sm:$0xff] }
 0x4c4   :  { %2238 = vmatpush.msra.mxu3 %v8829_v41  ;;  %2219 = vmatpush.msrb.mxu2 %v7432_v29  ;;  %v8837_v41 = vld [vmem:[#allocation78_spill] sm:$0xff] }
 0x4c5   :  { %2258 = vmatpush.msra.mxu0 %v8831_v50  ;;  %v3284_v50 = vld [vmem:[%s7878_s2 + $0xf8] sm:$0xff] }
 0x4c6   :  { %2332 = vmatpush.msra.mxu2 %v8832_v26  ;;  %2239 = vmatpush.msra.mxu3 %v8833_v6  ;;  %v3286_v6 = vld [vmem:[%s7878_s2 + $0xc8] sm:$0xff]  ;;  %v3289_v26 = vld [vmem:[%s7878_s2 + $0x80] sm:$0xff] }
 0x4c7   :  { %2259 = vmatpush.msra.mxu0 %v8834_v62  ;;  %v3285_v62 = vld [vmem:[%s7878_s2 + $0xe0] sm:$0xff] }
 0x4c8   :  { %2333 = vmatpush.msra.mxu2 %v8835_v51  ;;  %v3287_v51 = vld [vmem:[%s7878_s2 + $0xb0] sm:$0xff] }
 0x4ca   :  { %2334 = vmatpush.msra.mxu2 %v8836_v24  ;;  %v3290_v24 = vld [vmem:[%s7878_s2 + $0x68] sm:$0xff] }
 0x4cc   :  { %2335 = vmatpush.msra.mxu2 %v8837_v41  ;;  %v3291_v41 = vld [vmem:[%s7878_s2 + $0x50] sm:$0xff] }
 0x4ce   :  { %2336 = vmatpush.msra.mxu2 %v3283_v8  ;;  %v3288_v8 = vld [vmem:[%s7878_s2 + $0x98] sm:$0xff] }
 0x4d0   :  { %2337 = vmatpush.msra.mxu2 %v3284_v50  ;;  %v3292_v50 = vld [vmem:[%s7878_s2 + $0x38] sm:$0xff] }
 0x4d2   :  { %2338 = vmatpush.msra.mxu2 %v3285_v62  ;;  %v3293_v62 = vld [vmem:[%s7878_s2 + $0x20] sm:$0xff] }
 0x4d4   :  { %2339 = vmatpush.msra.mxu2 %v3286_v6  ;;  %v3294_v6 = vld [vmem:[%s7878_s2 + $0x8] sm:$0xff] }
 0x4d6   :  { %2340 = vmatpush.msra.mxu2 %v3287_v51 }
 0x4d8   :  { %2341 = vmatpush.msra.mxu2 %v3288_v8  ;;  %v8838_v8 = vld [vmem:[#allocation79_spill] sm:$0xff] }
 0x4da   :  { %2342 = vmatpush.msra.mxu2 %v3289_v26  ;;  %v8839_v26 = vld [vmem:[#allocation5_spill] sm:$0xff] }
 0x4dc   :  { %2343 = vmatpush.msra.mxu2 %v3290_v24  ;;  %v174_v24 = vadd.f32 %v8839_v26, %v8838_v8 }
 0x4de   :  { %2344 = vmatpush.msra.mxu2 %v3291_v41 }
 0x4e0   :  { %2345 = vmatpush.msra.mxu2 %v3292_v50 }
 0x4e2   :  { %2346 = vmatpush.msra.mxu2 %v3293_v62 }
 0x4e4   :  { %2347 = vmatpush.msra.mxu2 %v3294_v6 }
 0x4f3   :  { %v1945_v51 = vpop.f32.mrf.mxu1 }
 0x502   :  { %v7480_v41 = vpop.f32.mrf.mxu0  ;;  %v2073_v29 = vpop.f32.mrf.mxu1 }
 0x503   :  { %v2116_v18 = vadd.f32 %v2073_v29, %v174_v24 }
 0x505   :  { %v2731_v27 = vmul.f32 -1.442695, %v2116_v18 }
 0x507   :  { %2853 = vpow2.f32 %v2731_v27  ;;  %v1885_v50 = vpop.f32.mrf.mxu2  ;;  %v1905_v1 = vpop.f32.mrf.mxu3 }
 0x508   :  { %v1886_v35 = vadd.f32 %v1885_v50, %v8840_v60  ;;  %v1906_v26 = vadd.f32 %v1905_v1, %v8842_v23 }
 0x50a   :  { %v1988_v14 = vadd.f32 %v1945_v51, %v1886_v35  ;;  %v2053_v62 = vpop.f32.mrf.mxu0 }
 0x50b   :  { %v2096_v38 = vadd.f32 %v2053_v62, %v8841_v44 }
 0x50c   :  { %v2728_v25 = vmul.f32 -1.442695, %v1988_v14 }
 0x50d   :  { %v2854_v6 = vpop.eup %2853  ;;  %v2730_v55 = vmul.f32 -1.442695, %v2096_v38 }
 0x50e   :  { %2855 = vpow2.f32 %v2728_v25  ;;  %v7485_v8 = vadd.f32 1.0, %v2854_v6 }
 0x50f   :  { %2857 = vpow2.f32 %v2730_v55 }
 0x510   :  { %v1965_v29 = vpop.f32.mrf.mxu2  ;;  %2859 = vrcp.f32 %v7485_v8  ;;  %vm2126_vm4 = vweird.f32 %v7485_v8 }
 0x511   :  { %v2008_v18 = vadd.f32 %v1965_v29, %v1906_v26  ;;  %v1985_v29 = vpop.f32.mrf.mxu3 }
 0x512   :  { %v2028_v39 = vadd.f32 %v8843_v49, %v1985_v29 }
 0x513   :  { %v2729_v27 = vmul.f32 -1.442695, %v2008_v18 }
 0x514   :  { %v2856_v24 = vpop.eup %2855 }
 0x515   :  { %v2858_v35 = vpop.eup %2857  ;;  %v1992_v51 = vadd.f32 1.0, %v2856_v24  ;;  %2861 = vpow2.f32 %v2729_v27 }
 0x516   :  { %v2100_v44 = vadd.f32 1.0, %v2858_v35  ;;  %v7488_v14 = vpop.eup %2859 }
 0x517   :  { %2863 = vrcp.f32 %v1992_v51  ;;  %v2122_v50 = vmul.f32 %v7488_v14, %v7485_v8  ;;  %v2002_v18 = vand.u32 2147483647, %v1992_v51  ;;  %v2004_v27 = vand.u32 2147483648, %v1992_v51 }
 0x518   :  { %2865 = vrcp.f32 %v2100_v44  ;;  %v2112_v60 = vand.u32 2147483648, %v2100_v44  ;;  %v2110_v28 = vand.u32 2147483647, %v2100_v44  ;;  %vm1998_vm11 = vweird.f32 %v1992_v51 }
 0x519   :  { %v2123_v35 = vsub.f32 1.0, %v2122_v50  ;;  %vm2106_vm13 = vweird.f32 %v2100_v44  ;;  %vm2003_vm14 = vcmp.eq.f32.partialorder %v2002_v18, 8.507059e+37  ;;  %vm2127_vm2 = vweird.f32 %v7488_v14 }
 0x51a   :  { %vm2111_vm0 = vcmp.eq.f32.partialorder %v2110_v28, 8.507059e+37  ;;  %v8845_v28 = vld [vmem:[#allocation39_spill] sm:$0xff]  ;;  %vm2128_vm6 = vmor %vm2126_vm4, %vm2127_vm2 }
 0x51b   :  { %v2862_v25 = vpop.eup %2861 }
 0x51c   :  { %v7490_v38 = vadd.f32 1.0, %v2862_v25 }
 0x51d   :  { %v2864_v55 = vpop.eup %2863 }
 0x51e   :  { %v2866_v1 = vpop.eup %2865  ;;  %2867 = vrcp.f32 %v7490_v38  ;;  %v1994_v62 = vmul.f32 %v2864_v55, %v1992_v51  ;;  %vm1999_vm9 = vweird.f32 %v2864_v55  ;;  %vm2018_vm3 = vweird.f32 %v7490_v38 }
 0x51f   :  { %v2102_v6 = vmul.f32 %v2866_v1, %v2100_v44  ;;  %vm2107_vm10 = vweird.f32 %v2866_v1  ;;  %vm2000_vm12 = vmor %vm1998_vm11, %vm1999_vm9 }
 0x520   :  { %v1995_v26 = vsub.f32 1.0, %v1994_v62  ;;  %v2005_v62 = vor.u32 1.1754944e-38, %v2004_v27  ;;  %vm2108_vm15 = vmor %vm2106_vm13, %vm2107_vm10  ;;  %v2024_v27 = vand.u32 2147483648, %v7490_v38 }
 0x521   :  { %v2103_v24 = vsub.f32 1.0, %v2102_v6  ;;  %v2124_v6 = vmul.f32 %v7488_v14, %v2123_v35 }
 0x522   :  { %v1996_v23 = vmul.f32 %v2864_v55, %v1995_v26  ;;  %v2113_v26 = vor.u32 1.1754944e-38, %v2112_v60 }
 0x523   :  { %v2104_v25 = vmul.f32 %v2866_v1, %v2103_v24 }
 0x524   :  { %v2868_v48 = vpop.eup %2867  ;;  %v1997_v3 = vadd.f32 %v2864_v55, %v1996_v23  ;;  %v8844_v23 = vld [vmem:[#allocation8_spill] sm:$0xff] }
 0x525   :  { %v2014_v45 = vmul.f32 %v2868_v48, %v7490_v38  ;;  %v2105_v54 = vadd.f32 %v2866_v1, %v2104_v25  ;;  %v1926_v51 = vadd.f32 %v7480_v41, %v8844_v23  ;;  %vm2019_vm1 = vweird.f32 %v2868_v48 }
 0x526   :  { %v2001_v50 = vsel %vm2000_vm12, %v2864_v55, %v1997_v3  ;;  %v7504_v3 = vld [vmem:[%s7880_s4] ss:$0 sm:$0xff]  ;;  %vm2020_vm5 = vmor %vm2018_vm3, %vm2019_vm1  ;;  %v2025_v55 = vor.u32 1.1754944e-38, %v2024_v27 }
 0x527   :  { %v2015_v24 = vsub.f32 1.0, %v2014_v45  ;;  %v2006_v16 = vsel %vm2003_vm14, %v2005_v62, %v2001_v50  ;;  %v2109_v53 = vsel %vm2108_vm15, %v2866_v1, %v2105_v54  ;;  %v2022_v54 = vand.u32 2147483647, %v7490_v38 }
 0x528   :  { %v2029_v29 = vmul.f32 %v2028_v39, %v2006_v16  ;;  %v2093_v49 = vpop.f32.mrf.mxu2  ;;  %v2114_v22 = vsel %vm2111_vm0, %v2113_v26, %v2109_v53  ;;  %v215_v45 = vadd.f32 %v8845_v28, %v8684_v36  ;;  %v2125_v16 = vadd.f32 %v7488_v14, %v2124_v6  ;;  %v8858_v28 = vld [vmem:[#allocation28_spill] sm:$0xff] }
 0x529   :  { %v2016_v25 = vmul.f32 %v2868_v48, %v2015_v24  ;;  %v2136_v60 = vadd.f32 %v7504_v3, %v2093_v49  ;;  %v2132_v39 = vand.u32 2147483648, %v7485_v8  ;;  %v2130_v49 = vand.u32 2147483647, %v7485_v8 }
 0x52a   :  { %v2030_v53 = vadd.f32 %v2029_v29, %v1926_v51  ;;  %vm2023_vm7 = vcmp.eq.f32.partialorder %v2022_v54, 8.507059e+37  ;;  %v2129_v35 = vsel %vm2128_vm6, %v7488_v14, %v2125_v16  ;;  %v3319_v54 = vld [vmem:[%s7882_s6 + $0x178] sm:$0xff]  ;;  %v8860_v16 = vld [vmem:[#allocation64_spill] sm:$0xff] }
 0x52b   :  { %v2137_v41 = vmul.f32 %v2136_v60, %v2114_v22  ;;  %v2017_v44 = vadd.f32 %v2868_v48, %v2016_v25  ;;  %v2133_v6 = vor.u32 1.1754944e-38, %v2132_v39  ;;  %vm2131_vm8 = vcmp.eq.f32.partialorder %v2130_v49, 8.507059e+37  ;;  %v3318_v25 = vld [vmem:[%s7881_s5 + $0x8] sm:$0xff]  ;;  %v8857_v60 = vld [vmem:[#allocation84_spill] sm:$0xff]  ;;  %v8861_v39 = vld [vmem:[#allocation30_spill] sm:$0xff] }
 0x52c   :  { %2869 = vtanh.f32 %v2030_v53  ;;  %v3320_v53 = vld [vmem:[%s7882_s6 + $0x160] sm:$0xff]  ;;  %v8863_v49 = vld [vmem:[#allocation32_spill] sm:$0xff] }
 0x52d   :  { %v2138_v1 = vadd.f32 %v2137_v41, %v215_v45  ;;  %v2021_v18 = vsel %vm2020_vm5, %v2868_v48, %v2017_v44  ;;  %v2134_v38 = vsel %vm2131_vm8, %v2133_v6, %v2129_v35  ;;  %v8859_v45 = vld [vmem:[#allocation74_spill] sm:$0xff]  ;;  %v8862_v41 = vld [vmem:[#allocation12_spill] sm:$0xff]  ;;  %v3321_v44 = vld [vmem:[%s7882_s6 + $0x148] sm:$0xff] }
 0x52e   :  { %v2026_v62 = vsel %vm2023_vm7, %v2025_v55, %v2021_v18  ;;  %v2140_v8 = vsub.f32 1.0, %v2134_v38  ;;  %v2142_v48 = vmul.f32 %v2134_v38, %v6944_v33  ;;  %v3300_v33 = vld [vmem:[%s7881_s5 + $0x100] sm:$0xff]  ;;  %v8864_v55 = vld [vmem:[#allocation67_spill] sm:$0xff]  ;;  %v8866_v35 = vld [vmem:[#allocation69_spill] sm:$0xff] }
 0x52f   :  { %2871 = vtanh.f32 %v2138_v1  ;;  %v2032_v22 = vsub.f32 1.0, %v2026_v62  ;;  %v2034_v24 = vmul.f32 %v2026_v62, %v6913_v56  ;;  %v3296_v56 = vld [vmem:[%s7881_s5 + $0x130] sm:$0xff]  ;;  %v8865_v18 = vld [vmem:[#allocation34_spill] sm:$0xff]  ;;  %v3323_v62 = vld [vmem:[%s7882_s6 + $0x118] sm:$0xff] }
 0x530   :  { %v3322_v1 = vld [vmem:[%s7882_s6 + $0x130] sm:$0xff]  ;;  %v8867_v6 = vld [vmem:[#allocation70_spill] sm:$0xff]  ;;  %v8868_v38 = vld [vmem:[#allocation89_spill] sm:$0xff] }
 0x532   :  { %v2870_v50 = vpop.eup %2869 }
 0x533   :  { %v2033_v26 = vmul.f32 %v2870_v50, %v2032_v22  ;;  %v3324_v22 = vld [vmem:[%s7882_s6 + $0x100] sm:$0xff] }
 0x534   :  { %v8869_v50 = vld [vmem:[#allocation90_spill] sm:$0xff] }
 0x535   :  { %v2872_v51 = vpop.eup %2871  ;;  %v7518_v29 = vadd.f32 %v2034_v24, %v2033_v26  ;;  %v8870_v26 = vld [vmem:[#allocation37_spill] sm:$0xff]  ;;  %v3325_v24 = vld [vmem:[%s7882_s6 + $0xe8] sm:$0xff] }
 0x536   :  { %v2141_v27 = vmul.f32 %v2872_v51, %v2140_v8  ;;  %v8871_v8 = vld [vmem:[#allocation40_spill] sm:$0xff]  ;;  %v8872_v51 = vld [vmem:[#allocation71_spill] sm:$0xff] }
 0x537   :  { %2220 = vmatmul.f32.vlgmr.msrb.gmra.mxu2 %v7518_v29 }
 0x538   :  { %v7522_v14 = vadd.f32 %v2142_v48, %v2141_v27  ;;  %2460 = vmatpush.msrb.mxu2 %v6924_v17  ;;  %v3297_v17 = vld [vmem:[%s7881_s5 + $0x110] sm:$0xff]  ;;  %v8873_v48 = vld [vmem:[#allocation73_spill] sm:$0xff] }
 0x539   :  { %v3326_v27 = vld [vmem:[%s7882_s6 + $0xd0] sm:$0xff] }
 0x53a   :  { %2160 = vmatmul.f32.vlgmr.msrb.gmra.mxu3 %v7522_v14  ;;  %2180 = vmatmul.f32.vlgmr.msrb.gmra.mxu0 %v7522_v14 }
 0x53b   :  { %2200 = vmatmul.f32.vlgmr.msrb.gmra.mxu1 %v7522_v14  ;;  %2352 = vmatpush.msrb.mxu3 %v6954_v46  ;;  %v3301_v46 = vld [vmem:[%s7881_s5 + $0xe0] sm:$0xff] }
 0x53c   :  { %2420 = vmatpush.msrb.mxu0 %v6960_v57  ;;  %2440 = vmatpush.msrb.mxu1 %v6966_v42  ;;  %v3302_v57 = vld [vmem:[%s7881_s5 + $0xe8] sm:$0xff] }
 0x53d   :  { %2353 = vmatpush.msrb.mxu3 %v6973_v5  ;;  %2461 = vmatpush.msrb.mxu2 %v6931_v63  ;;  %v3298_v63 = vld [vmem:[%s7881_s5 + $0x118] sm:$0xff]  ;;  %v3303_v42 = vld [vmem:[%s7881_s5 + $0xc8] sm:$0xff]  ;;  %v3304_v5 = vld [vmem:[%s7881_s5 + $0xd0] sm:$0xff] }
 0x53e   :  { %2421 = vmatpush.msrb.mxu0 %v6979_v43  ;;  %2441 = vmatpush.msrb.mxu1 %v6985_v0  ;;  %v3305_v43 = vld [vmem:[%s7881_s5 + $0xb0] sm:$0xff]  ;;  %v3306_v0 = vld [vmem:[%s7881_s5 + $0xb8] sm:$0xff] }
 0x53f   :  { %2354 = vmatpush.msrb.mxu3 %v6992_v11  ;;  %2348 = vmatmul.f32.vlgmr.msra.gmra.mxu2 %v7522_v14  ;;  %v3307_v11 = vld [vmem:[%s7881_s5 + $0x98] sm:$0xff] }
 0x540   :  { %2422 = vmatpush.msrb.mxu0 %v6998_v2  ;;  %2442 = vmatpush.msrb.mxu1 %v7004_v61  ;;  %v3308_v2 = vld [vmem:[%s7881_s5 + $0xa0] sm:$0xff] }
 0x541   :  { %2355 = vmatpush.msrb.mxu3 %v7011_v10  ;;  %2462 = vmatpush.msrb.mxu2 %v6937_v15  ;;  %v3299_v15 = vld [vmem:[%s7881_s5 + $0xf8] sm:$0xff]  ;;  %v3309_v61 = vld [vmem:[%s7881_s5 + $0x80] sm:$0xff]  ;;  %v3310_v10 = vld [vmem:[%s7881_s5 + $0x88] sm:$0xff] }
 0x542   :  { %2240 = vmatmul.f32.vlgmr.msra.gmra.mxu3 %v7518_v29  ;;  %2260 = vmatmul.f32.vlgmr.msra.gmra.mxu0 %v7518_v29 }
 0x543   :  { %2328 = vmatmul.f32.vlgmr.msra.gmra.mxu1 %v7522_v14  ;;  %2356 = vmatpush.msrb.mxu3 %v7020_v59  ;;  %v8846_v59 = vld [vmem:[#allocation38_spill] sm:$0xff] }
 0x544   :  { %2423 = vmatpush.msrb.mxu0 %v7026_v19  ;;  %2443 = vmatpush.msrb.mxu1 %v7032_v20  ;;  %v3311_v19 = vld [vmem:[%s7881_s5 + $0x68] sm:$0xff]  ;;  %v8847_v20 = vld [vmem:[#allocation81_spill] sm:$0xff] }
 0x545   :  { %2357 = vmatpush.msrb.mxu3 %v7039_v4  ;;  %2463 = vmatpush.msrb.mxu2 %v3296_v56  ;;  %v3312_v4 = vld [vmem:[%s7881_s5 + $0x70] sm:$0xff]  ;;  %v8874_v56 = vld [vmem:[#allocation91_spill] sm:$0xff] }
 0x546   :  { %2424 = vmatpush.msrb.mxu0 %v7045_v34  ;;  %2444 = vmatpush.msrb.mxu1 %v3297_v17  ;;  %v8848_v34 = vld [vmem:[#allocation57_spill] sm:$0xff] }
 0x547   :  { %2358 = vmatpush.msrb.mxu3 %v7053_v30  ;;  %2464 = vmatpush.msrb.mxu2 %v3298_v63  ;;  %v3313_v30 = vld [vmem:[%s7881_s5 + $0x50] sm:$0xff]  ;;  %v3327_v17 = vld [vmem:[%s7882_s6 + $0xb8] sm:$0xff]  ;;  %v8875_v63 = vld [vmem:[#allocation75_spill] sm:$0xff] }
 0x548   :  { %2425 = vmatpush.msrb.mxu0 %v7059_v52  ;;  %2445 = vmatpush.msrb.mxu1 %v3299_v15  ;;  %v8849_v52 = vld [vmem:[#allocation14_spill] sm:$0xff] }
 0x549   :  { %2359 = vmatpush.msrb.mxu3 %v7067_v40  ;;  %2465 = vmatpush.msrb.mxu2 %v3300_v33  ;;  %v3314_v40 = vld [vmem:[%s7881_s5 + $0x58] sm:$0xff]  ;;  %v8876_v15 = vld [vmem:[#allocation42_spill] sm:$0xff] }
 0x54a   :  { %2426 = vmatpush.msrb.mxu0 %v7073_v58  ;;  %2446 = vmatpush.msrb.mxu1 %v3301_v46  ;;  %v8850_v58 = vld [vmem:[#allocation10_spill] sm:$0xff]  ;;  %v8877_v46 = vld [vmem:[#allocation77_spill] sm:$0xff] }
 0x54b   :  { %2360 = vmatpush.msrb.mxu3 %v7081_v12  ;;  %2466 = vmatpush.msrb.mxu2 %v3302_v57  ;;  %v3315_v12 = vld [vmem:[%s7881_s5 + $0x38] sm:$0xff]  ;;  %v3328_v33 = vld [vmem:[%s7882_s6 + $0xa0] sm:$0xff]  ;;  %v8878_v57 = vld [vmem:[#allocation44_spill] sm:$0xff] }
 0x54c   :  { %2427 = vmatpush.msrb.mxu0 %v7087_v7  ;;  %2447 = vmatpush.msrb.mxu1 %v3303_v42  ;;  %v8851_v7 = vld [vmem:[#allocation60_spill] sm:$0xff]  ;;  %v3329_v42 = vld [vmem:[%s7882_s6 + $0x88] sm:$0xff] }
 0x54d   :  { %2361 = vmatpush.msrb.mxu3 %v7100_v37  ;;  %2467 = vmatpush.msrb.mxu2 %v3304_v5  ;;  %v3316_v37 = vld [vmem:[%s7881_s5 + $0x40] sm:$0xff]  ;;  %v8879_v5 = vld [vmem:[#allocation80_spill] sm:$0xff] }
 0x54e   :  { %2428 = vmatpush.msrb.mxu0 %v7106_v47  ;;  %2448 = vmatpush.msrb.mxu1 %v3305_v43  ;;  %v8852_v47 = vld [vmem:[#allocation25_spill] sm:$0xff]  ;;  %v8880_v43 = vld [vmem:[#allocation46_spill] sm:$0xff] }
 0x54f   :  { %2362 = vmatpush.msrb.mxu3 %v7119_v32  ;;  %2468 = vmatpush.msrb.mxu2 %v3306_v0  ;;  %v8853_v32 = vld [vmem:[#allocation26_spill] sm:$0xff]  ;;  %v3330_v0 = vld [vmem:[%s7882_s6 + $0x70] sm:$0xff] }
 0x550   :  { %2429 = vmatpush.msrb.mxu0 %v7125_v31  ;;  %2449 = vmatpush.msrb.mxu1 %v3307_v11  ;;  %v3317_v31 = vld [vmem:[%s7881_s5 + $0x20] sm:$0xff]  ;;  %v8881_v11 = vld [vmem:[#allocation83_spill] sm:$0xff] }
 0x551   :  { %2363 = vmatpush.msrb.mxu3 %v7133_v13  ;;  %2469 = vmatpush.msrb.mxu2 %v3308_v2  ;;  %v8854_v13 = vld [vmem:[#allocation50_spill] sm:$0xff]  ;;  %v8882_v2 = vld [vmem:[#allocation49_spill] sm:$0xff] }
 0x552   :  { %2430 = vmatpush.msrb.mxu0 %v7139_v21  ;;  %2450 = vmatpush.msrb.mxu1 %v3309_v61  ;;  %v8855_v21 = vld [vmem:[#allocation54_spill] sm:$0xff]  ;;  %v3331_v61 = vld [vmem:[%s7882_s6 + $0x58] sm:$0xff] }
 0x553   :  { %2364 = vmatpush.msrb.mxu3 %v7147_v9  ;;  %2470 = vmatpush.msrb.mxu2 %v3310_v10  ;;  %v8856_v9 = vld [vmem:[#allocation62_spill] sm:$0xff]  ;;  %v8883_v10 = vld [vmem:[#allocation85_spill] sm:$0xff] }
 0x554   :  { %2431 = vmatpush.msrb.mxu0 %v8846_v59  ;;  %2451 = vmatpush.msrb.mxu1 %v3311_v19  ;;  %v8884_v59 = vld [vmem:[#allocation51_spill] sm:$0xff]  ;;  %v3332_v19 = vld [vmem:[%s7882_s6 + $0x40] sm:$0xff] }
 0x555   :  { %2365 = vmatpush.msrb.mxu3 %v8847_v20  ;;  %2471 = vmatpush.msrb.mxu2 %v3312_v4  ;;  %v8885_v20 = vld [vmem:[#allocation53_spill] sm:$0xff]  ;;  %v3333_v4 = vld [vmem:[%s7882_s6 + $0x20] sm:$0xff] }
 0x556   :  { %2432 = vmatpush.msrb.mxu0 %v8848_v34  ;;  %2452 = vmatpush.msrb.mxu1 %v3313_v30  ;;  %v3334_v34 = vld [vmem:[%s7882_s6 + $0x28] sm:$0xff] }
 0x557   :  { %2366 = vmatpush.msrb.mxu3 %v8849_v52  ;;  %2472 = vmatpush.msrb.mxu2 %v3314_v40  ;;  %v3335_v30 = vld [vmem:[%s7882_s6 + $0x8] sm:$0xff]  ;;  %v3336_v52 = vld [vmem:[%s7882_s6 + $0x10] sm:$0xff] }
 0x558   :  { %2433 = vmatpush.msrb.mxu0 %v8850_v58  ;;  %2453 = vmatpush.msrb.mxu1 %v3315_v12 }
 0x559   :  { %2367 = vmatpush.msrb.mxu3 %v8851_v7  ;;  %2473 = vmatpush.msrb.mxu2 %v3316_v37  ;;  %v8886_v7 = vld [vmem:[#allocation41_spill] sm:$0xff] }
 0x55a   :  { %2368 = vmatmul.f32.vlgmr.msrb.gmra.mxu3 %v7522_v14  ;;  %2434 = vmatpush.msrb.mxu0 %v8852_v47 }
 0x55b   :  { %2480 = vmatpush.msra.mxu3 %v8853_v32  ;;  %2454 = vmatpush.msrb.mxu1 %v3317_v31  ;;  %v8887_v31 = vld [vmem:[#allocation79_spill] sm:$0xff] }
 0x55c   :  { %2435 = vmatpush.msrb.mxu0 %v8854_v13  ;;  %2474 = vmatpush.msrb.mxu2 %v8855_v21  ;;  %v8888_v13 = vld [vmem:[#allocation68_spill] sm:$0xff] }
 0x55d   :  { %2481 = vmatpush.msra.mxu3 %v8856_v9  ;;  %2455 = vmatpush.msrb.mxu1 %v3318_v25  ;;  %v177_v21 = vadd.f32 %v8888_v13, %v8887_v31  ;;  %v8889_v25 = vld [vmem:[#allocation82_spill] sm:$0xff] }
 0x55e   :  { %2500 = vmatpush.msra.mxu0 %v8857_v60  ;;  %2475 = vmatpush.msrb.mxu2 %v8859_v45 }
 0x55f   :  { %2520 = vmatpush.msra.mxu1 %v3319_v54  ;;  %2482 = vmatpush.msra.mxu3 %v8858_v28 }
 0x560   :  { %2501 = vmatpush.msra.mxu0 %v8860_v16 }
 0x561   :  { %2521 = vmatpush.msra.mxu1 %v3320_v53  ;;  %2483 = vmatpush.msra.mxu3 %v8861_v39  ;;  %v8890_v53 = vld [vmem:[#allocation7_spill] sm:$0xff] }
 0x562   :  { %2502 = vmatpush.msra.mxu0 %v8862_v41 }
 0x563   :  { %2522 = vmatpush.msra.mxu1 %v3321_v44  ;;  %2484 = vmatpush.msra.mxu3 %v8863_v49 }
 0x564   :  { %2503 = vmatpush.msra.mxu0 %v8864_v55 }
 0x565   :  { %2523 = vmatpush.msra.mxu1 %v3322_v1  ;;  %2485 = vmatpush.msra.mxu3 %v8865_v18 }
 0x566   :  { %2504 = vmatpush.msra.mxu0 %v8866_v35 }
 0x567   :  { %2524 = vmatpush.msra.mxu1 %v3323_v62  ;;  %2486 = vmatpush.msra.mxu3 %v8867_v6 }
 0x568   :  { %2505 = vmatpush.msra.mxu0 %v8868_v38 }
 0x569   :  { %2525 = vmatpush.msra.mxu1 %v3324_v22  ;;  %2487 = vmatpush.msra.mxu3 %v8869_v50 }
 0x56a   :  { %2506 = vmatpush.msra.mxu0 %v8870_v26 }
 0x56b   :  { %2526 = vmatpush.msra.mxu1 %v3325_v24  ;;  %2488 = vmatpush.msra.mxu3 %v8871_v8 }
 0x56c   :  { %2507 = vmatpush.msra.mxu0 %v8872_v51 }
 0x56d   :  { %2527 = vmatpush.msra.mxu1 %v3326_v27  ;;  %2489 = vmatpush.msra.mxu3 %v8873_v48  ;;  %v8891_v48 = vld [vmem:[#allocation6_spill] sm:$0xff] }
 0x56e   :  { %2508 = vmatpush.msra.mxu0 %v8874_v56  ;;  %v218_v56 = vadd.f32 %v8891_v48, %v8684_v36  ;;  %v2599_v48 = vld [vmem:[%s7887_s9 + $0x58] sm:$0xff] }
 0x56f   :  { %2528 = vmatpush.msra.mxu1 %v3327_v17  ;;  %2490 = vmatpush.msra.mxu3 %v8875_v63 }
 0x570   :  { %2509 = vmatpush.msra.mxu0 %v8876_v15 }
 0x571   :  { %2529 = vmatpush.msra.mxu1 %v3328_v33  ;;  %2491 = vmatpush.msra.mxu3 %v8877_v46 }
 0x572   :  { %2510 = vmatpush.msra.mxu0 %v8878_v57 }
 0x573   :  { %2530 = vmatpush.msra.mxu1 %v3329_v42  ;;  %2492 = vmatpush.msra.mxu3 %v8879_v5 }
 0x574   :  { %2511 = vmatpush.msra.mxu0 %v8880_v43 }
 0x575   :  { %2531 = vmatpush.msra.mxu1 %v3330_v0  ;;  %2493 = vmatpush.msra.mxu3 %v8881_v11 }
 0x576   :  { %2512 = vmatpush.msra.mxu0 %v8882_v2  ;;  %v8892_v2 = vld [vmem:[#allocation29_spill] sm:$0xff] }
 0x577   :  { %2532 = vmatpush.msra.mxu1 %v3331_v61  ;;  %2494 = vmatpush.msra.mxu3 %v8883_v10 }
 0x578   :  { %2513 = vmatpush.msra.mxu0 %v8884_v59 }
 0x579   :  { %2533 = vmatpush.msra.mxu1 %v3332_v19  ;;  %2495 = vmatpush.msra.mxu3 %v8885_v20 }
 0x57a   :  { %2514 = vmatpush.msra.mxu0 %v3333_v4 }
 0x57b   :  { %2534 = vmatpush.msra.mxu1 %v3334_v34 }
 0x57c   :  { %2515 = vmatpush.msra.mxu0 %v3335_v30 }
 0x57d   :  { %2535 = vmatpush.msra.mxu1 %v3336_v52 }
 0x5b7   :  { %v2181_v9 = vpop.f32.mrf.mxu0 }
 0x5b8   :  { %v2201_v40 = vpop.f32.mrf.mxu1  ;;  %v2182_v39 = vadd.f32 %v2181_v9, %v8890_v53 }
 0x5b9   :  { %v2202_v17 = vadd.f32 %v2201_v40, %v8844_v23 }
 0x5ba   :  { %v2221_v58 = vpop.f32.mrf.mxu2 }
 0x5bd   :  { %v2161_v12 = vpop.f32.mrf.mxu3 }
 0x5be   :  { %v2162_v37 = vadd.f32 %v2161_v12, %v8886_v7 }
 0x5bf   :  { %v2261_v63 = vpop.f32.mrf.mxu0 }
 0x5c0   :  { %v2264_v47 = vadd.f32 %v2221_v58, %v2162_v37  ;;  %v2329_v32 = vpop.f32.mrf.mxu1  ;;  %v2304_v61 = vadd.f32 %v8892_v2, %v2261_v63  ;;  %v2597_v63 = vld [vmem:[%s7887_s9 + $0x48] sm:$0xff] }
 0x5c1   :  { %v2372_v60 = vadd.f32 %v2329_v32, %v8889_v25 }
 0x5c2   :  { %v2732_v54 = vmul.f32 -1.442695, %v2264_v47  ;;  %v2349_v28 = vpop.f32.mrf.mxu2 }
 0x5c3   :  { %v2734_v45 = vmul.f32 -1.442695, %v2372_v60  ;;  %v2392_v16 = vadd.f32 %v2349_v28, %v177_v21 }
 0x5c4   :  { %2873 = vpow2.f32 %v2732_v54 }
 0x5c5   :  { %2875 = vpow2.f32 %v2734_v45  ;;  %v2735_v41 = vmul.f32 -1.442695, %v2392_v16  ;;  %v2241_v44 = vpop.f32.mrf.mxu3 }
 0x5c6   :  { %v2284_v49 = vadd.f32 %v2241_v44, %v2182_v39 }
 0x5c7   :  { %2877 = vpow2.f32 %v2735_v41 }
 0x5c8   :  { %v2733_v55 = vmul.f32 -1.442695, %v2284_v49 }
 0x5ca   :  { %v2874_v1 = vpop.eup %2873  ;;  %2879 = vpow2.f32 %v2733_v55 }
 0x5cb   :  { %v2876_v18 = vpop.eup %2875  ;;  %v2268_v35 = vadd.f32 1.0, %v2874_v1 }
 0x5cc   :  { %v2376_v62 = vadd.f32 1.0, %v2876_v18 }
 0x5cd   :  { %v2878_v6 = vpop.eup %2877  ;;  %2881 = vrcp.f32 %v2268_v35  ;;  %v2278_v33 = vand.u32 2147483647, %v2268_v35  ;;  %v2280_v46 = vand.u32 2147483648, %v2268_v35  ;;  %vm2274_vm11 = vweird.f32 %v2268_v35 }
 0x5ce   :  { %2883 = vrcp.f32 %v2376_v62  ;;  %v7731_v38 = vadd.f32 1.0, %v2878_v6  ;;  %v2386_v43 = vand.u32 2147483647, %v2376_v62  ;;  %v2388_v0 = vand.u32 2147483648, %v2376_v62 }
 0x5cf   :  { %vm2382_vm12 = vweird.f32 %v2376_v62  ;;  %vm2279_vm14 = vcmp.eq.f32.partialorder %v2278_v33, 8.507059e+37  ;;  %v2281_v20 = vor.u32 1.1754944e-38, %v2280_v46 }
 0x5d0   :  { %v2880_v22 = vpop.eup %2879  ;;  %2885 = vrcp.f32 %v7731_v38  ;;  %vm2387_vm0 = vcmp.eq.f32.partialorder %v2386_v43, 8.507059e+37  ;;  %v2389_v40 = vor.u32 1.1754944e-38, %v2388_v0  ;;  %v2408_v25 = vand.u32 2147483648, %v7731_v38  ;;  %v2594_v43 = vld [vmem:[%s7887_s9 + $0x30] sm:$0xff] }
 0x5d1   :  { %v7734_v50 = vadd.f32 1.0, %v2880_v22  ;;  %vm2402_vm4 = vweird.f32 %v7731_v38  ;;  %v2406_v16 = vand.u32 2147483647, %v7731_v38 }
 0x5d2   :  { %v2409_v49 = vor.u32 1.1754944e-38, %v2408_v25 }
 0x5d3   :  { %v2882_v26 = vpop.eup %2881  ;;  %2887 = vrcp.f32 %v7734_v50  ;;  %v2300_v47 = vand.u32 2147483648, %v7734_v50  ;;  %v2298_v60 = vand.u32 2147483647, %v7734_v50  ;;  %vm2294_vm3 = vweird.f32 %v7734_v50 }
 0x5d4   :  { %v2884_v24 = vpop.eup %2883  ;;  %v2270_v8 = vmul.f32 %v2882_v26, %v2268_v35  ;;  %vm2275_vm9 = vweird.f32 %v2882_v26  ;;  %vm2407_vm8 = vcmp.eq.f32.partialorder %v2406_v16, 8.507059e+37 }
 0x5d5   :  { %v2378_v51 = vmul.f32 %v2884_v24, %v2376_v62  ;;  %vm2383_vm10 = vweird.f32 %v2884_v24  ;;  %vm2276_vm13 = vmor %vm2274_vm11, %vm2275_vm9  ;;  %v2301_v41 = vor.u32 1.1754944e-38, %v2300_v47  ;;  %vm2299_vm7 = vcmp.eq.f32.partialorder %v2298_v60, 8.507059e+37  ;;  %v2637_v60 = vld [vmem:[%s7888_s11 + $0x48] sm:$0xff] }
 0x5d6   :  { %v7737_v27 = vpop.eup %2885  ;;  %v2271_v15 = vsub.f32 1.0, %v2270_v8  ;;  %vm2384_vm15 = vmor %vm2382_vm12, %vm2383_vm10 }
 0x5d7   :  { %v2398_v57 = vmul.f32 %v7737_v27, %v7731_v38  ;;  %v2379_v42 = vsub.f32 1.0, %v2378_v51  ;;  %vm2403_vm2 = vweird.f32 %v7737_v27  ;;  %v2602_v51 = vld [vmem:[%s7887_s9 + $0x70] sm:$0xff] }
 0x5d8   :  { %v2272_v5 = vmul.f32 %v2882_v26, %v2271_v15  ;;  %vm2404_vm6 = vmor %vm2402_vm4, %vm2403_vm2  ;;  %v2596_v15 = vld [vmem:[%s7887_s9 + $0x40] sm:$0xff] }
 0x5d9   :  { %v2888_v11 = vpop.eup %2887  ;;  %v2399_v10 = vsub.f32 1.0, %v2398_v57  ;;  %v2380_v59 = vmul.f32 %v2884_v24, %v2379_v42  ;;  %v2595_v42 = vld [vmem:[%s7887_s9 + $0x38] sm:$0xff] }
 0x5da   :  { %v2273_v36 = vadd.f32 %v2882_v26, %v2272_v5  ;;  %v2290_v19 = vmul.f32 %v2888_v11, %v7734_v50  ;;  %vm2295_vm1 = vweird.f32 %v2888_v11 }
 0x5db   :  { %v2400_v4 = vmul.f32 %v7737_v27, %v2399_v10  ;;  %v2381_v34 = vadd.f32 %v2884_v24, %v2380_v59  ;;  %vm2296_vm5 = vmor %vm2294_vm3, %vm2295_vm1  ;;  %v2592_v10 = vld [vmem:[%s7887_s9 + $0x20] sm:$0xff] }
 0x5dc   :  { %v2277_v30 = vsel %vm2276_vm13, %v2882_v26, %v2273_v36  ;;  %v2291_v52 = vsub.f32 1.0, %v2290_v19  ;;  %v2590_v36 = vld [vmem:[%s7887_s9 + $0x10] sm:$0xff]  ;;  %v2589_v19 = vld [vmem:[%s7887_s9 + $0x8] sm:$0xff] }
 0x5dd   :  { %v2282_v58 = vsel %vm2279_vm14, %v2281_v20, %v2277_v30  ;;  %v2369_v12 = vpop.f32.mrf.mxu3  ;;  %v2385_v37 = vsel %vm2384_vm15, %v2884_v24, %v2381_v34  ;;  %v2401_v9 = vadd.f32 %v7737_v27, %v2400_v4  ;;  %v2588_v34 = vld [vmem:[%s7887_s9] sm:$0xff]  ;;  %v2643_v30 = vld [vmem:[%s7888_s11 + $0x78] sm:$0xff] }
 0x5de   :  { %v2305_v32 = vmul.f32 %v2304_v61, %v2282_v58  ;;  %v2292_v31 = vmul.f32 %v2888_v11, %v2291_v52  ;;  %v2390_v13 = vsel %vm2387_vm0, %v2389_v40, %v2385_v37  ;;  %v2412_v21 = vadd.f32 %v7504_v3, %v2369_v12  ;;  %v2642_v52 = vld [vmem:[%s7888_s11 + $0x70] sm:$0xff]  ;;  %2648 = vmatpush.msrb.mxu3 %v2643_v30  ;;  %v2641_v12 = vld [vmem:[%s7888_s11 + $0x68] sm:$0xff]  ;;  %v2640_v37 = vld [vmem:[%s7888_s11 + $0x60] sm:$0xff] }
 0x5df   :  { %v2405_v44 = vsel %vm2404_vm6, %v7737_v27, %v2401_v9  ;;  %v2600_v27 = vld [vmem:[%s7887_s9 + $0x60] sm:$0xff] }
 0x5e0   :  { %v2306_v54 = vadd.f32 %v2305_v32, %v2202_v17  ;;  %v2413_v28 = vmul.f32 %v2412_v21, %v2390_v13  ;;  %v2293_v45 = vadd.f32 %v2888_v11, %v2292_v31  ;;  %v2410_v1 = vsel %vm2407_vm8, %v2409_v49, %v2405_v44  ;;  %2649 = vmatpush.msrb.mxu3 %v2642_v52  ;;  %v2639_v32 = vld [vmem:[%s7888_s11 + $0x58] sm:$0xff]  ;;  %v2638_v13 = vld [vmem:[%s7888_s11 + $0x50] sm:$0xff] }
 0x5e1   :  { %v2416_v62 = vsub.f32 1.0, %v2410_v1  ;;  %v2418_v24 = vmul.f32 %v2410_v1, %v7522_v14  ;;  %v2601_v14 = vld [vmem:[%s7887_s9 + $0x68] sm:$0xff] }
 0x5e2   :  { %2889 = vtanh.f32 %v2306_v54  ;;  %v2414_v3 = vadd.f32 %v2413_v28, %v218_v56  ;;  %v2297_v39 = vsel %vm2296_vm5, %v2888_v11, %v2293_v45  ;;  %v2598_v56 = vld [vmem:[%s7887_s9 + $0x50] sm:$0xff]  ;;  %2650 = vmatpush.msrb.mxu3 %v2641_v12 }
 0x5e3   :  { %v2302_v55 = vsel %vm2299_vm7, %v2301_v41, %v2297_v39 }
 0x5e4   :  { %2891 = vtanh.f32 %v2414_v3  ;;  %v2308_v18 = vsub.f32 1.0, %v2302_v55  ;;  %v2310_v38 = vmul.f32 %v2302_v55, %v7518_v29  ;;  %v2603_v29 = vld [vmem:[%s7887_s9 + $0x78] sm:$0xff]  ;;  %2651 = vmatpush.msrb.mxu3 %v2640_v37  ;;  %v2636_v3 = vld [vmem:[%s7888_s11 + $0x40] sm:$0xff] }
 0x5e5   :  { %2608 = vmatpush.msra.mxu2 %v2603_v29  ;;  %v2635_v55 = vld [vmem:[%s7888_s11 + $0x38] sm:$0xff] }
 0x5e6   :  { %2652 = vmatpush.msrb.mxu3 %v2639_v32 }
 0x5e7   :  { %2609 = vmatpush.msra.mxu2 %v2602_v51  ;;  %v2633_v51 = vld [vmem:[%s7888_s11 + $0x28] sm:$0xff] }
 0x5e8   :  { %v2890_v35 = vpop.eup %2889  ;;  %2653 = vmatpush.msrb.mxu3 %v2638_v13 }
 0x5e9   :  { %v2309_v6 = vmul.f32 %v2890_v35, %v2308_v18  ;;  %2610 = vmatpush.msra.mxu2 %v2601_v14  ;;  %v3337_v35 = vld [vmem:[%s7884_s8] ss:$0 sm:$0xff] }
 0x5ea   :  { %v2892_v22 = vpop.eup %2891  ;;  %2654 = vmatpush.msrb.mxu3 %v2637_v60 }
 0x5eb   :  { %v2417_v50 = vmul.f32 %v2892_v22, %v2416_v62  ;;  %v7759_v26 = vadd.f32 %v2310_v38, %v2309_v6  ;;  %2611 = vmatpush.msra.mxu2 %v2600_v27  ;;  %v2634_v38 = vld [vmem:[%s7888_s11 + $0x30] sm:$0xff] }
 0x5ec   :  { %2655 = vmatpush.msrb.mxu3 %v2636_v3 }
 0x5ed   :  { %2496 = vmatmul.f32.vlgmr.msra.gmra.mxu3 %v7759_v26  ;;  %v2419_v8 = vadd.f32 %v2418_v24, %v2417_v50  ;;  %2612 = vmatpush.msra.mxu2 %v2599_v48  ;;  %v2632_v48 = vld [vmem:[%s7888_s11 + $0x20] sm:$0xff] }
 0x5ee   :  { %2656 = vmatpush.msrb.mxu3 %v2635_v55 }
 0x5ef   :  { %2436 = vmatmul.f32.vlgmr.msrb.gmra.mxu0 %v2419_v8  ;;  %2456 = vmatmul.f32.vlgmr.msrb.gmra.mxu1 %v2419_v8 }
 0x5f0   :  { %2476 = vmatmul.f32.vlgmr.msrb.gmra.mxu2 %v2419_v8  ;;  %2657 = vmatpush.msrb.mxu3 %v2634_v38 }
 0x5f1   :  { %2613 = vmatpush.msra.mxu2 %v2598_v56 }
 0x5f2   :  { %2658 = vmatpush.msrb.mxu3 %v2633_v51 }
 0x5f3   :  { %2614 = vmatpush.msra.mxu2 %v2597_v63  ;;  %v2630_v63 = vld [vmem:[%s7888_s11 + $0x10] sm:$0xff] }
 0x5f4   :  { %2659 = vmatpush.msrb.mxu3 %v2632_v48 }
 0x5f5   :  { %2615 = vmatpush.msra.mxu2 %v2596_v15 }
 0x5f7   :  { %2516 = vmatmul.f32.vlgmr.msra.gmra.mxu0 %v7759_v26  ;;  %2536 = vmatmul.f32.vlgmr.msra.gmra.mxu1 %v7759_v26 }
 0x5f8   :  { %2616 = vmatpush.msra.mxu2 %v2595_v42 }
 0x5fa   :  { %2617 = vmatpush.msra.mxu2 %v2594_v43  ;;  %v2628_v43 = vld [vmem:[%s7888_s11] sm:$0xff] }
 0x66c   :  { %v2437_v17 = vpop.f32.mrf.mxu0  ;;  %v2457_v46 = vpop.f32.mrf.mxu1 }
 0x66d   :  { %v2438_v33 = vadd.f32 %v2437_v17, %v8886_v7  ;;  %v2458_v0 = vadd.f32 %v2457_v46, %v8890_v53  ;;  %v2593_v7 = vld [vmem:[%s7887_s9 + $0x28] sm:$0xff]  ;;  %v2591_v53 = vld [vmem:[%s7887_s9 + $0x18] sm:$0xff] }
 0x66e   :  { %2618 = vmatpush.msra.mxu2 %v2593_v7 }
 0x670   :  { %v2497_v57 = vpop.f32.mrf.mxu3  ;;  %2619 = vmatpush.msra.mxu2 %v2592_v10 }
 0x671   :  { %v2540_v5 = vadd.f32 %v2497_v57, %v2438_v33 }
 0x672   :  { %2620 = vmatpush.msra.mxu2 %v2591_v53 }
 0x673   :  { %v2736_v11 = vmul.f32 -1.442695, %v2540_v5  ;;  %v2477_v44 = vpop.f32.mrf.mxu2  ;;  %v2629_v5 = vld [vmem:[%s7888_s11 + $0x8] sm:$0xff] }
 0x674   :  { %v2517_v2 = vpop.f32.mrf.mxu0  ;;  %2621 = vmatpush.msra.mxu2 %v2590_v36  ;;  %v2537_v16 = vpop.f32.mrf.mxu1  ;;  %v2478_v22 = vadd.f32 %v2477_v44, %v8844_v23  ;;  %v2631_v23 = vld [vmem:[%s7888_s11 + $0x18] sm:$0xff] }
 0x675   :  { %2893 = vpow2.f32 %v2736_v11  ;;  %v2560_v61 = vadd.f32 %v2517_v2, %v2458_v0  ;;  %v2580_v62 = vadd.f32 %v3337_v35, %v2537_v16  ;;  %2660 = vmatpush.msrb.mxu3 %v2631_v23  ;;  %v2741_v0 = vld [vmem:[%s7886_s10] ss:$0 sm:$0xff] }
 0x676   :  { %2622 = vmatpush.msra.mxu2 %v2589_v19 }
 0x677   :  { %v2737_v59 = vmul.f32 -1.442695, %v2560_v61  ;;  %2661 = vmatpush.msrb.mxu3 %v2630_v63 }
 0x678   :  { %2623 = vmatpush.msra.mxu2 %v2588_v34 }
 0x679   :  { %2895 = vpow2.f32 %v2737_v59  ;;  %2662 = vmatpush.msrb.mxu3 %v2629_v5 }
 0x67b   :  { %v2894_v20 = vpop.eup %2893  ;;  %2663 = vmatpush.msrb.mxu3 %v2628_v43 }
 0x67c   :  { %v2544_v4 = vadd.f32 1.0, %v2894_v20 }
 0x67e   :  { %2897 = vrcp.f32 %v2544_v4  ;;  %v2556_v25 = vand.u32 2147483648, %v2544_v4  ;;  %v2554_v45 = vand.u32 2147483647, %v2544_v4  ;;  %vm2550_vm10 = vweird.f32 %v2544_v4 }
 0x67f   :  { %v2896_v40 = vpop.eup %2895 }
 0x680   :  { %v2564_v58 = vadd.f32 1.0, %v2896_v40  ;;  %v2557_v49 = vor.u32 1.1754944e-38, %v2556_v25  ;;  %vm2555_vm12 = vcmp.eq.f32.partialorder %v2554_v45, 8.507059e+37 }
 0x682   :  { %2899 = vrcp.f32 %v2564_v58  ;;  %v2576_v24 = vand.u32 2147483648, %v2564_v58  ;;  %vm2570_vm14 = vweird.f32 %v2564_v58  ;;  %v2574_v29 = vand.u32 2147483647, %v2564_v58 }
 0x684   :  { %v2898_v47 = vpop.eup %2897  ;;  %v2577_v56 = vor.u32 1.1754944e-38, %v2576_v24  ;;  %vm2575_vm0 = vcmp.eq.f32.partialorder %v2574_v29, 8.507059e+37 }
 0x685   :  { %v2546_v31 = vmul.f32 %v2898_v47, %v2544_v4  ;;  %vm2551_vm9 = vweird.f32 %v2898_v47 }
 0x686   :  { %vm2552_vm11 = vmor %vm2550_vm10, %vm2551_vm9 }
 0x687   :  { %v2547_v21 = vsub.f32 1.0, %v2546_v31 }
 0x688   :  { %v2900_v9 = vpop.eup %2899 }
 0x689   :  { %v2566_v54 = vmul.f32 %v2900_v9, %v2564_v58  ;;  %v2548_v28 = vmul.f32 %v2898_v47, %v2547_v21  ;;  %vm2571_vm13 = vweird.f32 %v2900_v9 }
 0x68a   :  { %vm2572_vm15 = vmor %vm2570_vm14, %vm2571_vm13 }
 0x68b   :  { %v2567_v39 = vsub.f32 1.0, %v2566_v54  ;;  %v2549_v41 = vadd.f32 %v2898_v47, %v2548_v28 }
 0x68d   :  { %v2568_v1 = vmul.f32 %v2900_v9, %v2567_v39  ;;  %v2553_v18 = vsel %vm2552_vm11, %v2898_v47, %v2549_v41 }
 0x68e   :  { %v2558_v6 = vsel %vm2555_vm12, %v2557_v49, %v2553_v18 }
 0x68f   :  { %v2569_v50 = vadd.f32 %v2900_v9, %v2568_v1  ;;  %v2581_v8 = vmul.f32 %v2580_v62, %v2558_v6 }
 0x691   :  { %v2582_v14 = vadd.f32 %v2581_v8, %v2478_v22  ;;  %v2573_v27 = vsel %vm2572_vm15, %v2900_v9, %v2569_v50 }
 0x692   :  { %v2578_v17 = vsel %vm2575_vm0, %v2577_v56, %v2573_v27 }
 0x693   :  { %2901 = vtanh.f32 %v2582_v14  ;;  %v2584_v15 = vsub.f32 1.0, %v2578_v17  ;;  %v2586_v57 = vmul.f32 %v2578_v17, %v7759_v26  ;;  %v2742_v26 = vld [vmem:[%s7889_s12] ss:$0 sm:$0xff] }
 0x699   :  { %v2902_v33 = vpop.eup %2901 }
 0x69a   :  { %v2585_v46 = vmul.f32 %v2902_v33, %v2584_v15 }
 0x69c   :  { %v2587_v42 = vadd.f32 %v2586_v57, %v2585_v46 }
 0x69e   :  { %2624 = vmatmul.f32.vlgmr.msra.gmra.mxu2 %v2587_v42 }
 0x721   :  { %v2625_v11 = vpop.f32.mrf.mxu2 }
 0x722   :  { %v2626_v2 = vadd.f32 %v2741_v0, %v2625_v11 }
 0x724   :  { %2664 = vmatmul.f32.vlgmr.msrb.gmra.mxu3 %v2626_v2 }
 0x7a7   :  { %v2665_v7 = vpop.f32.mrf.mxu3 }
 0x7a8   :  { %v2666_v61 = vadd.f32 %v2742_v26, %v2665_v7 }
 0x7aa   :  { %2668 = vmax.xlane.f32.xlu0 %v2666_v61 }
 0x81d   :  { %v2669_v10 = vpop.xlane.xlu0 %2668 }
 0x81e   :  { %v2670_v59 = vsub.f32 %v2666_v61, %v2669_v10 }
 0x820   :  { %v2671_v53 = vmul.f32 1.442695, %v2670_v59 }
 0x822   :  { %2903 = vpow2.f32 %v2671_v53 }
 0x828   :  { %v2904_v36 = vpop.eup %2903 }
 0x829   :  { %2673 = vadd.xlane.f32.xlu0 %v2904_v36 }
 0x89c   :  { %v2674_v19 = vpop.xlane.xlu0 %2673 }
 0x89d   :  { %2905 = vrcp.f32 %v2674_v19 }
 0x8a3   :  { %v2906_v20 = vpop.eup %2905 }
 0x8a4   :  { %v2676_v4 = vmul.f32 %v2906_v20, %v2904_v36 }
 0x8a6   :  { %2677 = vst [vmem:[%s7890_s13] sm:$0xff] %v2676_v4 }

</bundles_post_ra>
